<compile_context>
chip_gen: v7x
topology: tpu7x:2x2x1
jax: 0.10.0
libtpu: 0.0.40
codegen_flags: <defaults>
</compile_context>

<pallas_src>
import math
import jax
import jax.numpy as jnp
from jax import lax
from jax.experimental import pallas as pl
from jax.experimental.pallas import tpu as pltpu

# ----------------------------- configuration --------------------------------
B = 2
RAD_SEQ = 8                       # rad_seq_len
CAM_SEQ = 8                       # cam_seq_len
TOTAL_SEQ = RAD_SEQ + CAM_SEQ     # maxToks
N = TOTAL_SEQ - 1                 # transformer valid length: total_toks[:, :-1]
NP = TOTAL_SEQ                    # padded (sublane-aligned) compute length
BN = B * NP                       # batch folded into matmul rows
RAD_NTOK = 16
CAM_NTOK = 16
V = RAD_NTOK + CAM_NTOK           # total_nToks == embedding vocab == nPred
C = 32                            # lEmb
NHEAD = 2
DHEAD = 16
INNER = NHEAD * DHEAD             # attention inner dim (== C here)
RMLP = 2
HID = RMLP * C
NLAYER = 2
LN_EPS = 1e-5
NEG_FILL = -1e30                  # finite "masked" fill (safer than -FLT_MAX)


# ------------------------------ kernel helpers -------------------------------
def _ln(x, g, b):
    mu = jnp.mean(x, axis=-1, keepdims=True)
    var = jnp.mean((x - mu) ** 2, axis=-1, keepdims=True)
    return (x - mu) * lax.rsqrt(var + LN_EPS) * g + b


# ------------------------------ fused Pallas kernel --------------------------
def gpt_fused_kernel(tok_ref, emb_ref, pos_ref,
                     g1_ref, b1_ref, wqkv_ref, bqkv_ref, wproj_ref, bproj_ref,
                     g2_ref, b2_ref, wfc_ref, bfc_ref, wfc2_ref, bfc2_ref,
                     gf_ref, bf_ref, wh_ref, bh_ref, mask_ref, tgt_ref,
                     loss_ref, amax_ref):
    """Embedding + NLAYER pre-LN GPT blocks + head + CE + argmax, fully fused."""
    f32 = jnp.float32
    bf16 = jnp.bfloat16

    # hoisted constants (computed once for the whole fused network)
    col_v = lax.broadcasted_iota(jnp.int32, (BN, V), 1)           # class index
    row_b = lax.broadcasted_iota(jnp.int32, (BN, 1), 0)           # flat row idx
    valid = ((row_b & (NP - 1)) < N).astype(f32)                  # mask pad row
    r_iota = lax.broadcasted_iota(jnp.int32, (NP, NP), 0)
    c_iota = lax.broadcasted_iota(jnp.int32, (NP, NP), 1)
    causal = r_iota >= c_iota
    scale = 1.0 / math.sqrt(DHEAD)

    # --- token embedding (one-hot matmul on MXU) + positional embedding ---
    onehot = (tok_ref[...] == col_v).astype(bf16)                 # (BN, V)
    x = jnp.dot(onehot, emb_ref[...], preferred_element_type=f32) + pos_ref[...]

    # --- transformer blocks (static unroll over layers; weights stacked) ---
    for l in range(NLAYER):
        h = _ln(x, g1_ref[l], b1_ref[l])
        qkv = jnp.dot(h.astype(bf16), wqkv_ref[l],
                      preferred_element_type=f32) + bqkv_ref[l]    # (BN, 3*INNER)
        wproj_l = wproj_ref[l]                                     # (INNER, C) bf16
        y_rows = []
        for b in range(B):                                         # static unroll
            qkv_b = qkv[b * NP:(b + 1) * NP, :]
            y_b = jnp.zeros((NP, C), f32)
            for hd in range(NHEAD):                                # static unroll
                q = qkv_b[:, hd * DHEAD:(hd + 1) * DHEAD]
                k = qkv_b[:, INNER + hd * DHEAD:INNER + (hd + 1) * DHEAD]
                v = qkv_b[:, 2 * INNER + hd * DHEAD:2 * INNER + (hd + 1) * DHEAD]
                att = jnp.dot(q, k.T, preferred_element_type=f32) * scale
                att = jnp.where(causal, att, NEG_FILL)
                att = att - jnp.max(att, axis=-1, keepdims=True)
                p = jnp.exp(att)
                p = p * pl.reciprocal(jnp.sum(p, axis=-1, keepdims=True),
                                      approx=True)
                pv = jnp.dot(p, v, preferred_element_type=f32)     # (NP, DHEAD)
                # per-head partial output projection (no lane-axis head concat)
                y_b = y_b + jnp.dot(pv.astype(bf16),
                                    wproj_l[hd * DHEAD:(hd + 1) * DHEAD, :],
                                    preferred_element_type=f32)
            y_rows.append(y_b)
        x = x + jnp.concatenate(y_rows, axis=0) + bproj_ref[l]

        # --- MLP (tanh-GELU; reference Transforming module is external) ---
        h2 = _ln(x, g2_ref[l], b2_ref[l])
        u = jnp.dot(h2.astype(bf16), wfc_ref[l],
                    preferred_element_type=f32) + bfc_ref[l]
        u = jax.nn.gelu(u, approximate=True)
        u = jnp.dot(u.astype(bf16), wfc2_ref[l],
                    preferred_element_type=f32) + bfc2_ref[l]
        x = x + u

    # --- head: final LN + logits + logits_mask fill + mean CE + argmax ---
    xf = _ln(x, gf_ref[...], bf_ref[...])
    logits = jnp.dot(xf.astype(bf16), wh_ref[...],
                     preferred_element_type=f32) + bh_ref[...]     # (BN, V)
    logits = jnp.where(mask_ref[...] != 0, NEG_FILL, logits)       # masked_fill_

    m = jnp.max(logits, axis=-1, keepdims=True)                    # (BN, 1)
    lse = m + jnp.log(jnp.sum(jnp.exp(logits - m), axis=-1, keepdims=True))
    tgt = tgt_ref[...]                                             # (BN, 1) int32
    tgt_logit = jnp.sum(jnp.where(tgt == col_v, logits, 0.0),
                        axis=-1, keepdims=True)
    loss_col = (lse - tgt_logit) * valid                           # (BN, 1)
    loss_ref[0, 0] = jnp.sum(loss_col) * (1.0 / (B * N))           # scalar mean CE

    # argmax over classes (first occurrence, matches torch.argmax tie-break),
    # emitted lane-dense as a (BN, 128) slab (wrapper reads lane 0).
    cand = jnp.where(logits == m, col_v, V)
    amax_col = jnp.min(cand, axis=-1, keepdims=True).astype(jnp.int32)
    amax_ref[...] = jnp.broadcast_to(amax_col, (BN, 128))


# ------------------------------ pallas_call wrapper ---------------------------
_VMEM = pl.BlockSpec(memory_space=pltpu.MemorySpace.VMEM)
_SMEM = pl.BlockSpec(memory_space=pltpu.MemorySpace.SMEM)


def transformer_call(toks_col, tgt_col, pos_tiled, mask_tiled, p):
    args = (toks_col, p['tok_emb'], pos_tiled,
            p['g1'], p['b1'], p['wqkv'], p['bqkv'], p['wproj'], p['bproj'],
            p['g2'], p['b2'], p['wfc'], p['bfc'], p['wfc2'], p['bfc2'],
            p['lnf_g'], p['lnf_b'], p['w_head'], p['b_head'],
            mask_tiled, tgt_col)
    loss, amax = pl.pallas_call(
        gpt_fused_kernel,
        out_shape=(jax.ShapeDtypeStruct((1, 1), jnp.float32),      # mean CE
                   jax.ShapeDtypeStruct((BN, 128), jnp.int32)),    # argmax slab
        in_specs=[_VMEM] * len(args),
        out_specs=(_SMEM, _VMEM),
    )(*args)
    return loss, amax


# ------------------------------ parameters & masks ---------------------------
def init_params(key):
    std = 0.02
    ks = jax.random.split(key, 7)
    bf16 = jnp.bfloat16

    def nrm(k, shape, dtype):
        return (std * jax.random.normal(k, shape, jnp.float32)).astype(dtype)

    return {
        'tok_emb': nrm(ks[0], (V, C), bf16),
        'pos_emb': std * jax.random.normal(ks[1], (TOTAL_SEQ, C), jnp.float32),
        'lnf_g': jnp.ones((1, C), jnp.float32),
        'lnf_b': jnp.zeros((1, C), jnp.float32),
        'w_head': nrm(ks[2], (C, V), bf16),
        'b_head': jnp.zeros((1, V), jnp.float32),
        # per-layer parameters stacked along a leading NLAYER axis
        'g1': jnp.ones((NLAYER, 1, C), jnp.float32),
        'b1': jnp.zeros((NLAYER, 1, C), jnp.float32),
        'g2': jnp.ones((NLAYER, 1, C), jnp.float32),
        'b2': jnp.zeros((NLAYER, 1, C), jnp.float32),
        'wqkv': nrm(ks[3], (NLAYER, C, 3 * INNER), bf16),
        'bqkv': jnp.zeros((NLAYER, 1, 3 * INNER), jnp.float32),
        'wproj': nrm(ks[4], (NLAYER, INNER, C), bf16),
        'bproj': jnp.zeros((NLAYER, 1, C), jnp.float32),
        'wfc': nrm(ks[5], (NLAYER, C, HID), bf16),
        'bfc': jnp.zeros((NLAYER, 1, HID), jnp.float32),
        'wfc2': nrm(ks[6], (NLAYER, HID, C), bf16),
        'bfc2': jnp.zeros((NLAYER, 1, C), jnp.float32),
    }


def build_logits_mask():
    seq = jnp.arange(TOTAL_SEQ)[:, None]
    tok = jnp.arange(V)[None, :]
    mask = ((seq >= RAD_SEQ) & (tok < RAD_NTOK)) | ((seq < RAD_SEQ) & (tok >= RAD_NTOK))
    mask = mask[1:].astype(jnp.int32)                              # (N, V)
    mask = jnp.concatenate([mask, jnp.zeros((NP - N, V), jnp.int32)], axis=0)
    return jnp.tile(mask, (B, 1))                                  # (BN, V)


# ------------------------------ GenRadar forward ------------------------------
def genradar_forward(params, rad_toks, cam_toks, logits_mask_tiled):
    # rad_s == cam_s == 'hard' -> targets are copies of the hard tokens
    rad_targets = rad_toks
    cam_targets = cam_toks

    # faith metrics (hard vs hard)
    rad_faith = jnp.mean((rad_toks == rad_toks).astype(jnp.float32))
    cam_faith = jnp.mean((cam_toks == cam_toks).astype(jnp.float32))

    # sep_embs: shift cam tokens into the joint vocabulary
    cam_toks_shifted = cam_toks + RAD_NTOK
    total_toks = jnp.concatenate([rad_toks, cam_toks_shifted], axis=1)   # (B, NP)

    # padded transformer input: feed all TOTAL_SEQ tokens; causal mask means
    # positions 0..N-1 never see the padded last position; its row is ignored.
    toks_col = total_toks.reshape(BN, 1).astype(jnp.int32)

    targets = jnp.concatenate([rad_targets[:, 1:], cam_targets + RAD_NTOK],
                              axis=1)                                    # (B, N)
    targets_p = jnp.concatenate([targets, jnp.zeros((B, NP - N), jnp.int32)],
                                axis=1)                                  # (B, NP)
    tgt_col = targets_p.reshape(BN, 1).astype(jnp.int32)

    pos_tiled = jnp.tile(params['pos_emb'], (B, 1))                      # (BN, C)

    loss_out, amax_out = transformer_call(toks_col, tgt_col, pos_tiled,
                                          logits_mask_tiled, params)
    loss = loss_out[0, 0]                                 # F.cross_entropy mean
    amax = amax_out[:, 0].reshape(B, NP)[:, :N]           # (B, N)

    # argmax bookkeeping (255 in the torch code == rad_seq_len - 1)
    first_rad_tok = jnp.zeros((B, 1), jnp.int32)
    max_mass_rad = jnp.concatenate([first_rad_tok, amax[:, :RAD_SEQ - 1]], axis=1)
    max_mass_cam = amax[:, RAD_SEQ - 1:]
    cam_modes = max_mass_cam - RAD_NTOK

    # cosine similarity along the sequence dim (eps = 1e-6), mean over batch
    a = (max_mass_cam - RAD_NTOK).astype(jnp.float32)
    b = cam_toks_shifted.astype(jnp.float32)
    num = jnp.sum(a * b, axis=1)
    den = jnp.maximum(jnp.sqrt(jnp.sum(a * a, axis=1)) * jnp.sqrt(jnp.sum(b * b, axis=1)),
                      1e-6)
    sim = jnp.mean(num / den)

    return loss, rad_faith, cam_faith, sim, cam_modes, max_mass_rad


# ------------------------------------ main ------------------------------------
if __name__ == "__main__":
    key = jax.random.PRNGKey(0)
    kp, kr, kc = jax.random.split(key, 3)
    params = init_params(kp)
    logits_mask_tiled = build_logits_mask()

    # pre-discretized 'hard' tokens (stand-ins for rad_vae/cam_vae.discretize)
    rad_toks = jax.random.randint(kr, (B, RAD_SEQ), 0, RAD_NTOK, dtype=jnp.int32)
    cam_toks = jax.random.randint(kc, (B, CAM_SEQ), 0, CAM_NTOK, dtype=jnp.int32)

    fwd = jax.jit(genradar_forward)
    loss, rad_faith, cam_faith, sim, cam_modes, max_mass_rad = fwd(
        params, rad_toks, cam_toks, logits_mask_tiled)
    jax.block_until_ready((loss, sim, cam_modes))
    assert jnp.isfinite(loss)
    print("KERNEL_OK")
</pallas_src>

<mosaic_0001>
module attributes {stable_mosaic.version = 11 : i64} {
  func.func @gpt_fused_kernel(%arg0: memref<32x1xi32, #tpu.memory_space<vmem>>, %arg1: memref<32x32xbf16, #tpu.memory_space<vmem>>, %arg2: memref<32x32xf32, #tpu.memory_space<vmem>>, %arg3: memref<2x1x32xf32, #tpu.memory_space<vmem>>, %arg4: memref<2x1x32xf32, #tpu.memory_space<vmem>>, %arg5: memref<2x32x96xbf16, #tpu.memory_space<vmem>>, %arg6: memref<2x1x96xf32, #tpu.memory_space<vmem>>, %arg7: memref<2x32x32xbf16, #tpu.memory_space<vmem>>, %arg8: memref<2x1x32xf32, #tpu.memory_space<vmem>>, %arg9: memref<2x1x32xf32, #tpu.memory_space<vmem>>, %arg10: memref<2x1x32xf32, #tpu.memory_space<vmem>>, %arg11: memref<2x32x64xbf16, #tpu.memory_space<vmem>>, %arg12: memref<2x1x64xf32, #tpu.memory_space<vmem>>, %arg13: memref<2x64x32xbf16, #tpu.memory_space<vmem>>, %arg14: memref<2x1x32xf32, #tpu.memory_space<vmem>>, %arg15: memref<1x32xf32, #tpu.memory_space<vmem>>, %arg16: memref<1x32xf32, #tpu.memory_space<vmem>>, %arg17: memref<32x32xbf16, #tpu.memory_space<vmem>>, %arg18: memref<1x32xf32, #tpu.memory_space<vmem>>, %arg19: memref<32x32xi32, #tpu.memory_space<vmem>>, %arg20: memref<32x1xi32, #tpu.memory_space<vmem>>, %arg21: memref<1x1xf32, #tpu.memory_space<smem>>, %arg22: memref<32x128xi32, #tpu.memory_space<vmem>>) attributes {dimension_semantics = [], scalar_prefetch = 0 : i64, scratch_operands = 0 : i64, tpu.core_type = #tpu.core_type<tc>} {
    %0 = tpu.iota {dimensions = array<i32: 1>} : vector<32x32xi32>
    %1 = tpu.iota {dimensions = array<i32: 0>} : vector<32x1xi32>
    %c15_i32 = arith.constant 15 : i32
    %2 = vector.broadcast %c15_i32 : i32 to vector<32x1xi32>
    %3 = arith.andi %1, %2 : vector<32x1xi32>
    %c15_i32_0 = arith.constant 15 : i32
    %4 = vector.broadcast %c15_i32_0 : i32 to vector<32x1xi32>
    %5 = arith.cmpi slt, %3, %4 : vector<32x1xi32>
    %6 = arith.extui %5 : vector<32x1xi1> to vector<32x1xi32>
    %7 = arith.sitofp %6 : vector<32x1xi32> to vector<32x1xf32>
    %8 = tpu.iota {dimensions = array<i32: 0>} : vector<16x16xi32>
    %9 = tpu.iota {dimensions = array<i32: 1>} : vector<16x16xi32>
    %10 = arith.cmpi sge, %8, %9 : vector<16x16xi32>
    %c0 = arith.constant 0 : index
    %c0_1 = arith.constant 0 : index
    %11 = vector.load %arg0[%c0, %c0_1] : memref<32x1xi32, #tpu.memory_space<vmem>>, vector<32x1xi32>
    %12 = vector.broadcast %11 : vector<32x1xi32> to vector<32x32xi32>
    %13 = arith.cmpi eq, %12, %0 : vector<32x32xi32>
    %14 = arith.extui %13 : vector<32x32xi1> to vector<32x32xi32>
    %15 = arith.sitofp %14 : vector<32x32xi32> to vector<32x32xf32>
    %16 = arith.truncf %15 : vector<32x32xf32> to vector<32x32xbf16>
    %c0_2 = arith.constant 0 : index
    %c0_3 = arith.constant 0 : index
    %17 = vector.load %arg1[%c0_2, %c0_3] : memref<32x32xbf16, #tpu.memory_space<vmem>>, vector<32x32xbf16>
    %cst = arith.constant dense<0.000000e+00> : vector<32x32xf32>
    %18 = tpu.matmul %16, %17, %cst {dimension_numbers = #tpu.dot_dimension_numbers<[1], [0], [0], [1], [0, 0, 1, 1], [], []>} : vector<32x32xbf16>, vector<32x32xbf16>, vector<32x32xf32> -> vector<32x32xf32>
    %c0_4 = arith.constant 0 : index
    %c0_5 = arith.constant 0 : index
    %19 = vector.load %arg2[%c0_4, %c0_5] : memref<32x32xf32, #tpu.memory_space<vmem>>, vector<32x32xf32>
    %20 = arith.addf %18, %19 : vector<32x32xf32>
    %c0_6 = arith.constant 0 : index
    %c0_7 = arith.constant 0 : index
    %c0_8 = arith.constant 0 : index
    %21 = vector.load %arg3[%c0_6, %c0_7, %c0_8] : memref<2x1x32xf32, #tpu.memory_space<vmem>>, vector<1x1x32xf32>
    %22 = vector.shape_cast %21 : vector<1x1x32xf32> to vector<1x32xf32>
    %c0_9 = arith.constant 0 : index
    %c0_10 = arith.constant 0 : index
    %c0_11 = arith.constant 0 : index
    %23 = vector.load %arg4[%c0_9, %c0_10, %c0_11] : memref<2x1x32xf32, #tpu.memory_space<vmem>>, vector<1x1x32xf32>
    %24 = vector.shape_cast %23 : vector<1x1x32xf32> to vector<1x32xf32>
    %cst_12 = arith.constant dense<0.000000e+00> : vector<32xf32>
    %25 = vector.multi_reduction <add>, %20, %cst_12 [1] : vector<32x32xf32> to vector<32xf32>
    %26 = vector.shape_cast %25 : vector<32xf32> to vector<32x1xf32>
    %cst_13 = arith.constant 3.200000e+01 : f32
    %27 = vector.broadcast %cst_13 : f32 to vector<32x1xf32>
    %28 = arith.divf %26, %27 : vector<32x1xf32>
    %29 = vector.broadcast %28 : vector<32x1xf32> to vector<32x32xf32>
    %30 = arith.subf %20, %29 : vector<32x32xf32>
    %31 = arith.mulf %30, %30 : vector<32x32xf32>
    %cst_14 = arith.constant dense<0.000000e+00> : vector<32xf32>
    %32 = vector.multi_reduction <add>, %31, %cst_14 [1] : vector<32x32xf32> to vector<32xf32>
    %33 = vector.shape_cast %32 : vector<32xf32> to vector<32x1xf32>
    %cst_15 = arith.constant 3.200000e+01 : f32
    %34 = vector.broadcast %cst_15 : f32 to vector<32x1xf32>
    %35 = arith.divf %33, %34 : vector<32x1xf32>
    %36 = vector.broadcast %28 : vector<32x1xf32> to vector<32x32xf32>
    %37 = arith.subf %20, %36 : vector<32x32xf32>
    %cst_16 = arith.constant 9.99999974E-6 : f32
    %38 = vector.broadcast %cst_16 : f32 to vector<32x1xf32>
    %39 = arith.addf %35, %38 : vector<32x1xf32>
    %40 = math.rsqrt %39 : vector<32x1xf32>
    %41 = vector.broadcast %40 : vector<32x1xf32> to vector<32x32xf32>
    %42 = arith.mulf %37, %41 : vector<32x32xf32>
    %43 = vector.broadcast %22 : vector<1x32xf32> to vector<32x32xf32>
    %44 = arith.mulf %42, %43 : vector<32x32xf32>
    %45 = vector.broadcast %24 : vector<1x32xf32> to vector<32x32xf32>
    %46 = arith.addf %44, %45 : vector<32x32xf32>
    %47 = arith.truncf %46 : vector<32x32xf32> to vector<32x32xbf16>
    %c0_17 = arith.constant 0 : index
    %c0_18 = arith.constant 0 : index
    %c0_19 = arith.constant 0 : index
    %48 = vector.load %arg5[%c0_17, %c0_18, %c0_19] : memref<2x32x96xbf16, #tpu.memory_space<vmem>>, vector<1x32x96xbf16>
    %49 = vector.shape_cast %48 : vector<1x32x96xbf16> to vector<32x96xbf16>
    %cst_20 = arith.constant dense<0.000000e+00> : vector<32x96xf32>
    %50 = tpu.matmul %47, %49, %cst_20 {dimension_numbers = #tpu.dot_dimension_numbers<[1], [0], [0], [1], [0, 0, 1, 1], [], []>} : vector<32x32xbf16>, vector<32x96xbf16>, vector<32x96xf32> -> vector<32x96xf32>
    %c0_21 = arith.constant 0 : index
    %c0_22 = arith.constant 0 : index
    %c0_23 = arith.constant 0 : index
    %51 = vector.load %arg6[%c0_21, %c0_22, %c0_23] : memref<2x1x96xf32, #tpu.memory_space<vmem>>, vector<1x1x96xf32>
    %52 = vector.shape_cast %51 : vector<1x1x96xf32> to vector<1x96xf32>
    %53 = vector.broadcast %52 : vector<1x96xf32> to vector<32x96xf32>
    %54 = arith.addf %50, %53 : vector<32x96xf32>
    %c0_24 = arith.constant 0 : index
    %c0_25 = arith.constant 0 : index
    %c0_26 = arith.constant 0 : index
    %55 = vector.load %arg7[%c0_24, %c0_25, %c0_26] : memref<2x32x32xbf16, #tpu.memory_space<vmem>>, vector<1x32x32xbf16>
    %56 = vector.shape_cast %55 : vector<1x32x32xbf16> to vector<32x32xbf16>
    %57 = vector.extract_strided_slice %54 {offsets = [0, 0], sizes = [16, 96], strides = [1, 1]} : vector<32x96xf32> to vector<16x96xf32>
    %cst_27 = arith.constant 0.000000e+00 : f32
    %58 = vector.broadcast %cst_27 : f32 to vector<16x32xf32>
    %59 = vector.extract_strided_slice %57 {offsets = [0, 0], sizes = [16, 16], strides = [1, 1]} : vector<16x96xf32> to vector<16x16xf32>
    %60 = vector.extract_strided_slice %57 {offsets = [0, 32], sizes = [16, 16], strides = [1, 1]} : vector<16x96xf32> to vector<16x16xf32>
    %61 = vector.extract_strided_slice %57 {offsets = [0, 64], sizes = [16, 16], strides = [1, 1]} : vector<16x96xf32> to vector<16x16xf32>
    %62 = tpu.transpose %60, [1, 0] : vector<16x16xf32> -> vector<16x16xf32>
    %cst_28 = arith.constant dense<0.000000e+00> : vector<16x16xf32>
    %63 = tpu.matmul %59, %62, %cst_28 {dimension_numbers = #tpu.dot_dimension_numbers<[1], [0], [0], [1], [0, 0, 1, 1], [], []>} : vector<16x16xf32>, vector<16x16xf32>, vector<16x16xf32> -> vector<16x16xf32>
    %cst_29 = arith.constant 2.500000e-01 : f32
    %64 = vector.broadcast %cst_29 : f32 to vector<16x16xf32>
    %65 = arith.mulf %63, %64 : vector<16x16xf32>
    %cst_30 = arith.constant -1.000000e+30 : f32
    %66 = vector.broadcast %cst_30 : f32 to vector<16x16xf32>
    %67 = arith.select %10, %65, %66 : vector<16x16xi1>, vector<16x16xf32>
    %cst_31 = arith.constant dense<0xFF800000> : vector<16xf32>
    %68 = vector.multi_reduction <maximumf>, %67, %cst_31 [1] : vector<16x16xf32> to vector<16xf32>
    %69 = vector.shape_cast %68 : vector<16xf32> to vector<16x1xf32>
    %70 = vector.broadcast %69 : vector<16x1xf32> to vector<16x16xf32>
    %71 = arith.subf %67, %70 : vector<16x16xf32>
    %72 = math.exp %71 : vector<16x16xf32>
    %cst_32 = arith.constant dense<0.000000e+00> : vector<16xf32>
    %73 = vector.multi_reduction <add>, %72, %cst_32 [1] : vector<16x16xf32> to vector<16xf32>
    %74 = vector.shape_cast %73 : vector<16xf32> to vector<16x1xf32>
    %75 = tpu.reciprocal %74 {approx = true} : vector<16x1xf32> -> vector<16x1xf32>
    %76 = vector.broadcast %75 : vector<16x1xf32> to vector<16x16xf32>
    %77 = arith.mulf %72, %76 : vector<16x16xf32>
    %cst_33 = arith.constant dense<0.000000e+00> : vector<16x16xf32>
    %78 = tpu.matmul %77, %61, %cst_33 {dimension_numbers = #tpu.dot_dimension_numbers<[1], [0], [0], [1], [0, 0, 1, 1], [], []>} : vector<16x16xf32>, vector<16x16xf32>, vector<16x16xf32> -> vector<16x16xf32>
    %79 = arith.truncf %78 : vector<16x16xf32> to vector<16x16xbf16>
    %80 = vector.extract_strided_slice %56 {offsets = [0, 0], sizes = [16, 32], strides = [1, 1]} : vector<32x32xbf16> to vector<16x32xbf16>
    %cst_34 = arith.constant dense<0.000000e+00> : vector<16x32xf32>
    %81 = tpu.matmul %79, %80, %cst_34 {dimension_numbers = #tpu.dot_dimension_numbers<[1], [0], [0], [1], [0, 0, 1, 1], [], []>} : vector<16x16xbf16>, vector<16x32xbf16>, vector<16x32xf32> -> vector<16x32xf32>
    %82 = arith.addf %58, %81 : vector<16x32xf32>
    %83 = vector.extract_strided_slice %57 {offsets = [0, 16], sizes = [16, 16], strides = [1, 1]} : vector<16x96xf32> to vector<16x16xf32>
    %84 = vector.extract_strided_slice %57 {offsets = [0, 48], sizes = [16, 16], strides = [1, 1]} : vector<16x96xf32> to vector<16x16xf32>
    %85 = vector.extract_strided_slice %57 {offsets = [0, 80], sizes = [16, 16], strides = [1, 1]} : vector<16x96xf32> to vector<16x16xf32>
    %86 = tpu.transpose %84, [1, 0] : vector<16x16xf32> -> vector<16x16xf32>
    %cst_35 = arith.constant dense<0.000000e+00> : vector<16x16xf32>
    %87 = tpu.matmul %83, %86, %cst_35 {dimension_numbers = #tpu.dot_dimension_numbers<[1], [0], [0], [1], [0, 0, 1, 1], [], []>} : vector<16x16xf32>, vector<16x16xf32>, vector<16x16xf32> -> vector<16x16xf32>
    %cst_36 = arith.constant 2.500000e-01 : f32
    %88 = vector.broadcast %cst_36 : f32 to vector<16x16xf32>
    %89 = arith.mulf %87, %88 : vector<16x16xf32>
    %cst_37 = arith.constant -1.000000e+30 : f32
    %90 = vector.broadcast %cst_37 : f32 to vector<16x16xf32>
    %91 = arith.select %10, %89, %90 : vector<16x16xi1>, vector<16x16xf32>
    %cst_38 = arith.constant dense<0xFF800000> : vector<16xf32>
    %92 = vector.multi_reduction <maximumf>, %91, %cst_38 [1] : vector<16x16xf32> to vector<16xf32>
    %93 = vector.shape_cast %92 : vector<16xf32> to vector<16x1xf32>
    %94 = vector.broadcast %93 : vector<16x1xf32> to vector<16x16xf32>
    %95 = arith.subf %91, %94 : vector<16x16xf32>
    %96 = math.exp %95 : vector<16x16xf32>
    %cst_39 = arith.constant dense<0.000000e+00> : vector<16xf32>
    %97 = vector.multi_reduction <add>, %96, %cst_39 [1] : vector<16x16xf32> to vector<16xf32>
    %98 = vector.shape_cast %97 : vector<16xf32> to vector<16x1xf32>
    %99 = tpu.reciprocal %98 {approx = true} : vector<16x1xf32> -> vector<16x1xf32>
    %100 = vector.broadcast %99 : vector<16x1xf32> to vector<16x16xf32>
    %101 = arith.mulf %96, %100 : vector<16x16xf32>
    %cst_40 = arith.constant dense<0.000000e+00> : vector<16x16xf32>
    %102 = tpu.matmul %101, %85, %cst_40 {dimension_numbers = #tpu.dot_dimension_numbers<[1], [0], [0], [1], [0, 0, 1, 1], [], []>} : vector<16x16xf32>, vector<16x16xf32>, vector<16x16xf32> -> vector<16x16xf32>
    %103 = arith.truncf %102 : vector<16x16xf32> to vector<16x16xbf16>
    %104 = vector.extract_strided_slice %56 {offsets = [16, 0], sizes = [16, 32], strides = [1, 1]} : vector<32x32xbf16> to vector<16x32xbf16>
    %cst_41 = arith.constant dense<0.000000e+00> : vector<16x32xf32>
    %105 = tpu.matmul %103, %104, %cst_41 {dimension_numbers = #tpu.dot_dimension_numbers<[1], [0], [0], [1], [0, 0, 1, 1], [], []>} : vector<16x16xbf16>, vector<16x32xbf16>, vector<16x32xf32> -> vector<16x32xf32>
    %106 = arith.addf %82, %105 : vector<16x32xf32>
    %107 = vector.extract_strided_slice %54 {offsets = [16, 0], sizes = [16, 96], strides = [1, 1]} : vector<32x96xf32> to vector<16x96xf32>
    %cst_42 = arith.constant 0.000000e+00 : f32
    %108 = vector.broadcast %cst_42 : f32 to vector<16x32xf32>
    %109 = vector.extract_strided_slice %107 {offsets = [0, 0], sizes = [16, 16], strides = [1, 1]} : vector<16x96xf32> to vector<16x16xf32>
    %110 = vector.extract_strided_slice %107 {offsets = [0, 32], sizes = [16, 16], strides = [1, 1]} : vector<16x96xf32> to vector<16x16xf32>
    %111 = vector.extract_strided_slice %107 {offsets = [0, 64], sizes = [16, 16], strides = [1, 1]} : vector<16x96xf32> to vector<16x16xf32>
    %112 = tpu.transpose %110, [1, 0] : vector<16x16xf32> -> vector<16x16xf32>
    %cst_43 = arith.constant dense<0.000000e+00> : vector<16x16xf32>
    %113 = tpu.matmul %109, %112, %cst_43 {dimension_numbers = #tpu.dot_dimension_numbers<[1], [0], [0], [1], [0, 0, 1, 1], [], []>} : vector<16x16xf32>, vector<16x16xf32>, vector<16x16xf32> -> vector<16x16xf32>
    %cst_44 = arith.constant 2.500000e-01 : f32
    %114 = vector.broadcast %cst_44 : f32 to vector<16x16xf32>
    %115 = arith.mulf %113, %114 : vector<16x16xf32>
    %cst_45 = arith.constant -1.000000e+30 : f32
    %116 = vector.broadcast %cst_45 : f32 to vector<16x16xf32>
    %117 = arith.select %10, %115, %116 : vector<16x16xi1>, vector<16x16xf32>
    %cst_46 = arith.constant dense<0xFF800000> : vector<16xf32>
    %118 = vector.multi_reduction <maximumf>, %117, %cst_46 [1] : vector<16x16xf32> to vector<16xf32>
    %119 = vector.shape_cast %118 : vector<16xf32> to vector<16x1xf32>
    %120 = vector.broadcast %119 : vector<16x1xf32> to vector<16x16xf32>
    %121 = arith.subf %117, %120 : vector<16x16xf32>
    %122 = math.exp %121 : vector<16x16xf32>
    %cst_47 = arith.constant dense<0.000000e+00> : vector<16xf32>
    %123 = vector.multi_reduction <add>, %122, %cst_47 [1] : vector<16x16xf32> to vector<16xf32>
    %124 = vector.shape_cast %123 : vector<16xf32> to vector<16x1xf32>
    %125 = tpu.reciprocal %124 {approx = true} : vector<16x1xf32> -> vector<16x1xf32>
    %126 = vector.broadcast %125 : vector<16x1xf32> to vector<16x16xf32>
    %127 = arith.mulf %122, %126 : vector<16x16xf32>
    %cst_48 = arith.constant dense<0.000000e+00> : vector<16x16xf32>
    %128 = tpu.matmul %127, %111, %cst_48 {dimension_numbers = #tpu.dot_dimension_numbers<[1], [0], [0], [1], [0, 0, 1, 1], [], []>} : vector<16x16xf32>, vector<16x16xf32>, vector<16x16xf32> -> vector<16x16xf32>
    %129 = arith.truncf %128 : vector<16x16xf32> to vector<16x16xbf16>
    %130 = vector.extract_strided_slice %56 {offsets = [0, 0], sizes = [16, 32], strides = [1, 1]} : vector<32x32xbf16> to vector<16x32xbf16>
    %cst_49 = arith.constant dense<0.000000e+00> : vector<16x32xf32>
    %131 = tpu.matmul %129, %130, %cst_49 {dimension_numbers = #tpu.dot_dimension_numbers<[1], [0], [0], [1], [0, 0, 1, 1], [], []>} : vector<16x16xbf16>, vector<16x32xbf16>, vector<16x32xf32> -> vector<16x32xf32>
    %132 = arith.addf %108, %131 : vector<16x32xf32>
    %133 = vector.extract_strided_slice %107 {offsets = [0, 16], sizes = [16, 16], strides = [1, 1]} : vector<16x96xf32> to vector<16x16xf32>
    %134 = vector.extract_strided_slice %107 {offsets = [0, 48], sizes = [16, 16], strides = [1, 1]} : vector<16x96xf32> to vector<16x16xf32>
    %135 = vector.extract_strided_slice %107 {offsets = [0, 80], sizes = [16, 16], strides = [1, 1]} : vector<16x96xf32> to vector<16x16xf32>
    %136 = tpu.transpose %134, [1, 0] : vector<16x16xf32> -> vector<16x16xf32>
    %cst_50 = arith.constant dense<0.000000e+00> : vector<16x16xf32>
    %137 = tpu.matmul %133, %136, %cst_50 {dimension_numbers = #tpu.dot_dimension_numbers<[1], [0], [0], [1], [0, 0, 1, 1], [], []>} : vector<16x16xf32>, vector<16x16xf32>, vector<16x16xf32> -> vector<16x16xf32>
    %cst_51 = arith.constant 2.500000e-01 : f32
    %138 = vector.broadcast %cst_51 : f32 to vector<16x16xf32>
    %139 = arith.mulf %137, %138 : vector<16x16xf32>
    %cst_52 = arith.constant -1.000000e+30 : f32
    %140 = vector.broadcast %cst_52 : f32 to vector<16x16xf32>
    %141 = arith.select %10, %139, %140 : vector<16x16xi1>, vector<16x16xf32>
    %cst_53 = arith.constant dense<0xFF800000> : vector<16xf32>
    %142 = vector.multi_reduction <maximumf>, %141, %cst_53 [1] : vector<16x16xf32> to vector<16xf32>
    %143 = vector.shape_cast %142 : vector<16xf32> to vector<16x1xf32>
    %144 = vector.broadcast %143 : vector<16x1xf32> to vector<16x16xf32>
    %145 = arith.subf %141, %144 : vector<16x16xf32>
    %146 = math.exp %145 : vector<16x16xf32>
    %cst_54 = arith.constant dense<0.000000e+00> : vector<16xf32>
    %147 = vector.multi_reduction <add>, %146, %cst_54 [1] : vector<16x16xf32> to vector<16xf32>
    %148 = vector.shape_cast %147 : vector<16xf32> to vector<16x1xf32>
    %149 = tpu.reciprocal %148 {approx = true} : vector<16x1xf32> -> vector<16x1xf32>
    %150 = vector.broadcast %149 : vector<16x1xf32> to vector<16x16xf32>
    %151 = arith.mulf %146, %150 : vector<16x16xf32>
    %cst_55 = arith.constant dense<0.000000e+00> : vector<16x16xf32>
    %152 = tpu.matmul %151, %135, %cst_55 {dimension_numbers = #tpu.dot_dimension_numbers<[1], [0], [0], [1], [0, 0, 1, 1], [], []>} : vector<16x16xf32>, vector<16x16xf32>, vector<16x16xf32> -> vector<16x16xf32>
    %153 = arith.truncf %152 : vector<16x16xf32> to vector<16x16xbf16>
    %154 = vector.extract_strided_slice %56 {offsets = [16, 0], sizes = [16, 32], strides = [1, 1]} : vector<32x32xbf16> to vector<16x32xbf16>
    %cst_56 = arith.constant dense<0.000000e+00> : vector<16x32xf32>
    %155 = tpu.matmul %153, %154, %cst_56 {dimension_numbers = #tpu.dot_dimension_numbers<[1], [0], [0], [1], [0, 0, 1, 1], [], []>} : vector<16x16xbf16>, vector<16x32xbf16>, vector<16x32xf32> -> vector<16x32xf32>
    %156 = arith.addf %132, %155 : vector<16x32xf32>
    %157 = tpu.concatenate %106, %156 in 0 : vector<16x32xf32>, vector<16x32xf32> -> vector<32x32xf32>
    %158 = arith.addf %20, %157 : vector<32x32xf32>
    %c0_57 = arith.constant 0 : index
    %c0_58 = arith.constant 0 : index
    %c0_59 = arith.constant 0 : index
    %159 = vector.load %arg8[%c0_57, %c0_58, %c0_59] : memref<2x1x32xf32, #tpu.memory_space<vmem>>, vector<1x1x32xf32>
    %160 = vector.shape_cast %159 : vector<1x1x32xf32> to vector<1x32xf32>
    %161 = vector.broadcast %160 : vector<1x32xf32> to vector<32x32xf32>
    %162 = arith.addf %158, %161 : vector<32x32xf32>
    %c0_60 = arith.constant 0 : index
    %c0_61 = arith.constant 0 : index
    %c0_62 = arith.constant 0 : index
    %163 = vector.load %arg9[%c0_60, %c0_61, %c0_62] : memref<2x1x32xf32, #tpu.memory_space<vmem>>, vector<1x1x32xf32>
    %164 = vector.shape_cast %163 : vector<1x1x32xf32> to vector<1x32xf32>
    %c0_63 = arith.constant 0 : index
    %c0_64 = arith.constant 0 : index
    %c0_65 = arith.constant 0 : index
    %165 = vector.load %arg10[%c0_63, %c0_64, %c0_65] : memref<2x1x32xf32, #tpu.memory_space<vmem>>, vector<1x1x32xf32>
    %166 = vector.shape_cast %165 : vector<1x1x32xf32> to vector<1x32xf32>
    %cst_66 = arith.constant dense<0.000000e+00> : vector<32xf32>
    %167 = vector.multi_reduction <add>, %162, %cst_66 [1] : vector<32x32xf32> to vector<32xf32>
    %168 = vector.shape_cast %167 : vector<32xf32> to vector<32x1xf32>
    %cst_67 = arith.constant 3.200000e+01 : f32
    %169 = vector.broadcast %cst_67 : f32 to vector<32x1xf32>
    %170 = arith.divf %168, %169 : vector<32x1xf32>
    %171 = vector.broadcast %170 : vector<32x1xf32> to vector<32x32xf32>
    %172 = arith.subf %162, %171 : vector<32x32xf32>
    %173 = arith.mulf %172, %172 : vector<32x32xf32>
    %cst_68 = arith.constant dense<0.000000e+00> : vector<32xf32>
    %174 = vector.multi_reduction <add>, %173, %cst_68 [1] : vector<32x32xf32> to vector<32xf32>
    %175 = vector.shape_cast %174 : vector<32xf32> to vector<32x1xf32>
    %cst_69 = arith.constant 3.200000e+01 : f32
    %176 = vector.broadcast %cst_69 : f32 to vector<32x1xf32>
    %177 = arith.divf %175, %176 : vector<32x1xf32>
    %178 = vector.broadcast %170 : vector<32x1xf32> to vector<32x32xf32>
    %179 = arith.subf %162, %178 : vector<32x32xf32>
    %cst_70 = arith.constant 9.99999974E-6 : f32
    %180 = vector.broadcast %cst_70 : f32 to vector<32x1xf32>
    %181 = arith.addf %177, %180 : vector<32x1xf32>
    %182 = math.rsqrt %181 : vector<32x1xf32>
    %183 = vector.broadcast %182 : vector<32x1xf32> to vector<32x32xf32>
    %184 = arith.mulf %179, %183 : vector<32x32xf32>
    %185 = vector.broadcast %164 : vector<1x32xf32> to vector<32x32xf32>
    %186 = arith.mulf %184, %185 : vector<32x32xf32>
    %187 = vector.broadcast %166 : vector<1x32xf32> to vector<32x32xf32>
    %188 = arith.addf %186, %187 : vector<32x32xf32>
    %189 = arith.truncf %188 : vector<32x32xf32> to vector<32x32xbf16>
    %c0_71 = arith.constant 0 : index
    %c0_72 = arith.constant 0 : index
    %c0_73 = arith.constant 0 : index
    %190 = vector.load %arg11[%c0_71, %c0_72, %c0_73] : memref<2x32x64xbf16, #tpu.memory_space<vmem>>, vector<1x32x64xbf16>
    %191 = vector.shape_cast %190 : vector<1x32x64xbf16> to vector<32x64xbf16>
    %cst_74 = arith.constant dense<0.000000e+00> : vector<32x64xf32>
    %192 = tpu.matmul %189, %191, %cst_74 {dimension_numbers = #tpu.dot_dimension_numbers<[1], [0], [0], [1], [0, 0, 1, 1], [], []>} : vector<32x32xbf16>, vector<32x64xbf16>, vector<32x64xf32> -> vector<32x64xf32>
    %c0_75 = arith.constant 0 : index
    %c0_76 = arith.constant 0 : index
    %c0_77 = arith.constant 0 : index
    %193 = vector.load %arg12[%c0_75, %c0_76, %c0_77] : memref<2x1x64xf32, #tpu.memory_space<vmem>>, vector<1x1x64xf32>
    %194 = vector.shape_cast %193 : vector<1x1x64xf32> to vector<1x64xf32>
    %195 = vector.broadcast %194 : vector<1x64xf32> to vector<32x64xf32>
    %196 = arith.addf %192, %195 : vector<32x64xf32>
    %197 = arith.mulf %196, %196 : vector<32x64xf32>
    %198 = arith.mulf %196, %197 : vector<32x64xf32>
    %cst_78 = arith.constant 4.471500e-02 : f32
    %199 = vector.broadcast %cst_78 : f32 to vector<32x64xf32>
    %200 = arith.mulf %199, %198 : vector<32x64xf32>
    %201 = arith.addf %196, %200 : vector<32x64xf32>
    %cst_79 = arith.constant 0.797884583 : f32
    %202 = vector.broadcast %cst_79 : f32 to vector<32x64xf32>
    %203 = arith.mulf %202, %201 : vector<32x64xf32>
    %204 = math.tanh %203 : vector<32x64xf32>
    %cst_80 = arith.constant 1.000000e+00 : f32
    %205 = vector.broadcast %cst_80 : f32 to vector<32x64xf32>
    %206 = arith.addf %205, %204 : vector<32x64xf32>
    %cst_81 = arith.constant 5.000000e-01 : f32
    %207 = vector.broadcast %cst_81 : f32 to vector<32x64xf32>
    %208 = arith.mulf %207, %206 : vector<32x64xf32>
    %209 = arith.mulf %196, %208 : vector<32x64xf32>
    %210 = arith.truncf %209 : vector<32x64xf32> to vector<32x64xbf16>
    %c0_82 = arith.constant 0 : index
    %c0_83 = arith.constant 0 : index
    %c0_84 = arith.constant 0 : index
    %211 = vector.load %arg13[%c0_82, %c0_83, %c0_84] : memref<2x64x32xbf16, #tpu.memory_space<vmem>>, vector<1x64x32xbf16>
    %212 = vector.shape_cast %211 : vector<1x64x32xbf16> to vector<64x32xbf16>
    %cst_85 = arith.constant dense<0.000000e+00> : vector<32x32xf32>
    %213 = tpu.matmul %210, %212, %cst_85 {dimension_numbers = #tpu.dot_dimension_numbers<[1], [0], [0], [1], [0, 0, 1, 1], [], []>} : vector<32x64xbf16>, vector<64x32xbf16>, vector<32x32xf32> -> vector<32x32xf32>
    %c0_86 = arith.constant 0 : index
    %c0_87 = arith.constant 0 : index
    %c0_88 = arith.constant 0 : index
    %214 = vector.load %arg14[%c0_86, %c0_87, %c0_88] : memref<2x1x32xf32, #tpu.memory_space<vmem>>, vector<1x1x32xf32>
    %215 = vector.shape_cast %214 : vector<1x1x32xf32> to vector<1x32xf32>
    %216 = vector.broadcast %215 : vector<1x32xf32> to vector<32x32xf32>
    %217 = arith.addf %213, %216 : vector<32x32xf32>
    %218 = arith.addf %162, %217 : vector<32x32xf32>
    %c1 = arith.constant 1 : index
    %c0_89 = arith.constant 0 : index
    %c0_90 = arith.constant 0 : index
    %219 = vector.load %arg3[%c1, %c0_89, %c0_90] : memref<2x1x32xf32, #tpu.memory_space<vmem>>, vector<1x1x32xf32>
    %220 = vector.shape_cast %219 : vector<1x1x32xf32> to vector<1x32xf32>
    %c1_91 = arith.constant 1 : index
    %c0_92 = arith.constant 0 : index
    %c0_93 = arith.constant 0 : index
    %221 = vector.load %arg4[%c1_91, %c0_92, %c0_93] : memref<2x1x32xf32, #tpu.memory_space<vmem>>, vector<1x1x32xf32>
    %222 = vector.shape_cast %221 : vector<1x1x32xf32> to vector<1x32xf32>
    %cst_94 = arith.constant dense<0.000000e+00> : vector<32xf32>
    %223 = vector.multi_reduction <add>, %218, %cst_94 [1] : vector<32x32xf32> to vector<32xf32>
    %224 = vector.shape_cast %223 : vector<32xf32> to vector<32x1xf32>
    %cst_95 = arith.constant 3.200000e+01 : f32
    %225 = vector.broadcast %cst_95 : f32 to vector<32x1xf32>
    %226 = arith.divf %224, %225 : vector<32x1xf32>
    %227 = vector.broadcast %226 : vector<32x1xf32> to vector<32x32xf32>
    %228 = arith.subf %218, %227 : vector<32x32xf32>
    %229 = arith.mulf %228, %228 : vector<32x32xf32>
    %cst_96 = arith.constant dense<0.000000e+00> : vector<32xf32>
    %230 = vector.multi_reduction <add>, %229, %cst_96 [1] : vector<32x32xf32> to vector<32xf32>
    %231 = vector.shape_cast %230 : vector<32xf32> to vector<32x1xf32>
    %cst_97 = arith.constant 3.200000e+01 : f32
    %232 = vector.broadcast %cst_97 : f32 to vector<32x1xf32>
    %233 = arith.divf %231, %232 : vector<32x1xf32>
    %234 = vector.broadcast %226 : vector<32x1xf32> to vector<32x32xf32>
    %235 = arith.subf %218, %234 : vector<32x32xf32>
    %cst_98 = arith.constant 9.99999974E-6 : f32
    %236 = vector.broadcast %cst_98 : f32 to vector<32x1xf32>
    %237 = arith.addf %233, %236 : vector<32x1xf32>
    %238 = math.rsqrt %237 : vector<32x1xf32>
    %239 = vector.broadcast %238 : vector<32x1xf32> to vector<32x32xf32>
    %240 = arith.mulf %235, %239 : vector<32x32xf32>
    %241 = vector.broadcast %220 : vector<1x32xf32> to vector<32x32xf32>
    %242 = arith.mulf %240, %241 : vector<32x32xf32>
    %243 = vector.broadcast %222 : vector<1x32xf32> to vector<32x32xf32>
    %244 = arith.addf %242, %243 : vector<32x32xf32>
    %245 = arith.truncf %244 : vector<32x32xf32> to vector<32x32xbf16>
    %c1_99 = arith.constant 1 : index
    %c0_100 = arith.constant 0 : index
    %c0_101 = arith.constant 0 : index
    %246 = vector.load %arg5[%c1_99, %c0_100, %c0_101] : memref<2x32x96xbf16, #tpu.memory_space<vmem>>, vector<1x32x96xbf16>
    %247 = vector.shape_cast %246 : vector<1x32x96xbf16> to vector<32x96xbf16>
    %cst_102 = arith.constant dense<0.000000e+00> : vector<32x96xf32>
    %248 = tpu.matmul %245, %247, %cst_102 {dimension_numbers = #tpu.dot_dimension_numbers<[1], [0], [0], [1], [0, 0, 1, 1], [], []>} : vector<32x32xbf16>, vector<32x96xbf16>, vector<32x96xf32> -> vector<32x96xf32>
    %c1_103 = arith.constant 1 : index
    %c0_104 = arith.constant 0 : index
    %c0_105 = arith.constant 0 : index
    %249 = vector.load %arg6[%c1_103, %c0_104, %c0_105] : memref<2x1x96xf32, #tpu.memory_space<vmem>>, vector<1x1x96xf32>
    %250 = vector.shape_cast %249 : vector<1x1x96xf32> to vector<1x96xf32>
    %251 = vector.broadcast %250 : vector<1x96xf32> to vector<32x96xf32>
    %252 = arith.addf %248, %251 : vector<32x96xf32>
    %c1_106 = arith.constant 1 : index
    %c0_107 = arith.constant 0 : index
    %c0_108 = arith.constant 0 : index
    %253 = vector.load %arg7[%c1_106, %c0_107, %c0_108] : memref<2x32x32xbf16, #tpu.memory_space<vmem>>, vector<1x32x32xbf16>
    %254 = vector.shape_cast %253 : vector<1x32x32xbf16> to vector<32x32xbf16>
    %255 = vector.extract_strided_slice %252 {offsets = [0, 0], sizes = [16, 96], strides = [1, 1]} : vector<32x96xf32> to vector<16x96xf32>
    %cst_109 = arith.constant 0.000000e+00 : f32
    %256 = vector.broadcast %cst_109 : f32 to vector<16x32xf32>
    %257 = vector.extract_strided_slice %255 {offsets = [0, 0], sizes = [16, 16], strides = [1, 1]} : vector<16x96xf32> to vector<16x16xf32>
    %258 = vector.extract_strided_slice %255 {offsets = [0, 32], sizes = [16, 16], strides = [1, 1]} : vector<16x96xf32> to vector<16x16xf32>
    %259 = vector.extract_strided_slice %255 {offsets = [0, 64], sizes = [16, 16], strides = [1, 1]} : vector<16x96xf32> to vector<16x16xf32>
    %260 = tpu.transpose %258, [1, 0] : vector<16x16xf32> -> vector<16x16xf32>
    %cst_110 = arith.constant dense<0.000000e+00> : vector<16x16xf32>
    %261 = tpu.matmul %257, %260, %cst_110 {dimension_numbers = #tpu.dot_dimension_numbers<[1], [0], [0], [1], [0, 0, 1, 1], [], []>} : vector<16x16xf32>, vector<16x16xf32>, vector<16x16xf32> -> vector<16x16xf32>
    %cst_111 = arith.constant 2.500000e-01 : f32
    %262 = vector.broadcast %cst_111 : f32 to vector<16x16xf32>
    %263 = arith.mulf %261, %262 : vector<16x16xf32>
    %cst_112 = arith.constant -1.000000e+30 : f32
    %264 = vector.broadcast %cst_112 : f32 to vector<16x16xf32>
    %265 = arith.select %10, %263, %264 : vector<16x16xi1>, vector<16x16xf32>
    %cst_113 = arith.constant dense<0xFF800000> : vector<16xf32>
    %266 = vector.multi_reduction <maximumf>, %265, %cst_113 [1] : vector<16x16xf32> to vector<16xf32>
    %267 = vector.shape_cast %266 : vector<16xf32> to vector<16x1xf32>
    %268 = vector.broadcast %267 : vector<16x1xf32> to vector<16x16xf32>
    %269 = arith.subf %265, %268 : vector<16x16xf32>
    %270 = math.exp %269 : vector<16x16xf32>
    %cst_114 = arith.constant dense<0.000000e+00> : vector<16xf32>
    %271 = vector.multi_reduction <add>, %270, %cst_114 [1] : vector<16x16xf32> to vector<16xf32>
    %272 = vector.shape_cast %271 : vector<16xf32> to vector<16x1xf32>
    %273 = tpu.reciprocal %272 {approx = true} : vector<16x1xf32> -> vector<16x1xf32>
    %274 = vector.broadcast %273 : vector<16x1xf32> to vector<16x16xf32>
    %275 = arith.mulf %270, %274 : vector<16x16xf32>
    %cst_115 = arith.constant dense<0.000000e+00> : vector<16x16xf32>
    %276 = tpu.matmul %275, %259, %cst_115 {dimension_numbers = #tpu.dot_dimension_numbers<[1], [0], [0], [1], [0, 0, 1, 1], [], []>} : vector<16x16xf32>, vector<16x16xf32>, vector<16x16xf32> -> vector<16x16xf32>
    %277 = arith.truncf %276 : vector<16x16xf32> to vector<16x16xbf16>
    %278 = vector.extract_strided_slice %254 {offsets = [0, 0], sizes = [16, 32], strides = [1, 1]} : vector<32x32xbf16> to vector<16x32xbf16>
    %cst_116 = arith.constant dense<0.000000e+00> : vector<16x32xf32>
    %279 = tpu.matmul %277, %278, %cst_116 {dimension_numbers = #tpu.dot_dimension_numbers<[1], [0], [0], [1], [0, 0, 1, 1], [], []>} : vector<16x16xbf16>, vector<16x32xbf16>, vector<16x32xf32> -> vector<16x32xf32>
    %280 = arith.addf %256, %279 : vector<16x32xf32>
    %281 = vector.extract_strided_slice %255 {offsets = [0, 16], sizes = [16, 16], strides = [1, 1]} : vector<16x96xf32> to vector<16x16xf32>
    %282 = vector.extract_strided_slice %255 {offsets = [0, 48], sizes = [16, 16], strides = [1, 1]} : vector<16x96xf32> to vector<16x16xf32>
    %283 = vector.extract_strided_slice %255 {offsets = [0, 80], sizes = [16, 16], strides = [1, 1]} : vector<16x96xf32> to vector<16x16xf32>
    %284 = tpu.transpose %282, [1, 0] : vector<16x16xf32> -> vector<16x16xf32>
    %cst_117 = arith.constant dense<0.000000e+00> : vector<16x16xf32>
    %285 = tpu.matmul %281, %284, %cst_117 {dimension_numbers = #tpu.dot_dimension_numbers<[1], [0], [0], [1], [0, 0, 1, 1], [], []>} : vector<16x16xf32>, vector<16x16xf32>, vector<16x16xf32> -> vector<16x16xf32>
    %cst_118 = arith.constant 2.500000e-01 : f32
    %286 = vector.broadcast %cst_118 : f32 to vector<16x16xf32>
    %287 = arith.mulf %285, %286 : vector<16x16xf32>
    %cst_119 = arith.constant -1.000000e+30 : f32
    %288 = vector.broadcast %cst_119 : f32 to vector<16x16xf32>
    %289 = arith.select %10, %287, %288 : vector<16x16xi1>, vector<16x16xf32>
    %cst_120 = arith.constant dense<0xFF800000> : vector<16xf32>
    %290 = vector.multi_reduction <maximumf>, %289, %cst_120 [1] : vector<16x16xf32> to vector<16xf32>
    %291 = vector.shape_cast %290 : vector<16xf32> to vector<16x1xf32>
    %292 = vector.broadcast %291 : vector<16x1xf32> to vector<16x16xf32>
    %293 = arith.subf %289, %292 : vector<16x16xf32>
    %294 = math.exp %293 : vector<16x16xf32>
    %cst_121 = arith.constant dense<0.000000e+00> : vector<16xf32>
    %295 = vector.multi_reduction <add>, %294, %cst_121 [1] : vector<16x16xf32> to vector<16xf32>
    %296 = vector.shape_cast %295 : vector<16xf32> to vector<16x1xf32>
    %297 = tpu.reciprocal %296 {approx = true} : vector<16x1xf32> -> vector<16x1xf32>
    %298 = vector.broadcast %297 : vector<16x1xf32> to vector<16x16xf32>
    %299 = arith.mulf %294, %298 : vector<16x16xf32>
    %cst_122 = arith.constant dense<0.000000e+00> : vector<16x16xf32>
    %300 = tpu.matmul %299, %283, %cst_122 {dimension_numbers = #tpu.dot_dimension_numbers<[1], [0], [0], [1], [0, 0, 1, 1], [], []>} : vector<16x16xf32>, vector<16x16xf32>, vector<16x16xf32> -> vector<16x16xf32>
    %301 = arith.truncf %300 : vector<16x16xf32> to vector<16x16xbf16>
    %302 = vector.extract_strided_slice %254 {offsets = [16, 0], sizes = [16, 32], strides = [1, 1]} : vector<32x32xbf16> to vector<16x32xbf16>
    %cst_123 = arith.constant dense<0.000000e+00> : vector<16x32xf32>
    %303 = tpu.matmul %301, %302, %cst_123 {dimension_numbers = #tpu.dot_dimension_numbers<[1], [0], [0], [1], [0, 0, 1, 1], [], []>} : vector<16x16xbf16>, vector<16x32xbf16>, vector<16x32xf32> -> vector<16x32xf32>
    %304 = arith.addf %280, %303 : vector<16x32xf32>
    %305 = vector.extract_strided_slice %252 {offsets = [16, 0], sizes = [16, 96], strides = [1, 1]} : vector<32x96xf32> to vector<16x96xf32>
    %cst_124 = arith.constant 0.000000e+00 : f32
    %306 = vector.broadcast %cst_124 : f32 to vector<16x32xf32>
    %307 = vector.extract_strided_slice %305 {offsets = [0, 0], sizes = [16, 16], strides = [1, 1]} : vector<16x96xf32> to vector<16x16xf32>
    %308 = vector.extract_strided_slice %305 {offsets = [0, 32], sizes = [16, 16], strides = [1, 1]} : vector<16x96xf32> to vector<16x16xf32>
    %309 = vector.extract_strided_slice %305 {offsets = [0, 64], sizes = [16, 16], strides = [1, 1]} : vector<16x96xf32> to vector<16x16xf32>
    %310 = tpu.transpose %308, [1, 0] : vector<16x16xf32> -> vector<16x16xf32>
    %cst_125 = arith.constant dense<0.000000e+00> : vector<16x16xf32>
    %311 = tpu.matmul %307, %310, %cst_125 {dimension_numbers = #tpu.dot_dimension_numbers<[1], [0], [0], [1], [0, 0, 1, 1], [], []>} : vector<16x16xf32>, vector<16x16xf32>, vector<16x16xf32> -> vector<16x16xf32>
    %cst_126 = arith.constant 2.500000e-01 : f32
    %312 = vector.broadcast %cst_126 : f32 to vector<16x16xf32>
    %313 = arith.mulf %311, %312 : vector<16x16xf32>
    %cst_127 = arith.constant -1.000000e+30 : f32
    %314 = vector.broadcast %cst_127 : f32 to vector<16x16xf32>
    %315 = arith.select %10, %313, %314 : vector<16x16xi1>, vector<16x16xf32>
    %cst_128 = arith.constant dense<0xFF800000> : vector<16xf32>
    %316 = vector.multi_reduction <maximumf>, %315, %cst_128 [1] : vector<16x16xf32> to vector<16xf32>
    %317 = vector.shape_cast %316 : vector<16xf32> to vector<16x1xf32>
    %318 = vector.broadcast %317 : vector<16x1xf32> to vector<16x16xf32>
    %319 = arith.subf %315, %318 : vector<16x16xf32>
    %320 = math.exp %319 : vector<16x16xf32>
    %cst_129 = arith.constant dense<0.000000e+00> : vector<16xf32>
    %321 = vector.multi_reduction <add>, %320, %cst_129 [1] : vector<16x16xf32> to vector<16xf32>
    %322 = vector.shape_cast %321 : vector<16xf32> to vector<16x1xf32>
    %323 = tpu.reciprocal %322 {approx = true} : vector<16x1xf32> -> vector<16x1xf32>
    %324 = vector.broadcast %323 : vector<16x1xf32> to vector<16x16xf32>
    %325 = arith.mulf %320, %324 : vector<16x16xf32>
    %cst_130 = arith.constant dense<0.000000e+00> : vector<16x16xf32>
    %326 = tpu.matmul %325, %309, %cst_130 {dimension_numbers = #tpu.dot_dimension_numbers<[1], [0], [0], [1], [0, 0, 1, 1], [], []>} : vector<16x16xf32>, vector<16x16xf32>, vector<16x16xf32> -> vector<16x16xf32>
    %327 = arith.truncf %326 : vector<16x16xf32> to vector<16x16xbf16>
    %328 = vector.extract_strided_slice %254 {offsets = [0, 0], sizes = [16, 32], strides = [1, 1]} : vector<32x32xbf16> to vector<16x32xbf16>
    %cst_131 = arith.constant dense<0.000000e+00> : vector<16x32xf32>
    %329 = tpu.matmul %327, %328, %cst_131 {dimension_numbers = #tpu.dot_dimension_numbers<[1], [0], [0], [1], [0, 0, 1, 1], [], []>} : vector<16x16xbf16>, vector<16x32xbf16>, vector<16x32xf32> -> vector<16x32xf32>
    %330 = arith.addf %306, %329 : vector<16x32xf32>
    %331 = vector.extract_strided_slice %305 {offsets = [0, 16], sizes = [16, 16], strides = [1, 1]} : vector<16x96xf32> to vector<16x16xf32>
    %332 = vector.extract_strided_slice %305 {offsets = [0, 48], sizes = [16, 16], strides = [1, 1]} : vector<16x96xf32> to vector<16x16xf32>
    %333 = vector.extract_strided_slice %305 {offsets = [0, 80], sizes = [16, 16], strides = [1, 1]} : vector<16x96xf32> to vector<16x16xf32>
    %334 = tpu.transpose %332, [1, 0] : vector<16x16xf32> -> vector<16x16xf32>
    %cst_132 = arith.constant dense<0.000000e+00> : vector<16x16xf32>
    %335 = tpu.matmul %331, %334, %cst_132 {dimension_numbers = #tpu.dot_dimension_numbers<[1], [0], [0], [1], [0, 0, 1, 1], [], []>} : vector<16x16xf32>, vector<16x16xf32>, vector<16x16xf32> -> vector<16x16xf32>
    %cst_133 = arith.constant 2.500000e-01 : f32
    %336 = vector.broadcast %cst_133 : f32 to vector<16x16xf32>
    %337 = arith.mulf %335, %336 : vector<16x16xf32>
    %cst_134 = arith.constant -1.000000e+30 : f32
    %338 = vector.broadcast %cst_134 : f32 to vector<16x16xf32>
    %339 = arith.select %10, %337, %338 : vector<16x16xi1>, vector<16x16xf32>
    %cst_135 = arith.constant dense<0xFF800000> : vector<16xf32>
    %340 = vector.multi_reduction <maximumf>, %339, %cst_135 [1] : vector<16x16xf32> to vector<16xf32>
    %341 = vector.shape_cast %340 : vector<16xf32> to vector<16x1xf32>
    %342 = vector.broadcast %341 : vector<16x1xf32> to vector<16x16xf32>
    %343 = arith.subf %339, %342 : vector<16x16xf32>
    %344 = math.exp %343 : vector<16x16xf32>
    %cst_136 = arith.constant dense<0.000000e+00> : vector<16xf32>
    %345 = vector.multi_reduction <add>, %344, %cst_136 [1] : vector<16x16xf32> to vector<16xf32>
    %346 = vector.shape_cast %345 : vector<16xf32> to vector<16x1xf32>
    %347 = tpu.reciprocal %346 {approx = true} : vector<16x1xf32> -> vector<16x1xf32>
    %348 = vector.broadcast %347 : vector<16x1xf32> to vector<16x16xf32>
    %349 = arith.mulf %344, %348 : vector<16x16xf32>
    %cst_137 = arith.constant dense<0.000000e+00> : vector<16x16xf32>
    %350 = tpu.matmul %349, %333, %cst_137 {dimension_numbers = #tpu.dot_dimension_numbers<[1], [0], [0], [1], [0, 0, 1, 1], [], []>} : vector<16x16xf32>, vector<16x16xf32>, vector<16x16xf32> -> vector<16x16xf32>
    %351 = arith.truncf %350 : vector<16x16xf32> to vector<16x16xbf16>
    %352 = vector.extract_strided_slice %254 {offsets = [16, 0], sizes = [16, 32], strides = [1, 1]} : vector<32x32xbf16> to vector<16x32xbf16>
    %cst_138 = arith.constant dense<0.000000e+00> : vector<16x32xf32>
    %353 = tpu.matmul %351, %352, %cst_138 {dimension_numbers = #tpu.dot_dimension_numbers<[1], [0], [0], [1], [0, 0, 1, 1], [], []>} : vector<16x16xbf16>, vector<16x32xbf16>, vector<16x32xf32> -> vector<16x32xf32>
    %354 = arith.addf %330, %353 : vector<16x32xf32>
    %355 = tpu.concatenate %304, %354 in 0 : vector<16x32xf32>, vector<16x32xf32> -> vector<32x32xf32>
    %356 = arith.addf %218, %355 : vector<32x32xf32>
    %c1_139 = arith.constant 1 : index
    %c0_140 = arith.constant 0 : index
    %c0_141 = arith.constant 0 : index
    %357 = vector.load %arg8[%c1_139, %c0_140, %c0_141] : memref<2x1x32xf32, #tpu.memory_space<vmem>>, vector<1x1x32xf32>
    %358 = vector.shape_cast %357 : vector<1x1x32xf32> to vector<1x32xf32>
    %359 = vector.broadcast %358 : vector<1x32xf32> to vector<32x32xf32>
    %360 = arith.addf %356, %359 : vector<32x32xf32>
    %c1_142 = arith.constant 1 : index
    %c0_143 = arith.constant 0 : index
    %c0_144 = arith.constant 0 : index
    %361 = vector.load %arg9[%c1_142, %c0_143, %c0_144] : memref<2x1x32xf32, #tpu.memory_space<vmem>>, vector<1x1x32xf32>
    %362 = vector.shape_cast %361 : vector<1x1x32xf32> to vector<1x32xf32>
    %c1_145 = arith.constant 1 : index
    %c0_146 = arith.constant 0 : index
    %c0_147 = arith.constant 0 : index
    %363 = vector.load %arg10[%c1_145, %c0_146, %c0_147] : memref<2x1x32xf32, #tpu.memory_space<vmem>>, vector<1x1x32xf32>
    %364 = vector.shape_cast %363 : vector<1x1x32xf32> to vector<1x32xf32>
    %cst_148 = arith.constant dense<0.000000e+00> : vector<32xf32>
    %365 = vector.multi_reduction <add>, %360, %cst_148 [1] : vector<32x32xf32> to vector<32xf32>
    %366 = vector.shape_cast %365 : vector<32xf32> to vector<32x1xf32>
    %cst_149 = arith.constant 3.200000e+01 : f32
    %367 = vector.broadcast %cst_149 : f32 to vector<32x1xf32>
    %368 = arith.divf %366, %367 : vector<32x1xf32>
    %369 = vector.broadcast %368 : vector<32x1xf32> to vector<32x32xf32>
    %370 = arith.subf %360, %369 : vector<32x32xf32>
    %371 = arith.mulf %370, %370 : vector<32x32xf32>
    %cst_150 = arith.constant dense<0.000000e+00> : vector<32xf32>
    %372 = vector.multi_reduction <add>, %371, %cst_150 [1] : vector<32x32xf32> to vector<32xf32>
    %373 = vector.shape_cast %372 : vector<32xf32> to vector<32x1xf32>
    %cst_151 = arith.constant 3.200000e+01 : f32
    %374 = vector.broadcast %cst_151 : f32 to vector<32x1xf32>
    %375 = arith.divf %373, %374 : vector<32x1xf32>
    %376 = vector.broadcast %368 : vector<32x1xf32> to vector<32x32xf32>
    %377 = arith.subf %360, %376 : vector<32x32xf32>
    %cst_152 = arith.constant 9.99999974E-6 : f32
    %378 = vector.broadcast %cst_152 : f32 to vector<32x1xf32>
    %379 = arith.addf %375, %378 : vector<32x1xf32>
    %380 = math.rsqrt %379 : vector<32x1xf32>
    %381 = vector.broadcast %380 : vector<32x1xf32> to vector<32x32xf32>
    %382 = arith.mulf %377, %381 : vector<32x32xf32>
    %383 = vector.broadcast %362 : vector<1x32xf32> to vector<32x32xf32>
    %384 = arith.mulf %382, %383 : vector<32x32xf32>
    %385 = vector.broadcast %364 : vector<1x32xf32> to vector<32x32xf32>
    %386 = arith.addf %384, %385 : vector<32x32xf32>
    %387 = arith.truncf %386 : vector<32x32xf32> to vector<32x32xbf16>
    %c1_153 = arith.constant 1 : index
    %c0_154 = arith.constant 0 : index
    %c0_155 = arith.constant 0 : index
    %388 = vector.load %arg11[%c1_153, %c0_154, %c0_155] : memref<2x32x64xbf16, #tpu.memory_space<vmem>>, vector<1x32x64xbf16>
    %389 = vector.shape_cast %388 : vector<1x32x64xbf16> to vector<32x64xbf16>
    %cst_156 = arith.constant dense<0.000000e+00> : vector<32x64xf32>
    %390 = tpu.matmul %387, %389, %cst_156 {dimension_numbers = #tpu.dot_dimension_numbers<[1], [0], [0], [1], [0, 0, 1, 1], [], []>} : vector<32x32xbf16>, vector<32x64xbf16>, vector<32x64xf32> -> vector<32x64xf32>
    %c1_157 = arith.constant 1 : index
    %c0_158 = arith.constant 0 : index
    %c0_159 = arith.constant 0 : index
    %391 = vector.load %arg12[%c1_157, %c0_158, %c0_159] : memref<2x1x64xf32, #tpu.memory_space<vmem>>, vector<1x1x64xf32>
    %392 = vector.shape_cast %391 : vector<1x1x64xf32> to vector<1x64xf32>
    %393 = vector.broadcast %392 : vector<1x64xf32> to vector<32x64xf32>
    %394 = arith.addf %390, %393 : vector<32x64xf32>
    %395 = arith.mulf %394, %394 : vector<32x64xf32>
    %396 = arith.mulf %394, %395 : vector<32x64xf32>
    %cst_160 = arith.constant 4.471500e-02 : f32
    %397 = vector.broadcast %cst_160 : f32 to vector<32x64xf32>
    %398 = arith.mulf %397, %396 : vector<32x64xf32>
    %399 = arith.addf %394, %398 : vector<32x64xf32>
    %cst_161 = arith.constant 0.797884583 : f32
    %400 = vector.broadcast %cst_161 : f32 to vector<32x64xf32>
    %401 = arith.mulf %400, %399 : vector<32x64xf32>
    %402 = math.tanh %401 : vector<32x64xf32>
    %cst_162 = arith.constant 1.000000e+00 : f32
    %403 = vector.broadcast %cst_162 : f32 to vector<32x64xf32>
    %404 = arith.addf %403, %402 : vector<32x64xf32>
    %cst_163 = arith.constant 5.000000e-01 : f32
    %405 = vector.broadcast %cst_163 : f32 to vector<32x64xf32>
    %406 = arith.mulf %405, %404 : vector<32x64xf32>
    %407 = arith.mulf %394, %406 : vector<32x64xf32>
    %408 = arith.truncf %407 : vector<32x64xf32> to vector<32x64xbf16>
    %c1_164 = arith.constant 1 : index
    %c0_165 = arith.constant 0 : index
    %c0_166 = arith.constant 0 : index
    %409 = vector.load %arg13[%c1_164, %c0_165, %c0_166] : memref<2x64x32xbf16, #tpu.memory_space<vmem>>, vector<1x64x32xbf16>
    %410 = vector.shape_cast %409 : vector<1x64x32xbf16> to vector<64x32xbf16>
    %cst_167 = arith.constant dense<0.000000e+00> : vector<32x32xf32>
    %411 = tpu.matmul %408, %410, %cst_167 {dimension_numbers = #tpu.dot_dimension_numbers<[1], [0], [0], [1], [0, 0, 1, 1], [], []>} : vector<32x64xbf16>, vector<64x32xbf16>, vector<32x32xf32> -> vector<32x32xf32>
    %c1_168 = arith.constant 1 : index
    %c0_169 = arith.constant 0 : index
    %c0_170 = arith.constant 0 : index
    %412 = vector.load %arg14[%c1_168, %c0_169, %c0_170] : memref<2x1x32xf32, #tpu.memory_space<vmem>>, vector<1x1x32xf32>
    %413 = vector.shape_cast %412 : vector<1x1x32xf32> to vector<1x32xf32>
    %414 = vector.broadcast %413 : vector<1x32xf32> to vector<32x32xf32>
    %415 = arith.addf %411, %414 : vector<32x32xf32>
    %416 = arith.addf %360, %415 : vector<32x32xf32>
    %c0_171 = arith.constant 0 : index
    %c0_172 = arith.constant 0 : index
    %417 = vector.load %arg15[%c0_171, %c0_172] : memref<1x32xf32, #tpu.memory_space<vmem>>, vector<1x32xf32>
    %c0_173 = arith.constant 0 : index
    %c0_174 = arith.constant 0 : index
    %418 = vector.load %arg16[%c0_173, %c0_174] : memref<1x32xf32, #tpu.memory_space<vmem>>, vector<1x32xf32>
    %cst_175 = arith.constant dense<0.000000e+00> : vector<32xf32>
    %419 = vector.multi_reduction <add>, %416, %cst_175 [1] : vector<32x32xf32> to vector<32xf32>
    %420 = vector.shape_cast %419 : vector<32xf32> to vector<32x1xf32>
    %cst_176 = arith.constant 3.200000e+01 : f32
    %421 = vector.broadcast %cst_176 : f32 to vector<32x1xf32>
    %422 = arith.divf %420, %421 : vector<32x1xf32>
    %423 = vector.broadcast %422 : vector<32x1xf32> to vector<32x32xf32>
    %424 = arith.subf %416, %423 : vector<32x32xf32>
    %425 = arith.mulf %424, %424 : vector<32x32xf32>
    %cst_177 = arith.constant dense<0.000000e+00> : vector<32xf32>
    %426 = vector.multi_reduction <add>, %425, %cst_177 [1] : vector<32x32xf32> to vector<32xf32>
    %427 = vector.shape_cast %426 : vector<32xf32> to vector<32x1xf32>
    %cst_178 = arith.constant 3.200000e+01 : f32
    %428 = vector.broadcast %cst_178 : f32 to vector<32x1xf32>
    %429 = arith.divf %427, %428 : vector<32x1xf32>
    %430 = vector.broadcast %422 : vector<32x1xf32> to vector<32x32xf32>
    %431 = arith.subf %416, %430 : vector<32x32xf32>
    %cst_179 = arith.constant 9.99999974E-6 : f32
    %432 = vector.broadcast %cst_179 : f32 to vector<32x1xf32>
    %433 = arith.addf %429, %432 : vector<32x1xf32>
    %434 = math.rsqrt %433 : vector<32x1xf32>
    %435 = vector.broadcast %434 : vector<32x1xf32> to vector<32x32xf32>
    %436 = arith.mulf %431, %435 : vector<32x32xf32>
    %437 = vector.broadcast %417 : vector<1x32xf32> to vector<32x32xf32>
    %438 = arith.mulf %436, %437 : vector<32x32xf32>
    %439 = vector.broadcast %418 : vector<1x32xf32> to vector<32x32xf32>
    %440 = arith.addf %438, %439 : vector<32x32xf32>
    %441 = arith.truncf %440 : vector<32x32xf32> to vector<32x32xbf16>
    %c0_180 = arith.constant 0 : index
    %c0_181 = arith.constant 0 : index
    %442 = vector.load %arg17[%c0_180, %c0_181] : memref<32x32xbf16, #tpu.memory_space<vmem>>, vector<32x32xbf16>
    %cst_182 = arith.constant dense<0.000000e+00> : vector<32x32xf32>
    %443 = tpu.matmul %441, %442, %cst_182 {dimension_numbers = #tpu.dot_dimension_numbers<[1], [0], [0], [1], [0, 0, 1, 1], [], []>} : vector<32x32xbf16>, vector<32x32xbf16>, vector<32x32xf32> -> vector<32x32xf32>
    %c0_183 = arith.constant 0 : index
    %c0_184 = arith.constant 0 : index
    %444 = vector.load %arg18[%c0_183, %c0_184] : memref<1x32xf32, #tpu.memory_space<vmem>>, vector<1x32xf32>
    %445 = vector.broadcast %444 : vector<1x32xf32> to vector<32x32xf32>
    %446 = arith.addf %443, %445 : vector<32x32xf32>
    %c0_185 = arith.constant 0 : index
    %c0_186 = arith.constant 0 : index
    %447 = vector.load %arg19[%c0_185, %c0_186] : memref<32x32xi32, #tpu.memory_space<vmem>>, vector<32x32xi32>
    %c0_i32 = arith.constant 0 : i32
    %448 = vector.broadcast %c0_i32 : i32 to vector<32x32xi32>
    %449 = arith.cmpi ne, %447, %448 : vector<32x32xi32>
    %cst_187 = arith.constant -1.000000e+30 : f32
    %450 = vector.broadcast %cst_187 : f32 to vector<32x32xf32>
    %451 = arith.select %449, %450, %446 : vector<32x32xi1>, vector<32x32xf32>
    %cst_188 = arith.constant dense<0xFF800000> : vector<32xf32>
    %452 = vector.multi_reduction <maximumf>, %451, %cst_188 [1] : vector<32x32xf32> to vector<32xf32>
    %453 = vector.shape_cast %452 : vector<32xf32> to vector<32x1xf32>
    %454 = vector.broadcast %453 : vector<32x1xf32> to vector<32x32xf32>
    %455 = arith.subf %451, %454 : vector<32x32xf32>
    %456 = math.exp %455 : vector<32x32xf32>
    %cst_189 = arith.constant dense<0.000000e+00> : vector<32xf32>
    %457 = vector.multi_reduction <add>, %456, %cst_189 [1] : vector<32x32xf32> to vector<32xf32>
    %458 = vector.shape_cast %457 : vector<32xf32> to vector<32x1xf32>
    %459 = math.log %458 : vector<32x1xf32>
    %460 = arith.addf %453, %459 : vector<32x1xf32>
    %c0_190 = arith.constant 0 : index
    %c0_191 = arith.constant 0 : index
    %461 = vector.load %arg20[%c0_190, %c0_191] : memref<32x1xi32, #tpu.memory_space<vmem>>, vector<32x1xi32>
    %462 = vector.broadcast %461 : vector<32x1xi32> to vector<32x32xi32>
    %463 = arith.cmpi eq, %462, %0 : vector<32x32xi32>
    %cst_192 = arith.constant 0.000000e+00 : f32
    %464 = vector.broadcast %cst_192 : f32 to vector<32x32xf32>
    %465 = arith.select %463, %451, %464 : vector<32x32xi1>, vector<32x32xf32>
    %cst_193 = arith.constant dense<0.000000e+00> : vector<32xf32>
    %466 = vector.multi_reduction <add>, %465, %cst_193 [1] : vector<32x32xf32> to vector<32xf32>
    %467 = vector.shape_cast %466 : vector<32xf32> to vector<32x1xf32>
    %468 = arith.subf %460, %467 : vector<32x1xf32>
    %469 = arith.mulf %468, %7 : vector<32x1xf32>
    %470 = vector.shape_cast %469 : vector<32x1xf32> to vector<1x32x1xf32>
    %cst_194 = arith.constant dense<0.000000e+00> : vector<1xf32>
    %471 = vector.multi_reduction <add>, %470, %cst_194 [1, 2] : vector<1x32x1xf32> to vector<1xf32>
    %472 = vector.shape_cast %471 : vector<1xf32> to vector<1x1x1xf32>
    %473 = vector.extract %472[0, 0, 0] : f32 from vector<1x1x1xf32>
    %cst_195 = arith.constant 0.0333333351 : f32
    %474 = arith.mulf %473, %cst_195 : f32
    %c0_196 = arith.constant 0 : index
    %c0_197 = arith.constant 0 : index
    %475 = memref.load %arg21[%c0_196, %c0_197] : memref<1x1xf32, #tpu.memory_space<smem>>
    memref.store %474, %arg21[%c0_196, %c0_197] : memref<1x1xf32, #tpu.memory_space<smem>>
    %476 = vector.broadcast %453 : vector<32x1xf32> to vector<32x32xf32>
    %477 = arith.cmpf oeq, %451, %476 : vector<32x32xf32>
    %c32_i32 = arith.constant 32 : i32
    %478 = vector.broadcast %c32_i32 : i32 to vector<32x32xi32>
    %479 = arith.select %477, %0, %478 : vector<32x32xi1>, vector<32x32xi32>
    %cst_198 = arith.constant dense<2147483647> : vector<32xi32>
    %480 = vector.multi_reduction <minsi>, %479, %cst_198 [1] : vector<32x32xi32> to vector<32xi32>
    %481 = vector.shape_cast %480 : vector<32xi32> to vector<32x1xi32>
    %482 = vector.shape_cast %481 : vector<32x1xi32> to vector<32x1xi32>
    %483 = vector.broadcast %482 : vector<32x1xi32> to vector<32x128xi32>
    %c0_199 = arith.constant 0 : index
    %c0_200 = arith.constant 0 : index
    %484 = vector.load %arg22[%c0_199, %c0_200] : memref<32x128xi32, #tpu.memory_space<vmem>>, vector<32x128xi32>
    tpu.vector_store %arg22[%c0_199, %c0_200], %483 {strides = array<i32>} : memref<32x128xi32, #tpu.memory_space<vmem>>, vector<32x128xi32>,
    return
  }
}

</mosaic_0001>

<bundles_post_ra>
// kernel: squeeze.3
= control target key start
LH: loop header
LB: loop body
LE: loop exit
PB: predicated region body
PF: predicated region fallthrough
CT: control target
= control target key end

     0   :  { %vm7_vm0 = vcmask 130048   ;;  %s39_s0 = inlined_call_operand.vmem [shape: s32[32], index: 0, kind: input, shape index: {}]   ;;  %s40_s1 = inlined_call_operand.vmem [shape: s32[2,16], index: 1, kind: output, shape index: {}]  }
   0x1   :  { %v4_v0 = vld [vmem:[%s39_s0] sm:$0x1]  ;;  %s22_s0 = smov 112  }
   0x2   :  { %5 = vst [vmem:[#allocation1] sm:$0x1] %v4_v0 }
   0x9   :  { %v9_v1 = vld [vmem:[#allocation1] sm:$0x1]  }
   0xa   :  { %v6_v2 = vld [vmem:[#allocation1] sm:$0x1]   ;;  %10 = vrot.lane.b32.xlu0 %v9_v1, %s22_s0 }
   0xb   :  { %8 = vst.msk [vmem:[#allocation0] sm:$0x1] %vm7_vm0, %v6_v2  }
  0x7c   :  { %v11_v3 = vpop.permute.xlu0 %10  }
  0x7d   :  { %14 = vst.msk [vmem:[#allocation0 + $0x1] sm:$0x1] %vm7_vm0, %v11_v3  }
  0x84   :  { %v18_v4 = vld [vmem:[#allocation0] sm:$0x3] }
  0x85   :  { %20 = vst [vmem:[%s40_s1] sm:$0x3] %v18_v4 }

// kernel: genradar_forward.1
= control target key start
LH: loop header
LB: loop body
LE: loop exit
PB: predicated region body
PF: predicated region fallthrough
CT: control target
= control target key end

     0   :  { %s5189_s0 = inlined_call_operand.vmem [shape: s32[32,1], index: 0, kind: input, shape index: {}]   ;;  %s5190_s1 = inlined_call_operand.vmem [shape: bf16[32,32], index: 1, kind: input, shape index: {}]   ;;  %s5191_s2 = inlined_call_operand.vmem [shape: f32[32,32], index: 2, kind: input, shape index: {}]   ;;  %s5192_s3 = inlined_call_operand.vmem [shape: f32[2,1,32], index: 3, kind: input, shape index: {}]   ;;  %s5193_s4 = inlined_call_operand.vmem [shape: f32[2,1,32], index: 4, kind: input, shape index: {}]   ;;  %s5194_s5 = inlined_call_operand.vmem [shape: bf16[2,32,96], index: 5, kind: input, shape index: {}]   ;;  %s5195_s6 = inlined_call_operand.vmem [shape: f32[2,1,96], index: 6, kind: input, shape index: {}]   ;;  %s5196_s7 = inlined_call_operand.vmem [shape: bf16[2,32,32], index: 7, kind: input, shape index: {}]   ;;  %s5197_s8 = inlined_call_operand.vmem [shape: f32[2,1,32], index: 8, kind: input, shape index: {}]   ;;  %s5198_s9 = inlined_call_operand.vmem [shape: f32[2,1,32], index: 9, kind: input, shape index: {}]   ;;  %s5199_s10 = inlined_call_operand.vmem [shape: f32[2,1,32], index: 10, kind: input, shape index: {}]   ;;  %s5200_s11 = inlined_call_operand.vmem [shape: bf16[2,32,64], index: 11, kind: input, shape index: {}]   ;;  %s5201_s12 = inlined_call_operand.vmem [shape: f32[2,1,64], index: 12, kind: input, shape index: {}]   ;;  %s5202_s13 = inlined_call_operand.vmem [shape: bf16[2,64,32], index: 13, kind: input, shape index: {}]   ;;  %s5203_s14 = inlined_call_operand.vmem [shape: f32[2,1,32], index: 14, kind: input, shape index: {}]   ;;  %s5204_s15 = inlined_call_operand.vmem [shape: f32[1,32], index: 15, kind: input, shape index: {}]   ;;  %s5205_s16 = inlined_call_operand.vmem [shape: f32[1,32], index: 16, kind: input, shape index: {}]   ;;  %s5206_s17 = inlined_call_operand.vmem [shape: bf16[32,32], index: 17, kind: input, shape index: {}]   ;;  %s5207_s18 = inlined_call_operand.vmem [shape: f32[1,32], index: 18, kind: input, shape index: {}]   ;;  %s5208_s19 = inlined_call_operand.vmem [shape: s32[32,32], index: 19, kind: input, shape index: {}]   ;;  %s5209_s20 = inlined_call_operand.vmem [shape: s32[32,1], index: 20, kind: input, shape index: {}]   ;;  %s5210_s21 = inlined_call_operand.hbm [shape: f32[1,1], index: 21, kind: output, shape index: {0}]   ;;  %s5211_s22 = inlined_call_operand.vmem [shape: s32[32,128], index: 22, kind: output, shape index: {1}]  }
   0x1   :  { %5223 = sst [smem:[#allocation5_spill]] %s5189_s0 }
   0x2   :  { %5224 = sst [smem:[#allocation6_spill]] %s5190_s1 }
   0x3   :  { %5225 = sst [smem:[#allocation7_spill]] %s5191_s2 }
   0x4   :  { %5226 = sst [smem:[#allocation8_spill]] %s5192_s3 }
   0x5   :  { %5227 = sst [smem:[#allocation9_spill]] %s5193_s4 }
   0x6   :  { %5228 = sst [smem:[#allocation10_spill]] %s5194_s5 }
   0x7   :  { %5229 = sst [smem:[#allocation11_spill]] %s5195_s6 }
   0x8   :  { %s5230_s29 = sld [smem:[#allocation5_spill]]  ;;  %v4361_v2 = vmov 0   ;;  %s5231_s25 = sld [smem:[#allocation6_spill]] }
   0x9   :  { %4108 = vset.pattern.permute.xlu1 %v4361_v2  ;;  %4107 = vset.pattern.permute.xlu0 %v4361_v2 }
   0xe   :  { %v99_v0 = vld [vmem:[%s5230_s29 + $0x10] sm:$0xff]  ;;  %v97_v1 = vld [vmem:[%s5230_s29] sm:$0xff]  ;;  %v100_v3 = vld [vmem:[%s5230_s29 + $0x18] sm:$0xff] }
   0xf   :  { %v98_v4 = vld [vmem:[%s5230_s29 + $0x8] sm:$0xff]  ;;  %108 = vperm.xlu1 %4108, %v99_v0   ;;  %102 = vperm.xlu0 %4107, %v97_v1   ;;  %v4189_v5 = vld [vmem:[%s5231_s25] sm:$0xff]  }
  0x10   :  { %3784 = vmatprep.subr.bf16.mxu0 %v4189_v5  ;;  %v4190_v6 = vld [vmem:[%s5231_s25 + $0x8] sm:$0xff]  }
  0x11   :  { %3785 = vmatpush3.bf16.msra.mxu0 %v4189_v5 }
  0x12   :  { %3786 = vmatprep.subr.bf16.mxu0 %v4190_v6 }
  0x13   :  { %111 = vperm.xlu1 %4108, %v100_v3   ;;  %105 = vperm.xlu0 %4107, %v98_v4  }
  0x15   :  { %3787 = vmatpush3.bf16.msra.mxu0 %v4190_v6 }
  0x16   :  { %28 = vsyncpa [#allocation3], 0  ;;  %v72_v7 = vlaneseq  ;;  %vm147_vm4 = vcmask 261120   ;;  %v4362_v13 = vmov 0.0   ;;  %s5232_s28 = sld [smem:[#allocation7_spill]]  ;;  %s5233_s6 = sld [smem:[#allocation10_spill]] }
  0x17   :  { %s5234_s3 = sld [smem:[#allocation8_spill]]  ;;  %s5235_s30 = sld [smem:[#allocation9_spill]]  ;;  %vm368_vm5 = vcmask 130048   ;;  %vm4368_vm9 = vmmov 0   ;;  %vm1613_vm10 = vcmask 523264  }
  0x18   :  { %v4504_v8 = vand.u32 127, %v72_v7  ;;  %s5236_s23 = sld [smem:[#allocation11_spill]]  ;;  %s4363_s1 = smov 80   ;;  %vm4584_vm6 = vmpackc.low %vm368_vm5, %vm368_vm5 }
  0x19   :  { %s4364_s5 = smov 96   ;;  %s4365_s24 = smov 112  }
  0x1a   :  { %s5221_s25 = smov 64   ;;  %s5219_s26 = smov 48  }
  0x1c   :  { %v131_v20 = vld [vmem:[%s5232_s28] sm:$0xff]  ;;  %v133_v22 = vld [vmem:[%s5232_s28 + $0x10] sm:$0xff]  ;;  %v132_v24 = vld [vmem:[%s5232_s28 + $0x8] sm:$0xff] }
  0x1d   :  { %v134_v31 = vld [vmem:[%s5232_s28 + $0x18] sm:$0xff]  ;;  %v4191_v56 = vld [vmem:[%s5233_s6] sm:$0xff]   ;;  %v4192_v57 = vld [vmem:[%s5233_s6 + $0x8] sm:$0xff]   ;;  %s4349_s28 = scalar_lea.hbm %s5210_s21, 16 }
  0x1e   :  { %3792 = vmatprep.subr.bf16.mxu1 %v4191_v56  ;;  %p4350_p0 = scmp.ne.s32.totalorder %s5210_s21, %s4349_s28  ;;  %p4353_p1 = scmp.lt.u32.totalorder %s4349_s28, %s5210_s21 }
  0x1f   :  { %3793 = vmatpush3.bf16.msra.mxu1 %v4191_v56 }
  0x20   :  { %3794 = vmatprep.subr.bf16.mxu1 %v4192_v57  ;;  %p4355_p2 = pnand %p4353_p1, %p4350_p0 }
  0x23   :  { %3795 = vmatpush3.bf16.msra.mxu1 %v4192_v57 }
  0x8e   :  { %v109_v9 = vpop.permute.xlu1 %108  ;;  %v103_v10 = vpop.permute.xlu0 %102 }
  0x8f   :  { %vm115_vm0 = vcmp.eq.s32.totalorder %v109_v9, %v4504_v8  ;;  %vm113_vm1 = vcmp.eq.s32.totalorder %v103_v10, %v4504_v8  ;;  %v3529_v9 = vld [vmem:[%s5234_s3] ss:$0 sm:$0xff] }
  0x90   :  { %v3523_v14 = vsel %vm115_vm0, 1.0, %v4362_v13  ;;  %v3521_v16 = vsel %vm113_vm1, 1.0, %v4362_v13 }
  0x92   :  { %v112_v11 = vpop.permute.xlu1 %111  ;;  %v106_v12 = vpop.permute.xlu0 %105 }
  0x93   :  { %vm116_vm2 = vcmp.eq.s32.totalorder %v112_v11, %v4504_v8  ;;  %vm114_vm3 = vcmp.eq.s32.totalorder %v106_v12, %v4504_v8 }
  0x94   :  { %v3524_v15 = vsel %vm116_vm2, 1.0, %v4362_v13  ;;  %v3522_v17 = vsel %vm114_vm3, 1.0, %v4362_v13 }
  0x95   :  { %v126_v18 = vpack.c.bf16 %v3524_v15, %v3523_v14  ;;  %v125_v19 = vpack.c.bf16 %v3522_v17, %v3521_v16  ;;  %v3530_v16 = vld [vmem:[%s5235_s30] ss:$0 sm:$0xff] }
  0x97   :  { %3788 = vmatprep.mubr.msk.bf16.mxu0 %vm147_vm4, %v125_v19 }
  0x98   :  { %3789 = vmatmul.mubr.msk.bf16.vlgmr.msra.gmra.mrb[0].mxu0 %vm147_vm4, %v126_v18 }
 0x16b   :  { %v3790_v21 = vpop.f32.mrb[0].mxu0 }
 0x16c   :  { %v188_v23 = vpop.f32.mrb[1].mxu0  ;;  %v4527_v28 = vadd.f32 %v3790_v21, %v133_v22 }
 0x16d   :  { %v4525_v25 = vadd.f32 %v188_v23, %v131_v20  ;;  %v3791_v26 = vpop.f32.mrb[2].mxu0 }
 0x16e   :  { %v191_v27 = vpop.f32.mrb[3].mxu0  ;;  %v4538_v33 = vadd.f32 %v3791_v26, %v134_v31  ;;  %v211_v34 = vsel %vm147_vm4, %v4527_v28, 0.0 }
 0x16f   :  { %v4529_v29 = vadd.f32 %v191_v27, %v132_v24  ;;  %v205_v30 = vsel %vm147_vm4, %v4525_v25, 0.0 }
 0x170   :  { %206 = vadd.xlane.f32.xlu0 %v205_v30  ;;  %v214_v35 = vsel %vm147_vm4, %v4538_v33, 0.0 }
 0x171   :  { %v208_v32 = vsel %vm147_vm4, %v4529_v29, 0.0 }
 0x172   :  { %209 = vadd.xlane.f32.xlu1 %v208_v32  ;;  %v3531_v32 = vld [vmem:[%s5236_s23] ss:$0 sm:$0xff] }
 0x174   :  { %212 = vadd.xlane.f32.xlu0 %v211_v34 }
 0x178   :  { %215 = vadd.xlane.f32.xlu0 %v214_v35 }
 0x1fd   :  { %v207_v36 = vpop.xlane.xlu0 %206 }
 0x1fe   :  { %v218_v37 = vmul.f32 0.03125, %v207_v36 }
 0x1ff   :  { %v210_v38 = vpop.xlane.xlu1 %209 }
 0x200   :  { %v222_v39 = vsub.f32 %v4525_v25, %v218_v37  ;;  %v219_v40 = vmul.f32 0.03125, %v210_v38 }
 0x201   :  { %v213_v41 = vpop.xlane.xlu0 %212 }
 0x202   :  { %v223_v42 = vsub.f32 %v4529_v29, %v219_v40  ;;  %v220_v43 = vmul.f32 0.03125, %v213_v41  ;;  %v226_v44 = vmul.f32 %v222_v39, %v222_v39 }
 0x204   :  { %v224_v45 = vsub.f32 %v4527_v28, %v220_v43  ;;  %v230_v46 = vsel %vm147_vm4, %v226_v44, 0.0  ;;  %v227_v47 = vmul.f32 %v223_v42, %v223_v42 }
 0x205   :  { %231 = vadd.xlane.f32.xlu1 %v230_v46  ;;  %v216_v48 = vpop.xlane.xlu0 %215 }
 0x206   :  { %v221_v49 = vmul.f32 0.03125, %v216_v48  ;;  %v233_v50 = vsel %vm147_vm4, %v227_v47, 0.0  ;;  %v228_v51 = vmul.f32 %v224_v45, %v224_v45 }
 0x207   :  { %234 = vadd.xlane.f32.xlu0 %v233_v50 }
 0x208   :  { %v225_v52 = vsub.f32 %v4538_v33, %v221_v49  ;;  %v236_v53 = vsel %vm147_vm4, %v228_v51, 0.0 }
 0x209   :  { %237 = vadd.xlane.f32.xlu1 %v236_v53 }
 0x20a   :  { %v229_v54 = vmul.f32 %v225_v52, %v225_v52 }
 0x20c   :  { %v239_v55 = vsel %vm147_vm4, %v229_v54, 0.0  ;;  %v4601_v54 = vshrl.u32 %v72_v7, 7 }
 0x20d   :  { %240 = vadd.xlane.f32.xlu0 %v239_v55 }
 0x20e   :  { %v4604_v55 = vadd.s32 8, %v4601_v54  ;;  %vm4614_vm8 = vcmp.ge.s32.totalorder %v4601_v54, %v4504_v8 }
 0x210   :  { %vm4608_vm7 = vcmp.ge.s32.totalorder %v4604_v55, %v4504_v8 }
 0x292   :  { %v232_v58 = vpop.xlane.xlu1 %231 }
 0x293   :  { %v242_v59 = vmul.f32 0.03125, %v232_v58 }
 0x294   :  { %v235_v60 = vpop.xlane.xlu0 %234 }
 0x295   :  { %v246_v61 = vadd.f32 1e-05, %v242_v59  ;;  %v243_v62 = vmul.f32 0.03125, %v235_v60 }
 0x296   :  { %v238_v63 = vpop.xlane.xlu1 %237 }
 0x297   :  { %4213 = vrsqrt.f32 %v246_v61  ;;  %v247_v0 = vadd.f32 1e-05, %v243_v62  ;;  %v244_v1 = vmul.f32 0.03125, %v238_v63 }
 0x299   :  { %4215 = vrsqrt.f32 %v247_v0  ;;  %v248_v2 = vadd.f32 1e-05, %v244_v1 }
 0x29a   :  { %v241_v3 = vpop.xlane.xlu0 %240 }
 0x29b   :  { %4217 = vrsqrt.f32 %v248_v2  ;;  %v245_v4 = vmul.f32 0.03125, %v241_v3 }
 0x29d   :  { %v249_v5 = vadd.f32 1e-05, %v245_v4 }
 0x29f   :  { %4219 = vrsqrt.f32 %v249_v5 }
 0x2a1   :  { %v4214_v6 = vpop.eup %4213 }
 0x2a2   :  { %v254_v10 = vmul.f32 %v4214_v6, %v222_v39 }
 0x2a3   :  { %v4216_v11 = vpop.eup %4215 }
 0x2a4   :  { %v255_v12 = vmul.f32 %v4216_v11, %v223_v42  ;;  %v264_v14 = vmul.f32 %v3529_v9, %v254_v10 }
 0x2a5   :  { %v4218_v15 = vpop.eup %4217 }
 0x2a6   :  { %v265_v17 = vmul.f32 %v3529_v9, %v255_v12  ;;  %v256_v18 = vmul.f32 %v4218_v15, %v224_v45  ;;  %v274_v19 = vadd.f32 %v3530_v16, %v264_v14 }
 0x2a8   :  { %v275_v20 = vadd.f32 %v3530_v16, %v265_v17  ;;  %v266_v24 = vmul.f32 %v3529_v9, %v256_v18 }
 0x2a9   :  { %v4220_v21 = vpop.eup %4219 }
 0x2aa   :  { %v278_v22 = vpack.c.bf16 %v275_v20, %v274_v19  ;;  %v257_v23 = vmul.f32 %v4220_v21, %v225_v52  ;;  %v276_v27 = vadd.f32 %v3530_v16, %v266_v24 }
 0x2ac   :  { %3796 = vmatprep.mubr.msk.bf16.mxu1 %vm147_vm4, %v278_v22  ;;  %v267_v26 = vmul.f32 %v3529_v9, %v257_v23 }
 0x2ae   :  { %v277_v30 = vadd.f32 %v3530_v16, %v267_v26 }
 0x2b0   :  { %v279_v31 = vpack.c.bf16 %v277_v30, %v276_v27 }
 0x2b2   :  { %3797 = vmatmul.mubr.msk.bf16.vlgmr.msra.gmra.mrb[0].mxu1 %vm147_vm4, %v279_v31 }
 0x385   :  { %v3798_v34 = vpop.f32.mrb[0].mxu1 }
 0x386   :  { %v4569_v35 = vadd.f32 %v3798_v34, %v3531_v32  ;;  %v343_v36 = vpop.f32.mrb[1].mxu1 }
 0x387   :  { %v344_v37 = vadd.f32 %v3531_v32, %v343_v36  ;;  %v3799_v38 = vpop.f32.mrb[2].mxu1 }
 0x388   :  { %v4571_v39 = vadd.f32 %v3799_v38, %v3531_v32  ;;  %v346_v40 = vpop.f32.mrb[3].mxu1 }
 0x389   :  { %v347_v41 = vadd.f32 %v3531_v32, %v346_v40  ;;  %3804 = vmatprep.mubr.msk.f32.mxu0 %vm368_vm5, %v344_v37 }
 0x38b   :  { %v4574_v42 = vpack.i.bf16 %v347_v41, %v344_v37 }
 0x38d   :  { %4115 = vrot.lane.b32.xlu0 %v4574_v42, %s4363_s1  ;;  %4110 = vrot.lane.b32.xlu1 %v4574_v42, %s4364_s5 }
 0x391   :  { %566 = vrot.lane.b32.xlu1 %v344_v37, %s4365_s24  ;;  %v4638_v37 = vpack.i.bf16 %v4571_v39, %v4569_v35 }
 0x395   :  { %568 = vrot.lane.b32.xlu1 %v347_v41, %s4365_s24 }
 0x3ff   :  { %v4116_v43 = vpop.permute.xlu0 %4115  ;;  %v4111_v44 = vpop.permute.xlu1 %4110 }
 0x400   :  { %v4118_v45 = vunpack.i.h.bf16 %v4116_v43  ;;  %v4117_v46 = vunpack.i.l.bf16 %v4116_v43  ;;  %v4113_v47 = vunpack.i.h.bf16 %v4111_v44  ;;  %v4112_v48 = vunpack.i.l.bf16 %v4111_v44 }
 0x402   :  { %v4016_v50 = vpack.c.bf16 %v4113_v47, %v4112_v48  ;;  %v4026_v51 = vpack.c.bf16 %v4118_v45, %v4117_v46 }
 0x403   :  { %v567_v52 = vpop.permute.xlu1 %566 }
 0x404   :  { %4018 = vmatprep.subr.msk.bf16.mxu0 %vm4584_vm6, %v4016_v50 }
 0x405   :  { %4021 = vmatpush3.bf16.xpose.msk.msra.mxu0 %vm4584_vm6, %v4016_v50 }
 0x406   :  { %4028 = vmatprep.subr.msk.bf16.mxu0 %vm4584_vm6, %v4026_v51 }
 0x407   :  { %v569_v53 = vpop.permute.xlu1 %568 }
 0x40c   :  { %3805 = vmatmul.mubr.msk.f32.vlgmr.msra.gmra.mrb[4].mxu0 %vm368_vm5, %v347_v41 }
 0x40d   :  { %4031 = vmatpush3.bf16.xpose.msk.msra.mxu0 %vm4584_vm6, %v4026_v51  ;;  %3818 = vmatprep.mubr.msk.f32.mxu0 %vm368_vm5, %v567_v52 }
 0x40e   :  { %3834 = vmatprep.subr.bf16.mxu0 %v4362_v13 }
 0x414   :  { %3819 = vmatmul.mubr.msk.f32.vlgmr.msra.gmra.mrb[6].mxu0 %vm368_vm5, %v569_v53 }
 0x415   :  { %3836 = vmatprep.mubr.msk.bf16.mxu0 %vm4368_vm9, %v4362_v13 }
 0x4df   :  { %v3806_v56 = vpop.f32.mrb[4].mxu0 }
 0x4e0   :  { %v453_v58 = vmul.f32 0.25, %v3806_v56  ;;  %v443_v59 = vpop.f32.mrb[5].mxu0 }
 0x4e1   :  { %v452_v7 = vmul.f32 0.25, %v443_v59 }
 0x4e2   :  { %v455_v61 = vsel %vm4608_vm7, %v453_v58, -1e+30 }
 0x4e3   :  { %v459_v62 = vsel %vm368_vm5, %v455_v61, -inf  ;;  %v454_v63 = vsel %vm4614_vm8, %v452_v7, -1e+30 }
 0x4e4   :  { %460 = vmax.xlane.f32.xlu1 %v459_v62  ;;  %v456_v0 = vsel %vm368_vm5, %v454_v63, -inf }
 0x4e5   :  { %457 = vmax.xlane.f32.xlu0 %v456_v0 }
 0x4e7   :  { %v3820_v1 = vpop.f32.mrb[6].mxu0 }
 0x4e8   :  { %v648_v2 = vpop.f32.mrb[7].mxu0  ;;  %v658_v3 = vmul.f32 0.25, %v3820_v1  ;;  %v4657_v1 = vld [vmem:[%s5196_s7 + $0x8] sm:$0xff]  }
 0x4e9   :  { %v657_v4 = vmul.f32 0.25, %v648_v2 }
 0x4ea   :  { %v660_v9 = vsel %vm4608_vm7, %v658_v3, -1e+30 }
 0x4eb   :  { %v659_v5 = vsel %vm4614_vm8, %v657_v4, -1e+30  ;;  %v664_v10 = vsel %vm368_vm5, %v660_v9, -inf  ;;  %v4194_v4 = vld [vmem:[%s5196_s7] sm:$0xff]  }
 0x4ec   :  { %v661_v6 = vsel %vm368_vm5, %v659_v5, -inf  ;;  %3835 = vmatpush3.bf16.msra.mxu0 %v4194_v4 }
 0x4ed   :  { %662 = vmax.xlane.f32.xlu0 %v661_v6 }
 0x4f1   :  { %665 = vmax.xlane.f32.xlu0 %v664_v10 }
 0x571   :  { %v461_v11 = vpop.xlane.xlu1 %460 }
 0x572   :  { %v463_v12 = vsub.f32 %v455_v61, %v461_v11  ;;  %v458_v14 = vpop.xlane.xlu0 %457 }
 0x573   :  { %v462_v15 = vsub.f32 %v454_v63, %v458_v14 }
 0x574   :  { %v466_v16 = vmul.f32 1.442695, %v463_v12 }
 0x575   :  { %v464_v17 = vmul.f32 1.442695, %v462_v15 }
 0x576   :  { %4221 = vpow2.f32 %v466_v16 }
 0x577   :  { %4223 = vpow2.f32 %v464_v17 }
 0x57a   :  { %v663_v18 = vpop.xlane.xlu0 %662 }
 0x57b   :  { %v667_v19 = vsub.f32 %v659_v5, %v663_v18 }
 0x57d   :  { %v669_v20 = vmul.f32 1.442695, %v667_v19 }
 0x57e   :  { %v666_v21 = vpop.xlane.xlu0 %665 }
 0x57f   :  { %4225 = vpow2.f32 %v669_v20  ;;  %v668_v22 = vsub.f32 %v660_v9, %v666_v21 }
 0x580   :  { %v4222_v23 = vpop.eup %4221 }
 0x581   :  { %v4224_v24 = vpop.eup %4223  ;;  %v671_v26 = vmul.f32 1.442695, %v668_v22  ;;  %v471_v27 = vsel %vm368_vm5, %v4222_v23, 0.0 }
 0x582   :  { %472 = vadd.xlane.f32.xlu0 %v471_v27  ;;  %v468_v30 = vsel %vm368_vm5, %v4224_v24, 0.0 }
 0x583   :  { %4227 = vpow2.f32 %v671_v26  ;;  %469 = vadd.xlane.f32.xlu1 %v468_v30 }
 0x589   :  { %v4226_v31 = vpop.eup %4225 }
 0x58a   :  { %v673_v32 = vsel %vm368_vm5, %v4226_v31, 0.0 }
 0x58b   :  { %674 = vadd.xlane.f32.xlu1 %v673_v32 }
 0x58d   :  { %v4228_v34 = vpop.eup %4227 }
 0x58e   :  { %v676_v36 = vsel %vm368_vm5, %v4228_v34, 0.0 }
 0x58f   :  { %677 = vadd.xlane.f32.xlu0 %v676_v36 }
 0x59c   :  { %4120 = vrot.lane.b32.xlu1 %v4574_v42, %s5221_s25 }
 0x5a0   :  { %4130 = vrot.lane.b32.xlu1 %v4638_v37, %s4364_s5 }
 0x5a4   :  { %4135 = vrot.lane.b32.xlu1 %v4638_v37, %s4363_s1 }
 0x5a5   :  { %4125 = vrot.lane.b32.xlu0 %v4574_v42, %s5219_s26 }
 0x5a8   :  { %1076 = vrot.lane.b32.xlu1 %v4571_v39, %s4365_s24 }
 0x5a9   :  { %1074 = vrot.lane.b32.xlu0 %v4569_v35, %s4365_s24 }
 0x60f   :  { %v473_v40 = vpop.xlane.xlu0 %472 }
 0x610   :  { %v470_v38 = vpop.xlane.xlu1 %469 }
 0x611   :  { %4229 = vrcp.f32 %v470_v38 }
 0x612   :  { %4231 = vrcp.f32 %v473_v40 }
 0x618   :  { %v675_v41 = vpop.xlane.xlu1 %674 }
 0x619   :  { %4233 = vrcp.f32 %v675_v41 }
 0x61b   :  { %v4230_v43 = vpop.eup %4229 }
 0x61c   :  { %v4121_v44 = vpop.permute.xlu1 %4120  ;;  %v678_v45 = vpop.xlane.xlu0 %677  ;;  %v476_v46 = vmul.f32 %v4230_v43, %v4224_v24 }
 0x61d   :  { %v4123_v47 = vunpack.i.h.bf16 %v4121_v44  ;;  %v4122_v48 = vunpack.i.l.bf16 %v4121_v44  ;;  %4235 = vrcp.f32 %v678_v45  ;;  %v4232_v50 = vpop.eup %4231 }
 0x61e   :  { %3811 = vmatprep.mubr.msk.f32.mxu1 %vm368_vm5, %v476_v46  ;;  %v477_v59 = vmul.f32 %v4232_v50, %v4222_v23 }
 0x61f   :  { %v4022_v42 = vpack.c.bf16 %v4123_v47, %v4122_v48 }
 0x620   :  { %v4126_v51 = vpop.permute.xlu0 %4125  ;;  %v4131_v58 = vpop.permute.xlu1 %4130 }
 0x621   :  { %v4128_v52 = vunpack.i.h.bf16 %v4126_v51  ;;  %v4127_v53 = vunpack.i.l.bf16 %v4126_v51  ;;  %4023 = vmatprep.subr.bf16.mxu1 %v4022_v42  ;;  %v4133_v62 = vunpack.i.h.bf16 %v4131_v58  ;;  %v4132_v63 = vunpack.i.l.bf16 %v4131_v58 }
 0x622   :  { %4025 = vmatpush3.bf16.msra.mxu1 %v4022_v42 }
 0x623   :  { %v4234_v56 = vpop.eup %4233  ;;  %v4032_v7 = vpack.c.bf16 %v4128_v52, %v4127_v53  ;;  %v4036_v3 = vpack.c.bf16 %v4133_v62, %v4132_v63 }
 0x624   :  { %v681_v61 = vmul.f32 %v4234_v56, %v4226_v31  ;;  %v4136_v9 = vpop.permute.xlu1 %4135  ;;  %v1075_v18 = vpop.permute.xlu0 %1074 }
 0x625   :  { %3812 = vmatmul.mubr.msk.f32.vlgmr.msra.gmra.mrb[4].mxu1 %vm368_vm5, %v477_v59  ;;  %4033 = vmatprep.subr.bf16.mxu1 %v4032_v7  ;;  %v4138_v11 = vunpack.i.h.bf16 %v4136_v9  ;;  %v4137_v12 = vunpack.i.l.bf16 %v4136_v9 }
 0x626   :  { %4035 = vmatpush3.bf16.msra.mxu1 %v4032_v7  ;;  %3825 = vmatprep.mubr.msk.f32.mxu1 %vm368_vm5, %v681_v61 }
 0x627   :  { %v4236_v0 = vpop.eup %4235  ;;  %3828 = vmatprep.subr.bf16.mxu1 %v4362_v13  ;;  %v4046_v17 = vpack.c.bf16 %v4138_v11, %v4137_v12 }
 0x628   :  { %v682_v2 = vmul.f32 %v4236_v0, %v4228_v34  ;;  %v1077_v19 = vpop.permute.xlu1 %1076 }
 0x62a   :  { %3826 = vmatmul.mubr.msk.f32.vlgmr.msra.gmra.mrb[6].mxu1 %vm368_vm5, %v682_v2 }
 0x62b   :  { %3829 = vmatpush3.bf16.msra.mxu1 %v4657_v1  ;;  %3830 = vmatprep.mubr.msk.bf16.mxu1 %vm4368_vm9, %v4362_v13 }
 0x62c   :  { %4038 = vmatprep.subr.msk.bf16.mxu1 %vm4584_vm6, %v4036_v3 }
 0x6f8   :  { %v3813_v5 = vpop.f32.mrb[4].mxu1 }
 0x6f9   :  { %v556_v6 = vpop.f32.mrb[5].mxu1 }
 0x6fa   :  { %v565_v10 = vpack.c.bf16 %v3813_v5, %v556_v6 }
 0x6fc   :  { %3837 = vmatmul.mubr.msk.bf16.vlgmr.msra.gmra.mrb[8].mxu0 %vm368_vm5, %v565_v10 }
 0x6fd   :  { %v3827_v14 = vpop.f32.mrb[6].mxu1 }
 0x6fe   :  { %v761_v15 = vpop.f32.mrb[7].mxu1 }
 0x6ff   :  { %v770_v16 = vpack.c.bf16 %v3827_v14, %v761_v15 }
 0x701   :  { %3831 = vmatmul.mubr.msk.bf16.vlgmr.msra.gmra.mrb[8].mxu1 %vm368_vm5, %v770_v16  ;;  %v4711_v16 = vld [vmem:[%s5197_s8] ss:$0 sm:$0xff] }
 0x702   :  { %4041 = vmatpush3.bf16.xpose.msk.msra.mxu1 %vm4584_vm6, %v4036_v3  ;;  %3844 = vmatprep.mubr.msk.f32.mxu1 %vm368_vm5, %v4569_v35 }
 0x703   :  { %4048 = vmatprep.subr.msk.bf16.mxu1 %vm4584_vm6, %v4046_v17 }
 0x709   :  { %3845 = vmatmul.mubr.msk.f32.vlgmr.msra.gmra.mrb[12].mxu1 %vm368_vm5, %v4571_v39 }
 0x70a   :  { %4051 = vmatpush3.bf16.xpose.msk.msra.mxu1 %vm4584_vm6, %v4046_v17  ;;  %3858 = vmatprep.mubr.msk.f32.mxu1 %vm368_vm5, %v1075_v18 }
 0x70b   :  { %3874 = vmatprep.subr.bf16.mxu1 %v4362_v13 }
 0x711   :  { %3859 = vmatmul.mubr.msk.f32.vlgmr.msra.gmra.mrb[14].mxu1 %vm368_vm5, %v1077_v19 }
 0x712   :  { %3875 = vmatpush3.bf16.msra.mxu1 %v4194_v4  ;;  %3876 = vmatprep.mubr.msk.bf16.mxu1 %vm4368_vm9, %v4362_v13 }
 0x7cf   :  { %v864_v35 = vpop.f32.mrb[8].mxu0 }
 0x7d0   :  { %v3838_v20 = vpop.f32.mrb[9].mxu0 }
 0x7d1   :  { %v867_v21 = vpop.f32.mrb[10].mxu0 }
 0x7d2   :  { %v3839_v22 = vpop.f32.mrb[11].mxu0 }
 0x7d4   :  { %v814_v23 = vpop.f32.mrb[8].mxu1 }
 0x7d5   :  { %v865_v39 = vadd.f32 %v864_v35, %v814_v23  ;;  %v3832_v24 = vpop.f32.mrb[9].mxu1 }
 0x7d6   :  { %v817_v26 = vpop.f32.mrb[10].mxu1 }
 0x7d7   :  { %v868_v27 = vadd.f32 %v867_v21, %v817_v26  ;;  %v3833_v30 = vpop.f32.mrb[11].mxu1  ;;  %v1367_v15 = vadd.f32 %v865_v39, %v4525_v25 }
 0x7d9   :  { %v4714_v17 = vadd.f32 %v4711_v16, %v1367_v15  ;;  %v1368_v18 = vadd.f32 %v868_v27, %v4529_v29 }
 0x7db   :  { %v4718_v19 = vadd.f32 %v4711_v16, %v1368_v18  ;;  %v1384_v35 = vsel %vm147_vm4, %v4714_v17, 0.0 }
 0x7dc   :  { %v3846_v31 = vpop.f32.mrb[12].mxu1 }
 0x7dd   :  { %v961_v32 = vmul.f32 0.25, %v3846_v31  ;;  %v951_v34 = vpop.f32.mrb[13].mxu1  ;;  %v1387_v25 = vsel %vm147_vm4, %v4718_v19, 0.0 }
 0x7de   :  { %v960_v36 = vmul.f32 0.25, %v951_v34 }
 0x7df   :  { %v963_v38 = vsel %vm4608_vm7, %v961_v32, -1e+30 }
 0x7e0   :  { %v967_v40 = vsel %vm368_vm5, %v963_v38, -inf  ;;  %v962_v41 = vsel %vm4614_vm8, %v960_v36, -1e+30 }
 0x7e1   :  { %968 = vmax.xlane.f32.xlu1 %v967_v40  ;;  %v964_v43 = vsel %vm368_vm5, %v962_v41, -inf }
 0x7e2   :  { %965 = vmax.xlane.f32.xlu0 %v964_v43 }
 0x7e4   :  { %v3860_v44 = vpop.f32.mrb[14].mxu1 }
 0x7e5   :  { %v1156_v45 = vpop.f32.mrb[15].mxu1  ;;  %v1166_v46 = vmul.f32 0.25, %v3860_v44 }
 0x7e6   :  { %v1165_v47 = vmul.f32 0.25, %v1156_v45 }
 0x7e7   :  { %v1168_v50 = vsel %vm4608_vm7, %v1166_v46, -1e+30 }
 0x7e8   :  { %v1167_v48 = vsel %vm4614_vm8, %v1165_v47, -1e+30  ;;  %v1172_v51 = vsel %vm368_vm5, %v1168_v50, -inf }
 0x7e9   :  { %v1169_v42 = vsel %vm368_vm5, %v1167_v48, -inf }
 0x7ea   :  { %1170 = vmax.xlane.f32.xlu0 %v1169_v42 }
 0x7ee   :  { %1173 = vmax.xlane.f32.xlu0 %v1172_v51 }
 0x86e   :  { %v969_v52 = vpop.xlane.xlu1 %968 }
 0x86f   :  { %v971_v53 = vsub.f32 %v963_v38, %v969_v52  ;;  %v966_v56 = vpop.xlane.xlu0 %965 }
 0x870   :  { %v970_v58 = vsub.f32 %v962_v41, %v966_v56 }
 0x871   :  { %v974_v59 = vmul.f32 1.442695, %v971_v53 }
 0x872   :  { %v972_v7 = vmul.f32 1.442695, %v970_v58 }
 0x873   :  { %4237 = vpow2.f32 %v974_v59 }
 0x874   :  { %4239 = vpow2.f32 %v972_v7 }
 0x877   :  { %v1171_v61 = vpop.xlane.xlu0 %1170 }
 0x878   :  { %v1175_v62 = vsub.f32 %v1167_v48, %v1171_v61 }
 0x87a   :  { %v1177_v63 = vmul.f32 1.442695, %v1175_v62 }
 0x87b   :  { %v1174_v0 = vpop.xlane.xlu0 %1173 }
 0x87c   :  { %4241 = vpow2.f32 %v1177_v63  ;;  %v1176_v2 = vsub.f32 %v1168_v50, %v1174_v0 }
 0x87d   :  { %v4238_v3 = vpop.eup %4237 }
 0x87e   :  { %v4240_v4 = vpop.eup %4239  ;;  %v1179_v5 = vmul.f32 1.442695, %v1176_v2  ;;  %v979_v6 = vsel %vm368_vm5, %v4238_v3, 0.0 }
 0x87f   :  { %980 = vadd.xlane.f32.xlu0 %v979_v6  ;;  %v976_v9 = vsel %vm368_vm5, %v4240_v4, 0.0 }
 0x880   :  { %4243 = vpow2.f32 %v1179_v5  ;;  %977 = vadd.xlane.f32.xlu1 %v976_v9 }
 0x886   :  { %v4242_v10 = vpop.eup %4241 }
 0x887   :  { %v1181_v11 = vsel %vm368_vm5, %v4242_v10, 0.0 }
 0x888   :  { %1182 = vadd.xlane.f32.xlu1 %v1181_v11 }
 0x88a   :  { %v4244_v12 = vpop.eup %4243 }
 0x88b   :  { %v1184_v14 = vsel %vm368_vm5, %v4244_v12, 0.0 }
 0x88c   :  { %1185 = vadd.xlane.f32.xlu0 %v1184_v14 }
 0x899   :  { %4140 = vrot.lane.b32.xlu1 %v4638_v37, %s5221_s25 }
 0x8a2   :  { %4145 = vrot.lane.b32.xlu0 %v4638_v37, %s5219_s26 }
 0x8bd   :  { %1385 = vadd.xlane.f32.xlu1 %v1384_v35 }
 0x8c1   :  { %1388 = vadd.xlane.f32.xlu0 %v1387_v25 }
 0x90c   :  { %v981_v20 = vpop.xlane.xlu0 %980 }
 0x90d   :  { %v978_v37 = vpop.xlane.xlu1 %977 }
 0x90e   :  { %4245 = vrcp.f32 %v978_v37 }
 0x90f   :  { %4247 = vrcp.f32 %v981_v20 }
 0x915   :  { %v1183_v21 = vpop.xlane.xlu1 %1182 }
 0x916   :  { %4249 = vrcp.f32 %v1183_v21 }
 0x918   :  { %v4246_v22 = vpop.eup %4245 }
 0x919   :  { %v4141_v23 = vpop.permute.xlu1 %4140  ;;  %v1186_v29 = vpop.xlane.xlu0 %1185  ;;  %v984_v39 = vmul.f32 %v4246_v22, %v4240_v4 }
 0x91a   :  { %v4143_v24 = vunpack.i.h.bf16 %v4141_v23  ;;  %v4142_v26 = vunpack.i.l.bf16 %v4141_v23  ;;  %4251 = vrcp.f32 %v1186_v29  ;;  %v4248_v30 = vpop.eup %4247 }
 0x91b   :  { %3851 = vmatprep.mubr.msk.f32.mxu0 %vm368_vm5, %v984_v39  ;;  %v985_v38 = vmul.f32 %v4248_v30, %v4238_v3 }
 0x91c   :  { %v4042_v27 = vpack.c.bf16 %v4143_v24, %v4142_v26 }
 0x91d   :  { %v4146_v31 = vpop.permute.xlu0 %4145 }
 0x91e   :  { %v4148_v32 = vunpack.i.h.bf16 %v4146_v31  ;;  %v4147_v34 = vunpack.i.l.bf16 %v4146_v31  ;;  %4043 = vmatprep.subr.bf16.mxu0 %v4042_v27 }
 0x91f   :  { %4045 = vmatpush3.bf16.msra.mxu0 %v4042_v27 }
 0x920   :  { %v4250_v36 = vpop.eup %4249  ;;  %v4052_v40 = vpack.c.bf16 %v4148_v32, %v4147_v34 }
 0x921   :  { %v1189_v41 = vmul.f32 %v4250_v36, %v4242_v10  ;;  %v3567_v36 = vld [vmem:[%s5198_s9] ss:$0 sm:$0xff] }
 0x922   :  { %3852 = vmatmul.mubr.msk.f32.vlgmr.msra.gmra.mrb[12].mxu0 %vm368_vm5, %v985_v38  ;;  %4053 = vmatprep.subr.bf16.mxu0 %v4052_v40 }
 0x923   :  { %4055 = vmatpush3.bf16.msra.mxu0 %v4052_v40  ;;  %3865 = vmatprep.mubr.msk.f32.mxu0 %vm368_vm5, %v1189_v41 }
 0x924   :  { %v4252_v43 = vpop.eup %4251  ;;  %3868 = vmatprep.subr.bf16.mxu0 %v4362_v13 }
 0x925   :  { %v1190_v44 = vmul.f32 %v4252_v43, %v4244_v12 }
 0x927   :  { %3866 = vmatmul.mubr.msk.f32.vlgmr.msra.gmra.mrb[14].mxu0 %vm368_vm5, %v1190_v44  ;;  %v3568_v44 = vld [vmem:[%s5199_s10] ss:$0 sm:$0xff] }
 0x928   :  { %3869 = vmatpush3.bf16.msra.mxu0 %v4657_v1  ;;  %3870 = vmatprep.mubr.msk.bf16.mxu0 %vm4368_vm9, %v4362_v13 }
 0x94a   :  { %v1386_v52 = vpop.xlane.xlu1 %1385 }
 0x94b   :  { %v1396_v1 = vmul.f32 0.03125, %v1386_v52 }
 0x94d   :  { %v1400_v2 = vsub.f32 %v4714_v17, %v1396_v1 }
 0x94e   :  { %v1389_v58 = vpop.xlane.xlu0 %1388 }
 0x94f   :  { %v1397_v61 = vmul.f32 0.03125, %v1389_v58  ;;  %v1404_v14 = vmul.f32 %v1400_v2, %v1400_v2 }
 0x951   :  { %v1401_v6 = vsub.f32 %v4718_v19, %v1397_v61  ;;  %v1408_v18 = vsel %vm147_vm4, %v1404_v14, 0.0  ;;  %v3569_v14 = vld [vmem:[%s5201_s12] ss:$0 sm:$0xff] }
 0x953   :  { %v1405_v15 = vmul.f32 %v1401_v6, %v1401_v6 }
 0x955   :  { %v1411_v35 = vsel %vm147_vm4, %v1405_v15, 0.0 }
 0x9f5   :  { %v3853_v45 = vpop.f32.mrb[12].mxu0 }
 0x9f6   :  { %v1064_v46 = vpop.f32.mrb[13].mxu0 }
 0x9f7   :  { %v1073_v47 = vpack.c.bf16 %v3853_v45, %v1064_v46 }
 0x9f9   :  { %3877 = vmatmul.mubr.msk.bf16.vlgmr.msra.gmra.mrb[16].mxu1 %vm368_vm5, %v1073_v47 }
 0x9fa   :  { %v3867_v48 = vpop.f32.mrb[14].mxu0 }
 0x9fb   :  { %v1269_v42 = vpop.f32.mrb[15].mxu0 }
 0x9fc   :  { %v1278_v50 = vpack.c.bf16 %v3867_v48, %v1269_v42  ;;  %v4195_v42 = vld [vmem:[%s5200_s11] sm:$0xff]  }
 0x9fd   :  { %3880 = vmatprep.subr.bf16.mxu0 %v4195_v42 }
 0x9fe   :  { %3871 = vmatmul.mubr.msk.bf16.vlgmr.msra.gmra.mrb[16].mxu0 %vm368_vm5, %v1278_v50  ;;  %v4196_v50 = vld [vmem:[%s5200_s11 + $0x8] sm:$0xff]  }
 0x9ff   :  { %3881 = vmatpush3.bf16.msra.mxu0 %v4195_v42 }
 0xa00   :  { %3882 = vmatprep.subr.bf16.mxu0 %v4196_v50 }
 0xa03   :  { %3883 = vmatpush3.bf16.msra.mxu0 %v4196_v50 }
 0xacc   :  { %v1360_v51 = vpop.f32.mrb[16].mxu1 }
 0xacd   :  { %v3878_v53 = vpop.f32.mrb[17].mxu1 }
 0xace   :  { %v1363_v56 = vpop.f32.mrb[18].mxu1 }
 0xacf   :  { %v3879_v59 = vpop.f32.mrb[19].mxu1 }
 0xad1   :  { %v1316_v7 = vpop.f32.mrb[16].mxu0 }
 0xad2   :  { %v1361_v62 = vadd.f32 %v1360_v51, %v1316_v7  ;;  %v3872_v63 = vpop.f32.mrb[17].mxu0 }
 0xad3   :  { %v1319_v0 = vpop.f32.mrb[18].mxu0 }
 0xad4   :  { %v1369_v3 = vadd.f32 %v1361_v62, %v4527_v28  ;;  %v1364_v4 = vadd.f32 %v1363_v56, %v1319_v0  ;;  %v3873_v5 = vpop.f32.mrb[19].mxu0 }
 0xad5   :  { %v4197_v5 = vld [vmem:[%s5202_s13] sm:$0xff]  }
 0xad6   :  { %v4738_v9 = vadd.f32 %v4711_v16, %v1369_v3  ;;  %v1370_v10 = vadd.f32 %v1364_v4, %v4538_v33  ;;  %3888 = vmatprep.subr.bf16.mxu1 %v4197_v5 }
 0xad7   :  { %3889 = vmatpush3.bf16.msra.mxu1 %v4197_v5 }
 0xad8   :  { %v4742_v11 = vadd.f32 %v4711_v16, %v1370_v10  ;;  %v1390_v12 = vsel %vm147_vm4, %v4738_v9, 0.0  ;;  %v4199_v10 = vld [vmem:[%s5202_s13 + $0x10] sm:$0xff]  }
 0xad9   :  { %1391 = vadd.xlane.f32.xlu1 %v1390_v12  ;;  %v4200_v12 = vld [vmem:[%s5202_s13 + $0x18] sm:$0xff]  }
 0xada   :  { %v1393_v28 = vsel %vm147_vm4, %v4742_v11, 0.0 }
 0xadb   :  { %1394 = vadd.xlane.f32.xlu0 %v1393_v28 }
 0xadd   :  { %1409 = vadd.xlane.f32.xlu1 %v1408_v18 }
 0xadf   :  { %1412 = vadd.xlane.f32.xlu0 %v1411_v35 }
 0xb66   :  { %v1392_v33 = vpop.xlane.xlu1 %1391 }
 0xb67   :  { %v1398_v25 = vmul.f32 0.03125, %v1392_v33 }
 0xb68   :  { %v1395_v16 = vpop.xlane.xlu0 %1394 }
 0xb69   :  { %v1402_v37 = vsub.f32 %v4738_v9, %v1398_v25  ;;  %v1399_v20 = vmul.f32 0.03125, %v1395_v16 }
 0xb6a   :  { %v1410_v21 = vpop.xlane.xlu1 %1409 }
 0xb6b   :  { %v1403_v22 = vsub.f32 %v4742_v11, %v1399_v20  ;;  %v1420_v23 = vmul.f32 0.03125, %v1410_v21  ;;  %v1406_v29 = vmul.f32 %v1402_v37, %v1402_v37 }
 0xb6c   :  { %v1413_v39 = vpop.xlane.xlu0 %1412 }
 0xb6d   :  { %v1424_v24 = vadd.f32 1e-05, %v1420_v23  ;;  %v1421_v26 = vmul.f32 0.03125, %v1413_v39  ;;  %v1414_v27 = vsel %vm147_vm4, %v1406_v29, 0.0  ;;  %v1407_v30 = vmul.f32 %v1403_v22, %v1403_v22 }
 0xb6e   :  { %1415 = vadd.xlane.f32.xlu1 %v1414_v27 }
 0xb6f   :  { %4253 = vrsqrt.f32 %v1424_v24  ;;  %v1425_v31 = vadd.f32 1e-05, %v1421_v26  ;;  %v1417_v32 = vsel %vm147_vm4, %v1407_v30, 0.0 }
 0xb70   :  { %1418 = vadd.xlane.f32.xlu0 %v1417_v32 }
 0xb71   :  { %4255 = vrsqrt.f32 %v1425_v31 }
 0xb79   :  { %v4254_v34 = vpop.eup %4253 }
 0xb7a   :  { %v1432_v38 = vmul.f32 %v4254_v34, %v1400_v2 }
 0xb7b   :  { %v4256_v40 = vpop.eup %4255 }
 0xb7c   :  { %v1433_v41 = vmul.f32 %v4256_v40, %v1401_v6  ;;  %v1442_v43 = vmul.f32 %v3567_v36, %v1432_v38  ;;  %v4198_v6 = vld [vmem:[%s5202_s13 + $0x8] sm:$0xff]  }
 0xb7d   :  { %3890 = vmatprep.subr.bf16.mxu1 %v4198_v6 }
 0xb7e   :  { %v1443_v45 = vmul.f32 %v3567_v36, %v1433_v41  ;;  %v1452_v46 = vadd.f32 %v3568_v44, %v1442_v43  ;;  %3891 = vmatpush3.bf16.msra.mxu1 %v4198_v6 }
 0xb7f   :  { %3892 = vmatprep.subr.bf16.mxu1 %v4199_v10 }
 0xb80   :  { %v1453_v47 = vadd.f32 %v3568_v44, %v1443_v45 }
 0xb82   :  { %v1456_v48 = vpack.c.bf16 %v1453_v47, %v1452_v46  ;;  %3893 = vmatpush3.bf16.msra.mxu1 %v4199_v10 }
 0xb83   :  { %3894 = vmatprep.subr.bf16.mxu1 %v4200_v12 }
 0xb84   :  { %3884 = vmatprep.mubr.msk.bf16.mxu0 %vm147_vm4, %v1456_v48 }
 0xb86   :  { %3895 = vmatpush3.bf16.msra.mxu1 %v4200_v12 }
 0xbfb   :  { %v1416_v51 = vpop.xlane.xlu1 %1415 }
 0xbfc   :  { %v1422_v52 = vmul.f32 0.03125, %v1416_v51 }
 0xbfd   :  { %v1419_v53 = vpop.xlane.xlu0 %1418 }
 0xbfe   :  { %v1426_v56 = vadd.f32 1e-05, %v1422_v52  ;;  %v1423_v58 = vmul.f32 0.03125, %v1419_v53 }
 0xc00   :  { %4257 = vrsqrt.f32 %v1426_v56  ;;  %v1427_v59 = vadd.f32 1e-05, %v1423_v58 }
 0xc02   :  { %4259 = vrsqrt.f32 %v1427_v59 }
 0xc0a   :  { %v4258_v1 = vpop.eup %4257 }
 0xc0b   :  { %v1434_v7 = vmul.f32 %v4258_v1, %v1402_v37 }
 0xc0c   :  { %v4260_v61 = vpop.eup %4259 }
 0xc0d   :  { %v1444_v62 = vmul.f32 %v3567_v36, %v1434_v7  ;;  %v1435_v63 = vmul.f32 %v4260_v61, %v1403_v22 }
 0xc0f   :  { %v1445_v0 = vmul.f32 %v3567_v36, %v1435_v63  ;;  %v1454_v2 = vadd.f32 %v3568_v44, %v1444_v62 }
 0xc11   :  { %v1455_v3 = vadd.f32 %v3568_v44, %v1445_v0 }
 0xc13   :  { %v1457_v4 = vpack.c.bf16 %v1455_v3, %v1454_v2  ;;  %v3574_v3 = vld [vmem:[%s5203_s14] ss:$0 sm:$0xff] }
 0xc15   :  { %3885 = vmatmul.mubr.msk.bf16.vlgmr.msra.gmra.mrb[20].mxu0 %vm147_vm4, %v1457_v4 }
 0xce8   :  { %v3886_v28 = vpop.f32.mrb[20].mxu0 }
 0xce9   :  { %v1530_v15 = vadd.f32 %v3886_v28, %v3569_v14  ;;  %v1521_v18 = vpop.f32.mrb[21].mxu0 }
 0xcea   :  { %v1522_v35 = vadd.f32 %v3569_v14, %v1521_v18  ;;  %v3887_v33 = vpop.f32.mrb[22].mxu0 }
 0xceb   :  { %v1538_v25 = vmul.f32 %v1530_v15, %v1530_v15  ;;  %v1533_v16 = vadd.f32 %v3887_v33, %v3569_v14  ;;  %v1524_v37 = vpop.f32.mrb[23].mxu0 }
 0xcec   :  { %v1536_v20 = vmul.f32 %v1522_v35, %v1522_v35  ;;  %v1525_v21 = vadd.f32 %v3569_v14, %v1524_v37 }
 0xced   :  { %v1542_v22 = vmul.f32 %v1538_v25, %v1530_v15  ;;  %v1539_v23 = vmul.f32 %v1533_v16, %v1533_v16 }
 0xcee   :  { %v1540_v29 = vmul.f32 %v1536_v20, %v1522_v35  ;;  %v1537_v39 = vmul.f32 %v1525_v21, %v1525_v21 }
 0xcef   :  { %v1546_v24 = vmul.f32 0.044715, %v1542_v22  ;;  %v1543_v26 = vmul.f32 %v1539_v23, %v1533_v16 }
 0xcf0   :  { %v1544_v27 = vmul.f32 0.044715, %v1540_v29  ;;  %v1541_v30 = vmul.f32 %v1537_v39, %v1525_v21 }
 0xcf1   :  { %v1550_v31 = vadd.f32 %v1546_v24, %v1530_v15  ;;  %v1547_v32 = vmul.f32 0.044715, %v1543_v26 }
 0xcf2   :  { %v1548_v34 = vadd.f32 %v1544_v27, %v1522_v35  ;;  %v1545_v36 = vmul.f32 0.044715, %v1541_v30 }
 0xcf3   :  { %v1554_v38 = vmul.f32 0.7978846, %v1550_v31  ;;  %v1551_v40 = vadd.f32 %v1547_v32, %v1533_v16 }
 0xcf4   :  { %v1552_v41 = vmul.f32 0.7978846, %v1548_v34  ;;  %v1549_v43 = vadd.f32 %v1545_v36, %v1525_v21 }
 0xcf5   :  { %4261 = vtanh.f32 %v1554_v38  ;;  %v1555_v44 = vmul.f32 0.7978846, %v1551_v40 }
 0xcf6   :  { %4263 = vtanh.f32 %v1552_v41  ;;  %v1553_v45 = vmul.f32 0.7978846, %v1549_v43 }
 0xcf7   :  { %4265 = vtanh.f32 %v1555_v44  ;;  %v4201_v44 = vld [vmem:[%s5233_s6 + $0x10] sm:$0xff]  }
 0xcf8   :  { %4267 = vtanh.f32 %v1553_v45  ;;  %3900 = vmatprep.subr.bf16.mxu0 %v4201_v44  ;;  %v4202_v45 = vld [vmem:[%s5233_s6 + $0x18] sm:$0xff]  }
 0xcf9   :  { %3901 = vmatpush3.bf16.msra.mxu0 %v4201_v44 }
 0xcfa   :  { %3902 = vmatprep.subr.bf16.mxu0 %v4202_v45 }
 0xcfd   :  { %3903 = vmatpush3.bf16.msra.mxu0 %v4202_v45 }
 0xcff   :  { %v4262_v46 = vpop.eup %4261 }
 0xd00   :  { %v4264_v47 = vpop.eup %4263  ;;  %v1562_v48 = vadd.f32 1.0, %v4262_v46 }
 0xd01   :  { %v4266_v42 = vpop.eup %4265  ;;  %v1560_v50 = vadd.f32 1.0, %v4264_v47 }
 0xd02   :  { %v4268_v51 = vpop.eup %4267  ;;  %v1566_v52 = vmul.f32 0.5, %v1562_v48  ;;  %v1563_v53 = vadd.f32 1.0, %v4266_v42 }
 0xd03   :  { %v1564_v56 = vmul.f32 0.5, %v1560_v50  ;;  %v1561_v58 = vadd.f32 1.0, %v4268_v51 }
 0xd04   :  { %v1567_v59 = vmul.f32 0.5, %v1563_v53  ;;  %v1570_v7 = vmul.f32 %v1566_v52, %v1530_v15 }
 0xd05   :  { %v1565_v1 = vmul.f32 0.5, %v1561_v58  ;;  %v1568_v62 = vmul.f32 %v1564_v56, %v1522_v35 }
 0xd06   :  { %v1571_v61 = vmul.f32 %v1567_v59, %v1533_v16 }
 0xd07   :  { %v1569_v63 = vmul.f32 %v1565_v1, %v1525_v21 }
 0xd08   :  { %v1573_v0 = vpack.c.bf16 %v1571_v61, %v1570_v7  ;;  %v3583_v61 = vld [vmem:[%s5234_s3 + $0x1] ss:$0 sm:$0xff] }
 0xd09   :  { %v1572_v2 = vpack.c.bf16 %v1569_v63, %v1568_v62 }
 0xd0b   :  { %3896 = vmatprep.mubr.msk.bf16.mxu1 %vm1613_vm10, %v1572_v2 }
 0xd0c   :  { %3897 = vmatmul.mubr.msk.bf16.vlgmr.msra.gmra.mrb[20].mxu1 %vm1613_vm10, %v1573_v0 }
 0xddf   :  { %v3898_v4 = vpop.f32.mrb[20].mxu1 }
 0xde0   :  { %v1654_v5 = vpop.f32.mrb[21].mxu1  ;;  %v1663_v6 = vadd.f32 %v3898_v4, %v3574_v3  ;;  %v3584_v4 = vld [vmem:[%s5235_s30 + $0x1] ss:$0 sm:$0xff]  ;;  %s5243_s30 = smov 64  }
 0xde1   :  { %v1655_v10 = vadd.f32 %v3574_v3, %v1654_v5  ;;  %v3899_v12 = vpop.f32.mrb[22].mxu1 }
 0xde2   :  { %v1657_v14 = vpop.f32.mrb[23].mxu1  ;;  %v1666_v15 = vadd.f32 %v3899_v12, %v3574_v3  ;;  %v4792_v35 = vadd.f32 %v1663_v6, %v4738_v9 }
 0xde3   :  { %v4789_v28 = vadd.f32 %v1655_v10, %v4714_v17  ;;  %v1658_v18 = vadd.f32 %v3574_v3, %v1657_v14 }
 0xde4   :  { %v4800_v16 = vadd.f32 %v1666_v15, %v4742_v11  ;;  %v1683_v17 = vsel %vm147_vm4, %v4792_v35, 0.0 }
 0xde5   :  { %v4795_v33 = vadd.f32 %v1658_v18, %v4718_v19  ;;  %v1677_v25 = vsel %vm147_vm4, %v4789_v28, 0.0 }
 0xde6   :  { %1678 = vadd.xlane.f32.xlu1 %v1677_v25  ;;  %v1686_v9 = vsel %vm147_vm4, %v4800_v16, 0.0 }
 0xde7   :  { %v1680_v37 = vsel %vm147_vm4, %v4795_v33, 0.0 }
 0xde8   :  { %1681 = vadd.xlane.f32.xlu0 %v1680_v37 }
 0xdea   :  { %1684 = vadd.xlane.f32.xlu1 %v1683_v17 }
 0xdec   :  { %1687 = vadd.xlane.f32.xlu0 %v1686_v9 }
 0xe73   :  { %v1679_v19 = vpop.xlane.xlu1 %1678 }
 0xe74   :  { %v1689_v20 = vmul.f32 0.03125, %v1679_v19 }
 0xe75   :  { %v1682_v21 = vpop.xlane.xlu0 %1681 }
 0xe76   :  { %v1693_v22 = vsub.f32 %v4789_v28, %v1689_v20  ;;  %v1690_v23 = vmul.f32 0.03125, %v1682_v21  ;;  %v3590_v20 = vld [vmem:[%s5236_s23 + $0x1] ss:$0 sm:$0xff]  ;;  %s5244_s23 = smov 48  }
 0xe77   :  { %v1685_v11 = vpop.xlane.xlu1 %1684 }
 0xe78   :  { %v1694_v29 = vsub.f32 %v4795_v33, %v1690_v23  ;;  %v1691_v39 = vmul.f32 0.03125, %v1685_v11  ;;  %v1697_v24 = vmul.f32 %v1693_v22, %v1693_v22 }
 0xe79   :  { %v1688_v26 = vpop.xlane.xlu0 %1687 }
 0xe7a   :  { %v1695_v27 = vsub.f32 %v4792_v35, %v1691_v39  ;;  %v1692_v30 = vmul.f32 0.03125, %v1688_v26  ;;  %v1701_v31 = vsel %vm147_vm4, %v1697_v24, 0.0  ;;  %v1698_v32 = vmul.f32 %v1694_v29, %v1694_v29 }
 0xe7b   :  { %1702 = vadd.xlane.f32.xlu1 %v1701_v31 }
 0xe7c   :  { %v1696_v34 = vsub.f32 %v4800_v16, %v1692_v30  ;;  %v1704_v36 = vsel %vm147_vm4, %v1698_v32, 0.0  ;;  %v1699_v38 = vmul.f32 %v1695_v27, %v1695_v27 }
 0xe7d   :  { %1705 = vadd.xlane.f32.xlu0 %v1704_v36 }
 0xe7e   :  { %v1707_v40 = vsel %vm147_vm4, %v1699_v38, 0.0  ;;  %v1700_v41 = vmul.f32 %v1696_v34, %v1696_v34 }
 0xe7f   :  { %1708 = vadd.xlane.f32.xlu1 %v1707_v40 }
 0xe80   :  { %v1710_v43 = vsel %vm147_vm4, %v1700_v41, 0.0 }
 0xe81   :  { %1711 = vadd.xlane.f32.xlu0 %v1710_v43 }
 0xf08   :  { %v1703_v46 = vpop.xlane.xlu1 %1702 }
 0xf09   :  { %v1713_v47 = vmul.f32 0.03125, %v1703_v46 }
 0xf0a   :  { %v1706_v48 = vpop.xlane.xlu0 %1705 }
 0xf0b   :  { %v1717_v42 = vadd.f32 1e-05, %v1713_v47  ;;  %v1714_v50 = vmul.f32 0.03125, %v1706_v48 }
 0xf0c   :  { %v1709_v51 = vpop.xlane.xlu1 %1708 }
 0xf0d   :  { %4269 = vrsqrt.f32 %v1717_v42  ;;  %v1718_v52 = vadd.f32 1e-05, %v1714_v50  ;;  %v1715_v53 = vmul.f32 0.03125, %v1709_v51 }
 0xf0e   :  { %v1712_v56 = vpop.xlane.xlu0 %1711 }
 0xf0f   :  { %4271 = vrsqrt.f32 %v1718_v52  ;;  %v1719_v58 = vadd.f32 1e-05, %v1715_v53  ;;  %v1716_v59 = vmul.f32 0.03125, %v1712_v56 }
 0xf11   :  { %4273 = vrsqrt.f32 %v1719_v58  ;;  %v1720_v1 = vadd.f32 1e-05, %v1716_v59 }
 0xf13   :  { %4275 = vrsqrt.f32 %v1720_v1 }
 0xf17   :  { %v4270_v7 = vpop.eup %4269 }
 0xf18   :  { %v1725_v62 = vmul.f32 %v4270_v7, %v1693_v22 }
 0xf19   :  { %v4272_v63 = vpop.eup %4271 }
 0xf1a   :  { %v1726_v0 = vmul.f32 %v4272_v63, %v1694_v29  ;;  %v1735_v2 = vmul.f32 %v3583_v61, %v1725_v62 }
 0xf1b   :  { %v4274_v3 = vpop.eup %4273 }
 0xf1c   :  { %v1727_v5 = vmul.f32 %v4274_v3, %v1695_v27  ;;  %v1736_v6 = vmul.f32 %v3583_v61, %v1726_v0  ;;  %v1745_v15 = vadd.f32 %v3584_v4, %v1735_v2 }
 0xf1d   :  { %v4276_v10 = vpop.eup %4275 }
 0xf1e   :  { %v1737_v12 = vmul.f32 %v3583_v61, %v1727_v5  ;;  %v1728_v14 = vmul.f32 %v4276_v10, %v1696_v34  ;;  %v1746_v18 = vadd.f32 %v3584_v4, %v1736_v6 }
 0xf20   :  { %v1738_v25 = vmul.f32 %v3583_v61, %v1728_v14  ;;  %v1749_v37 = vpack.c.bf16 %v1746_v18, %v1745_v15  ;;  %v1747_v17 = vadd.f32 %v3584_v4, %v1737_v12 }
 0xf22   :  { %3904 = vmatprep.mubr.msk.bf16.mxu0 %vm147_vm4, %v1749_v37  ;;  %v1748_v9 = vadd.f32 %v3584_v4, %v1738_v25 }
 0xf24   :  { %v1750_v19 = vpack.c.bf16 %v1748_v9, %v1747_v17 }
 0xf26   :  { %3905 = vmatmul.mubr.msk.bf16.vlgmr.msra.gmra.mrb[24].mxu0 %vm147_vm4, %v1750_v19 }
 0xff9   :  { %v3906_v21 = vpop.f32.mrb[24].mxu0 }
 0xffa   :  { %v4833_v22 = vadd.f32 %v3906_v21, %v3590_v20  ;;  %v1816_v23 = vpop.f32.mrb[25].mxu0 }
 0xffb   :  { %v1817_v11 = vadd.f32 %v3590_v20, %v1816_v23  ;;  %v3907_v29 = vpop.f32.mrb[26].mxu0 }
 0xffc   :  { %v4835_v39 = vadd.f32 %v3907_v29, %v3590_v20  ;;  %v1819_v24 = vpop.f32.mrb[27].mxu0 }
 0xffd   :  { %v1820_v26 = vadd.f32 %v3590_v20, %v1819_v24  ;;  %3912 = vmatprep.mubr.msk.f32.mxu0 %vm368_vm5, %v1817_v11 }
 0xfff   :  { %v4838_v27 = vpack.i.bf16 %v1820_v26, %v1817_v11 }
0x1001   :  { %4155 = vrot.lane.b32.xlu0 %v4838_v27, %s4363_s1  ;;  %4150 = vrot.lane.b32.xlu1 %v4838_v27, %s4364_s5 }
0x1005   :  { %2039 = vrot.lane.b32.xlu1 %v1817_v11, %s4365_s24  ;;  %v4880_v11 = vpack.i.bf16 %v4835_v39, %v4833_v22 }
0x1009   :  { %2041 = vrot.lane.b32.xlu1 %v1820_v26, %s4365_s24 }
0x1073   :  { %v4156_v30 = vpop.permute.xlu0 %4155  ;;  %v4151_v31 = vpop.permute.xlu1 %4150 }
0x1074   :  { %v4158_v32 = vunpack.i.h.bf16 %v4156_v30  ;;  %v4157_v34 = vunpack.i.l.bf16 %v4156_v30  ;;  %v4153_v36 = vunpack.i.h.bf16 %v4151_v31  ;;  %v4152_v38 = vunpack.i.l.bf16 %v4151_v31 }
0x1076   :  { %v4056_v40 = vpack.c.bf16 %v4153_v36, %v4152_v38  ;;  %v4066_v41 = vpack.c.bf16 %v4158_v32, %v4157_v34 }
0x1077   :  { %v2040_v43 = vpop.permute.xlu1 %2039 }
0x1078   :  { %4058 = vmatprep.subr.msk.bf16.mxu0 %vm4584_vm6, %v4056_v40 }
0x1079   :  { %4061 = vmatpush3.bf16.xpose.msk.msra.mxu0 %vm4584_vm6, %v4056_v40 }
0x107a   :  { %4068 = vmatprep.subr.msk.bf16.mxu0 %vm4584_vm6, %v4066_v41 }
0x107b   :  { %v2042_v44 = vpop.permute.xlu1 %2041 }
0x1080   :  { %3913 = vmatmul.mubr.msk.f32.vlgmr.msra.gmra.mrb[28].mxu0 %vm368_vm5, %v1820_v26 }
0x1081   :  { %4071 = vmatpush3.bf16.xpose.msk.msra.mxu0 %vm4584_vm6, %v4066_v41  ;;  %3926 = vmatprep.mubr.msk.f32.mxu0 %vm368_vm5, %v2040_v43 }
0x1082   :  { %3942 = vmatprep.subr.bf16.mxu0 %v4362_v13 }
0x1088   :  { %3927 = vmatmul.mubr.msk.f32.vlgmr.msra.gmra.mrb[30].mxu0 %vm368_vm5, %v2042_v44 }
0x1089   :  { %3944 = vmatprep.mubr.msk.bf16.mxu0 %vm4368_vm9, %v4362_v13 }
0x1153   :  { %v3914_v45 = vpop.f32.mrb[28].mxu0 }
0x1154   :  { %v1926_v46 = vmul.f32 0.25, %v3914_v45  ;;  %v1916_v47 = vpop.f32.mrb[29].mxu0 }
0x1155   :  { %v1925_v48 = vmul.f32 0.25, %v1916_v47 }
0x1156   :  { %v1928_v42 = vsel %vm4608_vm7, %v1926_v46, -1e+30 }
0x1157   :  { %v1932_v50 = vsel %vm368_vm5, %v1928_v42, -inf  ;;  %v1927_v51 = vsel %vm4614_vm8, %v1925_v48, -1e+30 }
0x1158   :  { %1933 = vmax.xlane.f32.xlu1 %v1932_v50  ;;  %v1929_v52 = vsel %vm368_vm5, %v1927_v51, -inf }
0x1159   :  { %1930 = vmax.xlane.f32.xlu0 %v1929_v52 }
0x115b   :  { %v3928_v53 = vpop.f32.mrb[30].mxu0 }
0x115c   :  { %v2121_v56 = vpop.f32.mrb[31].mxu0  ;;  %v2131_v58 = vmul.f32 0.25, %v3928_v53  ;;  %v4899_v53 = vld [vmem:[%s5196_s7 + $0x18] sm:$0xff]  }
0x115d   :  { %v2130_v59 = vmul.f32 0.25, %v2121_v56 }
0x115e   :  { %v2133_v61 = vsel %vm4608_vm7, %v2131_v58, -1e+30 }
0x115f   :  { %v2132_v1 = vsel %vm4614_vm8, %v2130_v59, -1e+30  ;;  %v2137_v62 = vsel %vm368_vm5, %v2133_v61, -inf  ;;  %v4204_v59 = vld [vmem:[%s5196_s7 + $0x10] sm:$0xff]  }
0x1160   :  { %v2134_v7 = vsel %vm368_vm5, %v2132_v1, -inf  ;;  %3943 = vmatpush3.bf16.msra.mxu0 %v4204_v59 }
0x1161   :  { %2135 = vmax.xlane.f32.xlu0 %v2134_v7 }
0x1165   :  { %2138 = vmax.xlane.f32.xlu0 %v2137_v62 }
0x11e5   :  { %v1934_v63 = vpop.xlane.xlu1 %1933 }
0x11e6   :  { %v1936_v0 = vsub.f32 %v1928_v42, %v1934_v63  ;;  %v1931_v2 = vpop.xlane.xlu0 %1930 }
0x11e7   :  { %v1935_v3 = vsub.f32 %v1927_v51, %v1931_v2 }
0x11e8   :  { %v1939_v4 = vmul.f32 1.442695, %v1936_v0 }
0x11e9   :  { %v1937_v5 = vmul.f32 1.442695, %v1935_v3 }
0x11ea   :  { %4277 = vpow2.f32 %v1939_v4 }
0x11eb   :  { %4279 = vpow2.f32 %v1937_v5 }
0x11ee   :  { %v2136_v6 = vpop.xlane.xlu0 %2135 }
0x11ef   :  { %v2140_v10 = vsub.f32 %v2132_v1, %v2136_v6 }
0x11f1   :  { %v2142_v12 = vmul.f32 1.442695, %v2140_v10 }
0x11f2   :  { %v2139_v14 = vpop.xlane.xlu0 %2138 }
0x11f3   :  { %4281 = vpow2.f32 %v2142_v12  ;;  %v2141_v15 = vsub.f32 %v2133_v61, %v2139_v14 }
0x11f4   :  { %v4278_v18 = vpop.eup %4277 }
0x11f5   :  { %v4280_v25 = vpop.eup %4279  ;;  %v2144_v37 = vmul.f32 1.442695, %v2141_v15  ;;  %v1944_v17 = vsel %vm368_vm5, %v4278_v18, 0.0 }
0x11f6   :  { %1945 = vadd.xlane.f32.xlu0 %v1944_v17  ;;  %v1941_v9 = vsel %vm368_vm5, %v4280_v25, 0.0 }
0x11f7   :  { %4283 = vpow2.f32 %v2144_v37  ;;  %1942 = vadd.xlane.f32.xlu1 %v1941_v9 }
0x11fd   :  { %v4282_v19 = vpop.eup %4281 }
0x11fe   :  { %v2146_v20 = vsel %vm368_vm5, %v4282_v19, 0.0 }
0x11ff   :  { %2147 = vadd.xlane.f32.xlu1 %v2146_v20 }
0x1201   :  { %v4284_v21 = vpop.eup %4283 }
0x1202   :  { %v2149_v23 = vsel %vm368_vm5, %v4284_v21, 0.0 }
0x1203   :  { %2150 = vadd.xlane.f32.xlu0 %v2149_v23 }
0x1210   :  { %4160 = vrot.lane.b32.xlu1 %v4838_v27, %s5243_s30 }
0x1214   :  { %4170 = vrot.lane.b32.xlu1 %v4880_v11, %s4364_s5 }
0x1218   :  { %4175 = vrot.lane.b32.xlu1 %v4880_v11, %s4363_s1 }
0x1219   :  { %4165 = vrot.lane.b32.xlu0 %v4838_v27, %s5244_s23 }
0x121c   :  { %2549 = vrot.lane.b32.xlu1 %v4835_v39, %s4365_s24 }
0x121d   :  { %2547 = vrot.lane.b32.xlu0 %v4833_v22, %s4365_s24 }
0x1283   :  { %v1946_v24 = vpop.xlane.xlu0 %1945 }
0x1284   :  { %v1943_v29 = vpop.xlane.xlu1 %1942 }
0x1285   :  { %4285 = vrcp.f32 %v1943_v29 }
0x1286   :  { %4287 = vrcp.f32 %v1946_v24 }
0x128c   :  { %v2148_v26 = vpop.xlane.xlu1 %2147 }
0x128d   :  { %4289 = vrcp.f32 %v2148_v26 }
0x128f   :  { %v4286_v30 = vpop.eup %4285 }
0x1290   :  { %v4161_v31 = vpop.permute.xlu1 %4160  ;;  %v2151_v32 = vpop.xlane.xlu0 %2150  ;;  %v1949_v34 = vmul.f32 %v4286_v30, %v4280_v25 }
0x1291   :  { %v4163_v36 = vunpack.i.h.bf16 %v4161_v31  ;;  %v4162_v38 = vunpack.i.l.bf16 %v4161_v31  ;;  %4291 = vrcp.f32 %v2151_v32  ;;  %v4288_v40 = vpop.eup %4287 }
0x1292   :  { %3919 = vmatprep.mubr.msk.f32.mxu1 %vm368_vm5, %v1949_v34  ;;  %v1950_v46 = vmul.f32 %v4288_v40, %v4278_v18 }
0x1293   :  { %v4062_v27 = vpack.c.bf16 %v4163_v36, %v4162_v38 }
0x1294   :  { %v4166_v41 = vpop.permute.xlu0 %4165  ;;  %v4171_v47 = vpop.permute.xlu1 %4170 }
0x1295   :  { %v4168_v43 = vunpack.i.h.bf16 %v4166_v41  ;;  %v4167_v44 = vunpack.i.l.bf16 %v4166_v41  ;;  %4063 = vmatprep.subr.bf16.mxu1 %v4062_v27  ;;  %v4173_v50 = vunpack.i.h.bf16 %v4171_v47  ;;  %v4172_v51 = vunpack.i.l.bf16 %v4171_v47 }
0x1296   :  { %4065 = vmatpush3.bf16.msra.mxu1 %v4062_v27 }
0x1297   :  { %v4290_v45 = vpop.eup %4289  ;;  %v4072_v48 = vpack.c.bf16 %v4168_v43, %v4167_v44  ;;  %v4076_v58 = vpack.c.bf16 %v4173_v50, %v4172_v51 }
0x1298   :  { %v2154_v42 = vmul.f32 %v4290_v45, %v4282_v19  ;;  %v4176_v61 = vpop.permute.xlu1 %4175  ;;  %v2548_v6 = vpop.permute.xlu0 %2547 }
0x1299   :  { %3920 = vmatmul.mubr.msk.f32.vlgmr.msra.gmra.mrb[24].mxu1 %vm368_vm5, %v1950_v46  ;;  %4073 = vmatprep.subr.bf16.mxu1 %v4072_v48  ;;  %v4178_v63 = vunpack.i.h.bf16 %v4176_v61  ;;  %v4177_v0 = vunpack.i.l.bf16 %v4176_v61 }
0x129a   :  { %4075 = vmatpush3.bf16.msra.mxu1 %v4072_v48  ;;  %3933 = vmatprep.mubr.msk.f32.mxu1 %vm368_vm5, %v2154_v42 }
0x129b   :  { %v4292_v52 = vpop.eup %4291  ;;  %3936 = vmatprep.subr.bf16.mxu1 %v4362_v13  ;;  %v4086_v5 = vpack.c.bf16 %v4178_v63, %v4177_v0  ;;  %v4951_v0 = vld [vmem:[%s5197_s8 + $0x1] ss:$0 sm:$0xff] }
0x129c   :  { %v2155_v56 = vmul.f32 %v4292_v52, %v4284_v21  ;;  %v2550_v10 = vpop.permute.xlu1 %2549 }
0x129e   :  { %3934 = vmatmul.mubr.msk.f32.vlgmr.msra.gmra.mrb[26].mxu1 %vm368_vm5, %v2155_v56 }
0x129f   :  { %3937 = vmatpush3.bf16.msra.mxu1 %v4899_v53  ;;  %3938 = vmatprep.mubr.msk.bf16.mxu1 %vm4368_vm9, %v4362_v13 }
0x12a0   :  { %4078 = vmatprep.subr.msk.bf16.mxu1 %vm4584_vm6, %v4076_v58 }
0x136c   :  { %v3921_v1 = vpop.f32.mrb[24].mxu1 }
0x136d   :  { %v2029_v7 = vpop.f32.mrb[25].mxu1 }
0x136e   :  { %v2038_v62 = vpack.c.bf16 %v3921_v1, %v2029_v7 }
0x1370   :  { %3945 = vmatmul.mubr.msk.bf16.vlgmr.msra.gmra.mrb[32].mxu0 %vm368_vm5, %v2038_v62 }
0x1371   :  { %v3935_v2 = vpop.f32.mrb[26].mxu1 }
0x1372   :  { %v2234_v3 = vpop.f32.mrb[27].mxu1 }
0x1373   :  { %v2243_v4 = vpack.c.bf16 %v3935_v2, %v2234_v3 }
0x1375   :  { %3939 = vmatmul.mubr.msk.bf16.vlgmr.msra.gmra.mrb[28].mxu1 %vm368_vm5, %v2243_v4 }
0x1376   :  { %4081 = vmatpush3.bf16.xpose.msk.msra.mxu1 %vm4584_vm6, %v4076_v58  ;;  %3952 = vmatprep.mubr.msk.f32.mxu1 %vm368_vm5, %v4833_v22 }
0x1377   :  { %4088 = vmatprep.subr.msk.bf16.mxu1 %vm4584_vm6, %v4086_v5 }
0x137d   :  { %3953 = vmatmul.mubr.msk.f32.vlgmr.msra.gmra.mrb[32].mxu1 %vm368_vm5, %v4835_v39 }
0x137e   :  { %4091 = vmatpush3.bf16.xpose.msk.msra.mxu1 %vm4584_vm6, %v4086_v5  ;;  %3966 = vmatprep.mubr.msk.f32.mxu1 %vm368_vm5, %v2548_v6 }
0x137f   :  { %3982 = vmatprep.subr.bf16.mxu1 %v4362_v13 }
0x1385   :  { %3967 = vmatmul.mubr.msk.f32.vlgmr.msra.gmra.mrb[34].mxu1 %vm368_vm5, %v2550_v10 }
0x1386   :  { %3983 = vmatpush3.bf16.msra.mxu1 %v4204_v59  ;;  %3984 = vmatprep.mubr.msk.bf16.mxu1 %vm4368_vm9, %v4362_v13 }
0x1443   :  { %v2337_v22 = vpop.f32.mrb[32].mxu0 }
0x1444   :  { %v3946_v12 = vpop.f32.mrb[33].mxu0 }
0x1445   :  { %v2340_v14 = vpop.f32.mrb[34].mxu0 }
0x1446   :  { %v3947_v15 = vpop.f32.mrb[35].mxu0 }
0x1448   :  { %v2287_v18 = vpop.f32.mrb[28].mxu1 }
0x1449   :  { %v2338_v39 = vadd.f32 %v2337_v22, %v2287_v18  ;;  %v3940_v25 = vpop.f32.mrb[29].mxu1 }
0x144a   :  { %v2290_v49 = vpop.f32.mrb[30].mxu1 }
0x144b   :  { %v2341_v37 = vadd.f32 %v2340_v14, %v2290_v49  ;;  %v3941_v17 = vpop.f32.mrb[31].mxu1  ;;  %v2840_v63 = vadd.f32 %v2338_v39, %v4789_v28 }
0x144d   :  { %v4954_v2 = vadd.f32 %v4951_v0, %v2840_v63  ;;  %v2841_v3 = vadd.f32 %v2341_v37, %v4795_v33 }
0x144f   :  { %v4958_v4 = vadd.f32 %v4951_v0, %v2841_v3  ;;  %v2860_v5 = vsel %vm147_vm4, %v4954_v2, 0.0 }
0x1450   :  { %v3954_v9 = vpop.f32.mrb[32].mxu1 }
0x1451   :  { %v2434_v19 = vmul.f32 0.25, %v3954_v9  ;;  %v2424_v20 = vpop.f32.mrb[33].mxu1  ;;  %v2863_v28 = vsel %vm147_vm4, %v4958_v4, 0.0 }
0x1452   :  { %v2433_v21 = vmul.f32 0.25, %v2424_v20 }
0x1453   :  { %v2436_v23 = vsel %vm4608_vm7, %v2434_v19, -1e+30 }
0x1454   :  { %v2440_v29 = vsel %vm368_vm5, %v2436_v23, -inf  ;;  %v2435_v24 = vsel %vm4614_vm8, %v2433_v21, -1e+30 }
0x1455   :  { %2441 = vmax.xlane.f32.xlu1 %v2440_v29  ;;  %v2437_v26 = vsel %vm368_vm5, %v2435_v24, -inf }
0x1456   :  { %2438 = vmax.xlane.f32.xlu0 %v2437_v26 }
0x1458   :  { %v3968_v30 = vpop.f32.mrb[34].mxu1 }
0x1459   :  { %v2629_v31 = vpop.f32.mrb[35].mxu1  ;;  %v2639_v32 = vmul.f32 0.25, %v3968_v30 }
0x145a   :  { %v2638_v34 = vmul.f32 0.25, %v2629_v31 }
0x145b   :  { %v2641_v27 = vsel %vm4608_vm7, %v2639_v32, -1e+30 }
0x145c   :  { %v2640_v36 = vsel %vm4614_vm8, %v2638_v34, -1e+30  ;;  %v2645_v40 = vsel %vm368_vm5, %v2641_v27, -inf }
0x145d   :  { %v2642_v38 = vsel %vm368_vm5, %v2640_v36, -inf }
0x145e   :  { %2643 = vmax.xlane.f32.xlu0 %v2642_v38 }
0x1462   :  { %2646 = vmax.xlane.f32.xlu0 %v2645_v40 }
0x14e2   :  { %v2442_v41 = vpop.xlane.xlu1 %2441 }
0x14e3   :  { %v2444_v43 = vsub.f32 %v2436_v23, %v2442_v41  ;;  %v2439_v44 = vpop.xlane.xlu0 %2438 }
0x14e4   :  { %v2443_v45 = vsub.f32 %v2435_v24, %v2439_v44 }
0x14e5   :  { %v2447_v46 = vmul.f32 1.442695, %v2444_v43 }
0x14e6   :  { %v2445_v47 = vmul.f32 1.442695, %v2443_v45 }
0x14e7   :  { %4293 = vpow2.f32 %v2447_v46 }
0x14e8   :  { %4295 = vpow2.f32 %v2445_v47 }
0x14eb   :  { %v2644_v48 = vpop.xlane.xlu0 %2643 }
0x14ec   :  { %v2648_v60 = vsub.f32 %v2640_v36, %v2644_v48 }
0x14ee   :  { %v2650_v42 = vmul.f32 1.442695, %v2648_v60 }
0x14ef   :  { %v2647_v50 = vpop.xlane.xlu0 %2646 }
0x14f0   :  { %4297 = vpow2.f32 %v2650_v42  ;;  %v2649_v51 = vsub.f32 %v2641_v27, %v2647_v50 }
0x14f1   :  { %v4294_v52 = vpop.eup %4293 }
0x14f2   :  { %v4296_v57 = vpop.eup %4295  ;;  %v2652_v56 = vmul.f32 1.442695, %v2649_v51  ;;  %v2452_v58 = vsel %vm368_vm5, %v4294_v52, 0.0 }
0x14f3   :  { %2453 = vadd.xlane.f32.xlu0 %v2452_v58  ;;  %v2449_v59 = vsel %vm368_vm5, %v4296_v57, 0.0 }
0x14f4   :  { %4299 = vpow2.f32 %v2652_v56  ;;  %2450 = vadd.xlane.f32.xlu1 %v2449_v59 }
0x14fa   :  { %v4298_v1 = vpop.eup %4297 }
0x14fb   :  { %v2654_v7 = vsel %vm368_vm5, %v4298_v1, 0.0 }
0x14fc   :  { %2655 = vadd.xlane.f32.xlu1 %v2654_v7 }
0x14fe   :  { %v4300_v61 = vpop.eup %4299 }
0x14ff   :  { %v2657_v62 = vsel %vm368_vm5, %v4300_v61, 0.0 }
0x1500   :  { %2658 = vadd.xlane.f32.xlu0 %v2657_v62 }
0x150d   :  { %4180 = vrot.lane.b32.xlu1 %v4880_v11, %s5243_s30 }
0x1516   :  { %4185 = vrot.lane.b32.xlu0 %v4880_v11, %s5244_s23 }
0x1531   :  { %2861 = vadd.xlane.f32.xlu1 %v2860_v5 }
0x1535   :  { %2864 = vadd.xlane.f32.xlu0 %v2863_v28 }
0x1580   :  { %v2454_v6 = vpop.xlane.xlu0 %2453 }
0x1581   :  { %v2451_v11 = vpop.xlane.xlu1 %2450 }
0x1582   :  { %4301 = vrcp.f32 %v2451_v11 }
0x1583   :  { %4303 = vrcp.f32 %v2454_v6 }
0x1589   :  { %v2656_v10 = vpop.xlane.xlu1 %2655 }
0x158a   :  { %4305 = vrcp.f32 %v2656_v10 }
0x158c   :  { %v4302_v22 = vpop.eup %4301 }
0x158d   :  { %v4181_v12 = vpop.permute.xlu1 %4180  ;;  %v2659_v33 = vpop.xlane.xlu0 %2658  ;;  %v2457_v14 = vmul.f32 %v4302_v22, %v4296_v57 }
0x158e   :  { %v4183_v15 = vunpack.i.h.bf16 %v4181_v12  ;;  %v4182_v18 = vunpack.i.l.bf16 %v4181_v12  ;;  %4307 = vrcp.f32 %v2659_v33  ;;  %v4304_v25 = vpop.eup %4303 }
0x158f   :  { %3959 = vmatprep.mubr.msk.f32.mxu0 %vm368_vm5, %v2457_v14  ;;  %v2458_v19 = vmul.f32 %v4304_v25, %v4294_v52 }
0x1590   :  { %v4082_v39 = vpack.c.bf16 %v4183_v15, %v4182_v18 }
0x1591   :  { %v4186_v49 = vpop.permute.xlu0 %4185 }
0x1592   :  { %v4188_v37 = vunpack.i.h.bf16 %v4186_v49  ;;  %v4187_v17 = vunpack.i.l.bf16 %v4186_v49  ;;  %4083 = vmatprep.subr.bf16.mxu0 %v4082_v39  ;;  %v3633_v49 = vld [vmem:[%s5198_s9 + $0x1] ss:$0 sm:$0xff] }
0x1593   :  { %4085 = vmatpush3.bf16.msra.mxu0 %v4082_v39 }
0x1594   :  { %v4306_v9 = vpop.eup %4305  ;;  %v4092_v20 = vpack.c.bf16 %v4188_v37, %v4187_v17 }
0x1595   :  { %v2662_v21 = vmul.f32 %v4306_v9, %v4298_v1 }
0x1596   :  { %3960 = vmatmul.mubr.msk.f32.vlgmr.msra.gmra.mrb[36].mxu0 %vm368_vm5, %v2458_v19  ;;  %4093 = vmatprep.subr.bf16.mxu0 %v4092_v20 }
0x1597   :  { %4095 = vmatpush3.bf16.msra.mxu0 %v4092_v20  ;;  %3973 = vmatprep.mubr.msk.f32.mxu0 %vm368_vm5, %v2662_v21  ;;  %v3634_v20 = vld [vmem:[%s5199_s10 + $0x1] ss:$0 sm:$0xff] }
0x1598   :  { %v4308_v23 = vpop.eup %4307  ;;  %3976 = vmatprep.subr.bf16.mxu0 %v4362_v13 }
0x1599   :  { %v2663_v29 = vmul.f32 %v4308_v23, %v4300_v61 }
0x159b   :  { %3974 = vmatmul.mubr.msk.f32.vlgmr.msra.gmra.mrb[38].mxu0 %vm368_vm5, %v2663_v29 }
0x159c   :  { %3977 = vmatpush3.bf16.msra.mxu0 %v4899_v53  ;;  %3978 = vmatprep.mubr.msk.bf16.mxu0 %vm4368_vm9, %v4362_v13 }
0x15be   :  { %v2862_v38 = vpop.xlane.xlu1 %2861 }
0x15bf   :  { %v2872_v53 = vmul.f32 0.03125, %v2862_v38 }
0x15c1   :  { %v2876_v60 = vsub.f32 %v4954_v2, %v2872_v53 }
0x15c2   :  { %v2865_v41 = vpop.xlane.xlu0 %2864 }
0x15c3   :  { %v2873_v45 = vmul.f32 0.03125, %v2865_v41  ;;  %v2880_v1 = vmul.f32 %v2876_v60, %v2876_v60 }
0x15c5   :  { %v2877_v52 = vsub.f32 %v4958_v4, %v2873_v45  ;;  %v2884_v61 = vsel %vm147_vm4, %v2880_v1, 0.0 }
0x15c7   :  { %v2881_v7 = vmul.f32 %v2877_v52, %v2877_v52 }
0x15c9   :  { %v2887_v62 = vsel %vm147_vm4, %v2881_v7, 0.0 }
0x1669   :  { %v3961_v24 = vpop.f32.mrb[36].mxu0 }
0x166a   :  { %v2537_v26 = vpop.f32.mrb[37].mxu0 }
0x166b   :  { %v2546_v30 = vpack.c.bf16 %v3961_v24, %v2537_v26  ;;  %v4205_v26 = vld [vmem:[%s5200_s11 + $0x10] sm:$0xff]  }
0x166c   :  { %3988 = vmatprep.subr.bf16.mxu0 %v4205_v26 }
0x166d   :  { %3985 = vmatmul.mubr.msk.bf16.vlgmr.msra.gmra.mrb[36].mxu1 %vm368_vm5, %v2546_v30  ;;  %v4206_v30 = vld [vmem:[%s5200_s11 + $0x18] sm:$0xff]  }
0x166e   :  { %v3975_v31 = vpop.f32.mrb[38].mxu0 }
0x166f   :  { %v2742_v32 = vpop.f32.mrb[39].mxu0 }
0x1670   :  { %v2751_v34 = vpack.c.bf16 %v3975_v31, %v2742_v32 }
0x1672   :  { %3979 = vmatmul.mubr.msk.bf16.vlgmr.msra.gmra.mrb[40].mxu0 %vm368_vm5, %v2751_v34 }
0x1673   :  { %3989 = vmatpush3.bf16.msra.mxu0 %v4205_v26 }
0x1674   :  { %3990 = vmatprep.subr.bf16.mxu0 %v4206_v30 }
0x1677   :  { %3991 = vmatpush3.bf16.msra.mxu0 %v4206_v30 }
0x1740   :  { %v2833_v36 = vpop.f32.mrb[36].mxu1 }
0x1741   :  { %v3986_v27 = vpop.f32.mrb[37].mxu1 }
0x1742   :  { %v2836_v40 = vpop.f32.mrb[38].mxu1 }
0x1743   :  { %v3987_v43 = vpop.f32.mrb[39].mxu1 }
0x1745   :  { %v2789_v44 = vpop.f32.mrb[40].mxu0 }
0x1746   :  { %v2834_v46 = vadd.f32 %v2833_v36, %v2789_v44  ;;  %v3980_v47 = vpop.f32.mrb[41].mxu0 }
0x1747   :  { %v2792_v48 = vpop.f32.mrb[42].mxu0 }
0x1748   :  { %v2842_v42 = vadd.f32 %v2834_v46, %v4792_v35  ;;  %v2837_v50 = vadd.f32 %v2836_v40, %v2792_v48  ;;  %v3981_v51 = vpop.f32.mrb[43].mxu0 }
0x1749   :  { %v4210_v51 = vld [vmem:[%s5202_s13 + $0x38] sm:$0xff]  }
0x174a   :  { %v4978_v57 = vadd.f32 %v4951_v0, %v2842_v42  ;;  %v2843_v56 = vadd.f32 %v2837_v50, %v4800_v16  ;;  %v4208_v42 = vld [vmem:[%s5202_s13 + $0x28] sm:$0xff]   ;;  %v4209_v50 = vld [vmem:[%s5202_s13 + $0x30] sm:$0xff]  }
0x174c   :  { %v4982_v58 = vadd.f32 %v4951_v0, %v2843_v56  ;;  %v2866_v59 = vsel %vm147_vm4, %v4978_v57, 0.0 }
0x174d   :  { %2867 = vadd.xlane.f32.xlu1 %v2866_v59 }
0x174e   :  { %v2869_v35 = vsel %vm147_vm4, %v4982_v58, 0.0 }
0x174f   :  { %2870 = vadd.xlane.f32.xlu0 %v2869_v35 }
0x1751   :  { %2885 = vadd.xlane.f32.xlu1 %v2884_v61 }
0x1753   :  { %2888 = vadd.xlane.f32.xlu0 %v2887_v62 }
0x17da   :  { %v2868_v16 = vpop.xlane.xlu1 %2867 }
0x17db   :  { %v2874_v63 = vmul.f32 0.03125, %v2868_v16 }
0x17dc   :  { %v2871_v0 = vpop.xlane.xlu0 %2870 }
0x17dd   :  { %v2878_v3 = vsub.f32 %v4978_v57, %v2874_v63  ;;  %v2875_v5 = vmul.f32 0.03125, %v2871_v0 }
0x17de   :  { %v2886_v28 = vpop.xlane.xlu1 %2885 }
0x17df   :  { %v2879_v11 = vsub.f32 %v4982_v58, %v2875_v5  ;;  %v2896_v6 = vmul.f32 0.03125, %v2886_v28  ;;  %v2882_v10 = vmul.f32 %v2878_v3, %v2878_v3 }
0x17e0   :  { %v2889_v22 = vpop.xlane.xlu0 %2888 }
0x17e1   :  { %v2900_v12 = vadd.f32 1e-05, %v2896_v6  ;;  %v2897_v33 = vmul.f32 0.03125, %v2889_v22  ;;  %v2890_v14 = vsel %vm147_vm4, %v2882_v10, 0.0  ;;  %v2883_v15 = vmul.f32 %v2879_v11, %v2879_v11 }
0x17e2   :  { %2891 = vadd.xlane.f32.xlu1 %v2890_v14 }
0x17e3   :  { %4309 = vrsqrt.f32 %v2900_v12  ;;  %v2901_v18 = vadd.f32 1e-05, %v2897_v33  ;;  %v2893_v39 = vsel %vm147_vm4, %v2883_v15, 0.0 }
0x17e4   :  { %2894 = vadd.xlane.f32.xlu0 %v2893_v39 }
0x17e5   :  { %4311 = vrsqrt.f32 %v2901_v18 }
0x17ed   :  { %v4310_v25 = vpop.eup %4309 }
0x17ee   :  { %v2908_v37 = vmul.f32 %v4310_v25, %v2876_v60  ;;  %v4207_v60 = vld [vmem:[%s5202_s13 + $0x20] sm:$0xff]  }
0x17ef   :  { %v4312_v17 = vpop.eup %4311  ;;  %3996 = vmatprep.subr.bf16.mxu1 %v4207_v60 }
0x17f0   :  { %v2909_v9 = vmul.f32 %v4312_v17, %v2877_v52  ;;  %v2918_v19 = vmul.f32 %v3633_v49, %v2908_v37  ;;  %3997 = vmatpush3.bf16.msra.mxu1 %v4207_v60  ;;  %v3640_v52 = vld [vmem:[%s5201_s12 + $0x1] ss:$0 sm:$0xff] }
0x17f1   :  { %3998 = vmatprep.subr.bf16.mxu1 %v4208_v42 }
0x17f2   :  { %v2919_v21 = vmul.f32 %v3633_v49, %v2909_v9  ;;  %v2928_v23 = vadd.f32 %v3634_v20, %v2918_v19 }
0x17f4   :  { %v2929_v29 = vadd.f32 %v3634_v20, %v2919_v21  ;;  %3999 = vmatpush3.bf16.msra.mxu1 %v4208_v42 }
0x17f5   :  { %4000 = vmatprep.subr.bf16.mxu1 %v4209_v50 }
0x17f6   :  { %v2932_v24 = vpack.c.bf16 %v2929_v29, %v2928_v23 }
0x17f8   :  { %3992 = vmatprep.mubr.msk.bf16.mxu0 %vm147_vm4, %v2932_v24  ;;  %4001 = vmatpush3.bf16.msra.mxu1 %v4209_v50 }
0x17f9   :  { %4002 = vmatprep.subr.bf16.mxu1 %v4210_v51 }
0x17fc   :  { %4003 = vmatpush3.bf16.msra.mxu1 %v4210_v51 }
0x186f   :  { %v2892_v31 = vpop.xlane.xlu1 %2891 }
0x1870   :  { %v2898_v32 = vmul.f32 0.03125, %v2892_v31 }
0x1871   :  { %v2895_v34 = vpop.xlane.xlu0 %2894 }
0x1872   :  { %v2902_v36 = vadd.f32 1e-05, %v2898_v32  ;;  %v2899_v38 = vmul.f32 0.03125, %v2895_v34 }
0x1874   :  { %4313 = vrsqrt.f32 %v2902_v36  ;;  %v2903_v27 = vadd.f32 1e-05, %v2899_v38 }
0x1876   :  { %4315 = vrsqrt.f32 %v2903_v27 }
0x187e   :  { %v4314_v40 = vpop.eup %4313 }
0x187f   :  { %v2910_v41 = vmul.f32 %v4314_v40, %v2878_v3 }
0x1880   :  { %v4316_v43 = vpop.eup %4315 }
0x1881   :  { %v2920_v53 = vmul.f32 %v3633_v49, %v2910_v41  ;;  %v2911_v44 = vmul.f32 %v4316_v43, %v2879_v11 }
0x1883   :  { %v2921_v45 = vmul.f32 %v3633_v49, %v2911_v44  ;;  %v2930_v46 = vadd.f32 %v3634_v20, %v2920_v53  ;;  %v3654_v44 = vld [vmem:[%s5203_s14 + $0x1] ss:$0 sm:$0xff] }
0x1885   :  { %v2931_v47 = vadd.f32 %v3634_v20, %v2921_v45 }
0x1887   :  { %v2933_v48 = vpack.c.bf16 %v2931_v47, %v2930_v46 }
0x1889   :  { %3993 = vmatmul.mubr.msk.bf16.vlgmr.msra.gmra.mrb[44].mxu0 %vm147_vm4, %v2933_v48 }
0x195c   :  { %v3994_v56 = vpop.f32.mrb[44].mxu0 }
0x195d   :  { %v3008_v59 = vadd.f32 %v3994_v56, %v3640_v52  ;;  %v2999_v1 = vpop.f32.mrb[45].mxu0 }
0x195e   :  { %v3000_v35 = vadd.f32 %v3640_v52, %v2999_v1  ;;  %v3995_v7 = vpop.f32.mrb[46].mxu0 }
0x195f   :  { %v3016_v61 = vmul.f32 %v3008_v59, %v3008_v59  ;;  %v3011_v62 = vadd.f32 %v3995_v7, %v3640_v52  ;;  %v3002_v16 = vpop.f32.mrb[47].mxu0 }
0x1960   :  { %v3014_v63 = vmul.f32 %v3000_v35, %v3000_v35  ;;  %v3003_v0 = vadd.f32 %v3640_v52, %v3002_v16 }
0x1961   :  { %v3020_v3 = vmul.f32 %v3016_v61, %v3008_v59  ;;  %v3017_v5 = vmul.f32 %v3011_v62, %v3011_v62 }
0x1962   :  { %v3018_v28 = vmul.f32 %v3014_v63, %v3000_v35  ;;  %v3015_v11 = vmul.f32 %v3003_v0, %v3003_v0 }
0x1963   :  { %v3024_v6 = vmul.f32 0.044715, %v3020_v3  ;;  %v3021_v10 = vmul.f32 %v3017_v5, %v3011_v62 }
0x1964   :  { %v3022_v22 = vmul.f32 0.044715, %v3018_v28  ;;  %v3019_v12 = vmul.f32 %v3015_v11, %v3003_v0 }
0x1965   :  { %v3028_v33 = vadd.f32 %v3024_v6, %v3008_v59  ;;  %v3025_v14 = vmul.f32 0.044715, %v3021_v10 }
0x1966   :  { %v3026_v15 = vadd.f32 %v3022_v22, %v3000_v35  ;;  %v3023_v18 = vmul.f32 0.044715, %v3019_v12 }
0x1967   :  { %v3032_v39 = vmul.f32 0.7978846, %v3028_v33  ;;  %v3029_v25 = vadd.f32 %v3025_v14, %v3011_v62 }
0x1968   :  { %v3030_v49 = vmul.f32 0.7978846, %v3026_v15  ;;  %v3027_v37 = vadd.f32 %v3023_v18, %v3003_v0 }
0x1969   :  { %4317 = vtanh.f32 %v3032_v39  ;;  %v3033_v17 = vmul.f32 0.7978846, %v3029_v25  ;;  %v4211_v25 = vld [vmem:[%s5206_s17] sm:$0xff]  }
0x196a   :  { %4319 = vtanh.f32 %v3030_v49  ;;  %v3031_v9 = vmul.f32 0.7978846, %v3027_v37  ;;  %4008 = vmatprep.subr.bf16.mxu0 %v4211_v25  ;;  %v4212_v49 = vld [vmem:[%s5206_s17 + $0x8] sm:$0xff]  }
0x196b   :  { %4321 = vtanh.f32 %v3033_v17  ;;  %4009 = vmatpush3.bf16.msra.mxu0 %v4211_v25 }
0x196c   :  { %4323 = vtanh.f32 %v3031_v9  ;;  %4010 = vmatprep.subr.bf16.mxu0 %v4212_v49 }
0x196f   :  { %4011 = vmatpush3.bf16.msra.mxu0 %v4212_v49 }
0x1973   :  { %v4318_v19 = vpop.eup %4317 }
0x1974   :  { %v4320_v20 = vpop.eup %4319  ;;  %v3040_v21 = vadd.f32 1.0, %v4318_v19 }
0x1975   :  { %v4322_v23 = vpop.eup %4321  ;;  %v3038_v29 = vadd.f32 1.0, %v4320_v20 }
0x1976   :  { %v4324_v24 = vpop.eup %4323  ;;  %v3044_v26 = vmul.f32 0.5, %v3040_v21  ;;  %v3041_v30 = vadd.f32 1.0, %v4322_v23 }
0x1977   :  { %v3042_v31 = vmul.f32 0.5, %v3038_v29  ;;  %v3039_v32 = vadd.f32 1.0, %v4324_v24 }
0x1978   :  { %v3045_v34 = vmul.f32 0.5, %v3041_v30  ;;  %v3048_v38 = vmul.f32 %v3044_v26, %v3008_v59 }
0x1979   :  { %v3043_v36 = vmul.f32 0.5, %v3039_v32  ;;  %v3046_v40 = vmul.f32 %v3042_v31, %v3000_v35 }
0x197a   :  { %v3049_v27 = vmul.f32 %v3045_v34, %v3011_v62  ;;  %v3661_v34 = vld [vmem:[%s5204_s15] ss:$0 sm:$0xff] }
0x197b   :  { %v3047_v41 = vmul.f32 %v3043_v36, %v3003_v0 }
0x197c   :  { %v3051_v43 = vpack.c.bf16 %v3049_v27, %v3048_v38 }
0x197d   :  { %v3050_v53 = vpack.c.bf16 %v3047_v41, %v3046_v40 }
0x197f   :  { %4004 = vmatprep.mubr.msk.bf16.mxu1 %vm1613_vm10, %v3050_v53 }
0x1980   :  { %4005 = vmatmul.mubr.msk.bf16.vlgmr.msra.gmra.mrb[40].mxu1 %vm1613_vm10, %v3051_v43  ;;  %v3662_v43 = vld [vmem:[%s5205_s16] ss:$0 sm:$0xff] }
0x1a53   :  { %v4006_v45 = vpop.f32.mrb[40].mxu1 }
0x1a54   :  { %v3133_v46 = vpop.f32.mrb[41].mxu1  ;;  %v3142_v47 = vadd.f32 %v4006_v45, %v3654_v44 }
0x1a55   :  { %v3134_v48 = vadd.f32 %v3654_v44, %v3133_v46  ;;  %v4007_v60 = vpop.f32.mrb[42].mxu1 }
0x1a56   :  { %v3136_v42 = vpop.f32.mrb[43].mxu1  ;;  %v3145_v50 = vadd.f32 %v4007_v60, %v3654_v44  ;;  %v3150_v1 = vadd.f32 %v3142_v47, %v4978_v57 }
0x1a57   :  { %v3137_v51 = vadd.f32 %v3654_v44, %v3136_v42  ;;  %v3148_v52 = vadd.f32 %v3134_v48, %v4954_v2 }
0x1a58   :  { %v3151_v7 = vadd.f32 %v3145_v50, %v4982_v58  ;;  %v3160_v61 = vsel %vm147_vm4, %v3150_v1, 0.0 }
0x1a59   :  { %v3154_v56 = vsel %vm147_vm4, %v3148_v52, 0.0  ;;  %v3149_v59 = vadd.f32 %v3137_v51, %v4958_v4 }
0x1a5a   :  { %3155 = vadd.xlane.f32.xlu1 %v3154_v56  ;;  %v3163_v62 = vsel %vm147_vm4, %v3151_v7, 0.0 }
0x1a5b   :  { %v3157_v35 = vsel %vm147_vm4, %v3149_v59, 0.0 }
0x1a5c   :  { %3158 = vadd.xlane.f32.xlu0 %v3157_v35  ;;  %v3306_v35 = vld [vmem:[%s5208_s19] sm:$0xff] }
0x1a5d   :  { %vm3310_vm12 = vcmp.ne.s32.totalorder %v3306_v35, 0 }
0x1a5e   :  { %3161 = vadd.xlane.f32.xlu1 %v3160_v61  ;;  %v3309_v61 = vld [vmem:[%s5208_s19 + $0x18] sm:$0xff] }
0x1a5f   :  { %vm3313_vm13 = vcmp.ne.s32.totalorder %v3309_v61, 0 }
0x1a60   :  { %3164 = vadd.xlane.f32.xlu0 %v3163_v62 }
0x1ae7   :  { %v3156_v16 = vpop.xlane.xlu1 %3155 }
0x1ae8   :  { %v3166_v2 = vmul.f32 0.03125, %v3156_v16 }
0x1ae9   :  { %v3159_v63 = vpop.xlane.xlu0 %3158 }
0x1aea   :  { %v3170_v0 = vsub.f32 %v3148_v52, %v3166_v2  ;;  %v3167_v3 = vmul.f32 0.03125, %v3159_v63 }
0x1aeb   :  { %v3162_v4 = vpop.xlane.xlu1 %3161 }
0x1aec   :  { %v3171_v5 = vsub.f32 %v3149_v59, %v3167_v3  ;;  %v3168_v57 = vmul.f32 0.03125, %v3162_v4  ;;  %v3174_v28 = vmul.f32 %v3170_v0, %v3170_v0  ;;  %v3308_v59 = vld [vmem:[%s5208_s19 + $0x10] sm:$0xff] }
0x1aed   :  { %v3165_v11 = vpop.xlane.xlu0 %3164  ;;  %vm3312_vm11 = vcmp.ne.s32.totalorder %v3308_v59, 0 }
0x1aee   :  { %v3172_v6 = vsub.f32 %v3150_v1, %v3168_v57  ;;  %v3169_v10 = vmul.f32 0.03125, %v3165_v11  ;;  %v3178_v58 = vsel %vm147_vm4, %v3174_v28, 0.0  ;;  %v3175_v22 = vmul.f32 %v3171_v5, %v3171_v5  ;;  %v3663_v1 = vld [vmem:[%s5207_s18] ss:$0 sm:$0xff] }
0x1aef   :  { %3179 = vadd.xlane.f32.xlu1 %v3178_v58  ;;  %v3366_v58 = vld [vmem:[%s5209_s20] sm:$0xff] }
0x1af0   :  { %v3173_v12 = vsub.f32 %v3151_v7, %v3169_v10  ;;  %v3181_v33 = vsel %vm147_vm4, %v3175_v22, 0.0  ;;  %v3176_v14 = vmul.f32 %v3172_v6, %v3172_v6  ;;  %v3367_v10 = vld [vmem:[%s5209_s20 + $0x8] sm:$0xff] }
0x1af1   :  { %3182 = vadd.xlane.f32.xlu0 %v3181_v33  ;;  %v3307_v22 = vld [vmem:[%s5208_s19 + $0x8] sm:$0xff] }
0x1af2   :  { %v3184_v15 = vsel %vm147_vm4, %v3176_v14, 0.0  ;;  %v3177_v18 = vmul.f32 %v3173_v12, %v3173_v12  ;;  %vm3311_vm14 = vcmp.ne.s32.totalorder %v3307_v22, 0 }
0x1af3   :  { %3185 = vadd.xlane.f32.xlu1 %v3184_v15  ;;  %v3368_v15 = vld [vmem:[%s5209_s20 + $0x10] sm:$0xff] }
0x1af4   :  { %v3187_v39 = vsel %vm147_vm4, %v3177_v18, 0.0  ;;  %v3369_v18 = vld [vmem:[%s5209_s20 + $0x18] sm:$0xff] }
0x1af5   :  { %3188 = vadd.xlane.f32.xlu0 %v3187_v39 }
0x1b7c   :  { %v3180_v37 = vpop.xlane.xlu1 %3179 }
0x1b7d   :  { %v3190_v17 = vmul.f32 0.03125, %v3180_v37 }
0x1b7e   :  { %v3183_v9 = vpop.xlane.xlu0 %3182 }
0x1b7f   :  { %v3194_v19 = vadd.f32 1e-05, %v3190_v17  ;;  %v3191_v20 = vmul.f32 0.03125, %v3183_v9 }
0x1b80   :  { %v3186_v21 = vpop.xlane.xlu1 %3185 }
0x1b81   :  { %4325 = vrsqrt.f32 %v3194_v19  ;;  %v3195_v23 = vadd.f32 1e-05, %v3191_v20  ;;  %v3192_v29 = vmul.f32 0.03125, %v3186_v21 }
0x1b82   :  { %v3189_v24 = vpop.xlane.xlu0 %3188 }
0x1b83   :  { %4327 = vrsqrt.f32 %v3195_v23  ;;  %v3196_v26 = vadd.f32 1e-05, %v3192_v29  ;;  %v3193_v30 = vmul.f32 0.03125, %v3189_v24 }
0x1b85   :  { %4329 = vrsqrt.f32 %v3196_v26  ;;  %v3197_v31 = vadd.f32 1e-05, %v3193_v30 }
0x1b87   :  { %4331 = vrsqrt.f32 %v3197_v31 }
0x1b8b   :  { %v4326_v32 = vpop.eup %4325 }
0x1b8c   :  { %v3202_v36 = vmul.f32 %v4326_v32, %v3170_v0 }
0x1b8d   :  { %v4328_v38 = vpop.eup %4327 }
0x1b8e   :  { %v3203_v27 = vmul.f32 %v4328_v38, %v3171_v5  ;;  %v3212_v40 = vmul.f32 %v3661_v34, %v3202_v36 }
0x1b8f   :  { %v4330_v41 = vpop.eup %4329 }
0x1b90   :  { %v3204_v53 = vmul.f32 %v4330_v41, %v3172_v6  ;;  %v3213_v44 = vmul.f32 %v3661_v34, %v3203_v27  ;;  %v3222_v48 = vadd.f32 %v3662_v43, %v3212_v40 }
0x1b91   :  { %v4332_v45 = vpop.eup %4331 }
0x1b92   :  { %v3214_v46 = vmul.f32 %v3661_v34, %v3204_v53  ;;  %v3205_v47 = vmul.f32 %v4332_v45, %v3173_v12  ;;  %v3223_v60 = vadd.f32 %v3662_v43, %v3213_v44 }
0x1b94   :  { %v3215_v42 = vmul.f32 %v3661_v34, %v3205_v47  ;;  %v3226_v50 = vpack.c.bf16 %v3223_v60, %v3222_v48  ;;  %v3224_v51 = vadd.f32 %v3662_v43, %v3214_v46 }
0x1b96   :  { %4012 = vmatprep.mubr.msk.bf16.mxu0 %vm147_vm4, %v3226_v50  ;;  %v3225_v52 = vadd.f32 %v3662_v43, %v3215_v42 }
0x1b98   :  { %v3227_v56 = vpack.c.bf16 %v3225_v52, %v3224_v51 }
0x1b9a   :  { %4013 = vmatmul.mubr.msk.bf16.vlgmr.msra.gmra.mrb[48].mxu0 %vm147_vm4, %v3227_v56 }
0x1c6d   :  { %v4014_v7 = vpop.f32.mrb[48].mxu0 }
0x1c6e   :  { %v3300_v62 = vadd.f32 %v4014_v7, %v3663_v1  ;;  %v3291_v16 = vpop.f32.mrb[49].mxu0 }
0x1c6f   :  { %v3292_v2 = vadd.f32 %v3663_v1, %v3291_v16  ;;  %v4015_v63 = vpop.f32.mrb[50].mxu0 }
0x1c70   :  { %v3316_v0 = vsel %vm3312_vm11, -1e+30, %v3300_v62  ;;  %v3303_v3 = vadd.f32 %v4015_v63, %v3663_v1  ;;  %v3294_v4 = vpop.f32.mrb[51].mxu0  ;;  %vm3410_vm11 = vcmask 7168  }
0x1c71   :  { %v5066_v5 = vsel %vm3310_vm12, -1e+30, %v3292_v2  ;;  %v3324_v57 = vsel %vm147_vm4, %v3316_v0, -inf  ;;  %v3295_v12 = vadd.f32 %v3663_v1, %v3294_v4 }
0x1c72   :  { %3325 = vmax.xlane.f32.xlu1 %v3324_v57  ;;  %v3318_v28 = vsel %vm147_vm4, %v5066_v5, -inf  ;;  %v5071_v11 = vsel %vm3313_vm13, -1e+30, %v3303_v3 }
0x1c73   :  { %3319 = vmax.xlane.f32.xlu0 %v3318_v28  ;;  %v3327_v6 = vsel %vm147_vm4, %v5071_v11, -inf  ;;  %v3315_v33 = vsel %vm3311_vm14, -1e+30, %v3295_v12 }
0x1c74   :  { %v3321_v14 = vsel %vm147_vm4, %v3315_v33, -inf }
0x1c77   :  { %3328 = vmax.xlane.f32.xlu0 %v3327_v6 }
0x1c83   :  { %3374 = vperm.xlu1 %4108, %v3367_v10  }
0x1c8d   :  { %3371 = vperm.xlu0 %4107, %v3366_v58  }
0x1ca7   :  { %3322 = vmax.xlane.f32.xlu1 %v3321_v14 }
0x1cb8   :  { %3377 = vperm.xlu1 %4108, %v3368_v15  }
0x1cbc   :  { %3380 = vperm.xlu1 %4108, %v3369_v18  }
0x1cff   :  { %v5091_v39 = vpop.xlane.xlu1 %3325 }
0x1d00   :  { %v3332_v25 = vsub.f32 %v3316_v0, %v5091_v39  ;;  %v5094_v49 = vpop.xlane.xlu0 %3319  ;;  %vm3432_vm1 = vcmp.eq.f32.partialorder %v3316_v0, %v5091_v39 }
0x1d01   :  { %v3330_v37 = vsub.f32 %v5066_v5, %v5094_v49  ;;  %vm3430_vm0 = vcmp.eq.f32.partialorder %v5066_v5, %v5094_v49  ;;  %v3436_v41 = vsel %vm3432_vm1, %v4504_v8, 32 }
0x1d02   :  { %v3338_v17 = vmul.f32 1.442695, %v3332_v25  ;;  %v3434_v32 = vsel %vm3430_vm0, %v4504_v8, 32  ;;  %v3468_v46 = vsel %vm147_vm4, %v3436_v41, 2147483647 }
0x1d03   :  { %v3334_v9 = vmul.f32 1.442695, %v3330_v37  ;;  %v3375_v19 = vpop.permute.xlu1 %3374  ;;  %v3438_v40 = vsel %vm147_vm4, %v3434_v32, 2147483647  ;;  %v3470_v48 = vshra.s32 %v3468_v46, 16  ;;  %v3469_v58 = vand.u32 65535, %v3468_v46 }
0x1d04   :  { %4333 = vpow2.f32 %v3338_v17  ;;  %vm3383_vm15 = vcmp.eq.s32.totalorder %v3375_v19, %v4504_v8  ;;  %v5102_v30 = vpop.xlane.xlu0 %3328  ;;  %v3440_v44 = vshra.s32 %v3438_v40, 16  ;;  %v78_v17 = vadd.s32 24, %v4601_v54 }
0x1d05   :  { %4335 = vpow2.f32 %v3334_v9  ;;  %v3387_v24 = vsel %vm3383_vm15, %v3315_v33, 0.0  ;;  %v3333_v31 = vsub.f32 %v5071_v11, %v5102_v30  ;;  %v3472_v60 = vcvt.s32.f32 %v3470_v48 }
0x1d06   :  { %v3393_v26 = vsel %vm147_vm4, %v3387_v24, 0.0  ;;  %v3442_v47 = vcvt.s32.f32 %v3440_v44  ;;  %vm3433_vm6 = vcmp.eq.f32.partialorder %v5071_v11, %v5102_v30  ;;  %v3471_v14 = vcvt.s32.f32 %v3469_v58 }
0x1d07   :  { %v3340_v38 = vmul.f32 1.442695, %v3333_v31  ;;  %v3437_v62 = vsel %vm3433_vm6, %v4504_v8, 32  ;;  %v80_v9 = vand.u32 15, %v4604_v55 }
0x1d09   :  { %vm84_vm9 = vcmp.lt.s32.totalorder %v80_v9, 15 }
0x1d0c   :  { %v3372_v50 = vpop.permute.xlu0 %3371 }
0x1d0d   :  { %vm3382_vm3 = vcmp.eq.s32.totalorder %v3372_v50, %v4504_v8 }
0x1d0e   :  { %v4334_v20 = vpop.eup %4333  ;;  %v3386_v1 = vsel %vm3382_vm3, %v5066_v5, 0.0 }
0x1d0f   :  { %v4336_v21 = vpop.eup %4335  ;;  %v3348_v23 = vsel %vm147_vm4, %v4334_v20, 0.0  ;;  %v3390_v7 = vsel %vm147_vm4, %v3386_v1, 0.0 }
0x1d10   :  { %3349 = vadd.xlane.f32.xlu0 %v3348_v23  ;;  %v3342_v29 = vsel %vm147_vm4, %v4336_v21, 0.0 }
0x1d11   :  { %3343 = vadd.xlane.f32.xlu1 %v3342_v29  ;;  %v82_v29 = vand.u32 15, %v78_v17 }
0x1d13   :  { %vm86_vm10 = vcmp.lt.s32.totalorder %v82_v29, 15 }
0x1d15   :  { %3394 = vadd.xlane.f32.xlu1 %v3393_v26 }
0x1d34   :  { %v5109_v34 = vpop.xlane.xlu1 %3322 }
0x1d35   :  { %v3331_v36 = vsub.f32 %v3315_v33, %v5109_v34  ;;  %vm3431_vm5 = vcmp.eq.f32.partialorder %v3315_v33, %v5109_v34 }
0x1d36   :  { %v3435_v35 = vsel %vm3431_vm5, %v4504_v8, 32 }
0x1d37   :  { %v3336_v27 = vmul.f32 1.442695, %v3331_v36  ;;  %v5129_v61 = vsel %vm147_vm4, %v3435_v35, 2147483647 }
0x1d38   :  { %v3378_v43 = vpop.permute.xlu1 %3377  ;;  %v3455_v2 = vshra.s32 %v5129_v61, 16 }
0x1d39   :  { %4337 = vpow2.f32 %v3336_v27  ;;  %vm3384_vm2 = vcmp.eq.s32.totalorder %v3378_v43, %v4504_v8 }
0x1d3a   :  { %v3388_v53 = vsel %vm3384_vm2, %v3316_v0, 0.0  ;;  %4339 = vpow2.f32 %v3340_v38  ;;  %v5136_v0 = vsel %vm147_vm4, %v3437_v62, 2147483647  ;;  %v5138_v3 = vcvt.s32.f32 %v3455_v2 }
0x1d3b   :  { %v3396_v45 = vsel %vm147_vm4, %v3388_v53, 0.0  ;;  %v3485_v4 = vshra.s32 %v5136_v0, 16  ;;  %v3519_v38 = vsel %vm84_vm9, 1.0, %v4362_v13 }
0x1d3c   :  { %3397 = vadd.xlane.f32.xlu1 %v3396_v45  ;;  %v3381_v56 = vpop.permute.xlu1 %3380  ;;  %v3520_v45 = vsel %vm86_vm10, 1.0, %v4362_v13 }
0x1d3d   :  { %vm3385_vm7 = vcmp.eq.s32.totalorder %v3381_v56, %v4504_v8  ;;  %v5142_v5 = vcvt.s32.f32 %v3485_v4 }
0x1d3e   :  { %v3389_v16 = vsel %vm3385_vm7, %v5071_v11, 0.0  ;;  %v3439_v11 = vand.u32 65535, %v3438_v40 }
0x1d3f   :  { %v3399_v63 = vsel %vm147_vm4, %v3389_v16, 0.0 }
0x1d40   :  { %3443 = vmin.xlane.f32.xlu1 %v3442_v47  ;;  %v3441_v10 = vcvt.s32.f32 %v3439_v11 }
0x1d43   :  { %v4338_v42 = vpop.eup %4337 }
0x1d44   :  { %3473 = vmin.xlane.f32.xlu1 %v3472_v60  ;;  %v3345_v51 = vsel %vm147_vm4, %v4338_v42, 0.0  ;;  %v4340_v52 = vpop.eup %4339 }
0x1d45   :  { %3346 = vadd.xlane.f32.xlu0 %v3345_v51  ;;  %v3351_v59 = vsel %vm147_vm4, %v4340_v52, 0.0  ;;  %v3454_v51 = vand.u32 65535, %v5129_v61 }
0x1d49   :  { %3352 = vadd.xlane.f32.xlu0 %v3351_v59  ;;  %v3484_v59 = vand.u32 65535, %v5136_v0 }
0x1d4b   :  { %v3486_v1 = vcvt.s32.f32 %v3484_v59 }
0x1d4d   :  { %3391 = vadd.xlane.f32.xlu0 %v3390_v7 }
0x1d51   :  { %3400 = vadd.xlane.f32.xlu0 %v3399_v63 }
0x1d55   :  { %3458 = vmin.xlane.f32.xlu0 %v5138_v3 }
0x1d59   :  { %3488 = vmin.xlane.f32.xlu0 %v5142_v5 }
0x1d9d   :  { %v3350_v22 = vpop.xlane.xlu0 %3349 }
0x1d9e   :  { %v3344_v8 = vpop.xlane.xlu1 %3343 }
0x1d9f   :  { %4341 = vlog2.f32 %v3344_v8 }
0x1da0   :  { %4343 = vlog2.f32 %v3350_v22 }
0x1da2   :  { %v3395_v57 = vpop.xlane.xlu1 %3394 }
0x1da9   :  { %v4342_v37 = vpop.eup %4341 }
0x1daa   :  { %v4344_v19 = vpop.eup %4343  ;;  %v3355_v20 = vmul.f32 0.6931472, %v4342_v37 }
0x1dab   :  { %v3359_v24 = vmul.f32 0.6931472, %v4344_v19 }
0x1dac   :  { %v3362_v32 = vadd.f32 %v3355_v20, %v5094_v49 }
0x1dad   :  { %v3364_v54 = vadd.f32 %v3359_v24, %v5091_v39 }
0x1dc9   :  { %v3398_v28 = vpop.xlane.xlu1 %3397 }
0x1dca   :  { %v3404_v43 = vsub.f32 %v3364_v54, %v3398_v28 }
0x1dcc   :  { %v3414_v48 = vsel %vm3410_vm11, %v3404_v43, 0.0 }
0x1dcd   :  { %v5145_v6 = vpop.xlane.xlu1 %3443 }
0x1dce   :  { %vm3445_vm4 = vcmp.eq.f32.partialorder %v3442_v47, %v5145_v6  ;;  %v3450_v7 = vcvt.f32.s32 %v5145_v6 }
0x1dcf   :  { %v3446_v12 = vsel %vm3445_vm4, %v3441_v10, inf }
0x1dd0   :  { %3447 = vmin.xlane.f32.xlu0 %v3446_v12  ;;  %v3451_v16 = vshll.u32 %v3450_v7, 16 }
0x1dd1   :  { %v5148_v33 = vpop.xlane.xlu1 %3473 }
0x1dd2   :  { %vm3475_vm8 = vcmp.eq.f32.partialorder %v3472_v60, %v5148_v33  ;;  %v3347_v15 = vpop.xlane.xlu0 %3346  ;;  %v3480_v61 = vcvt.f32.s32 %v5148_v33 }
0x1dd3   :  { %4345 = vlog2.f32 %v3347_v15  ;;  %v3476_v18 = vsel %vm3475_vm8, %v3471_v14, inf }
0x1dd4   :  { %3477 = vmin.xlane.f32.xlu0 %v3476_v18  ;;  %v3481_v4 = vshll.u32 %v3480_v61, 16 }
0x1dd6   :  { %v3353_v25 = vpop.xlane.xlu0 %3352 }
0x1dd7   :  { %4347 = vlog2.f32 %v3353_v25 }
0x1dda   :  { %v3392_v21 = vpop.xlane.xlu0 %3391 }
0x1ddb   :  { %v3402_v40 = vsub.f32 %v3362_v32, %v3392_v21 }
0x1ddd   :  { %v4346_v23 = vpop.eup %4345  ;;  %v3411_v46 = vsel %vm3410_vm11, %v3402_v40, 0.0 }
0x1dde   :  { %v3357_v26 = vmul.f32 0.6931472, %v4346_v23  ;;  %v3401_v41 = vpop.xlane.xlu0 %3400 }
0x1de0   :  { %v3363_v31 = vadd.f32 %v3357_v26, %v5109_v34 }
0x1de1   :  { %v4348_v36 = vpop.eup %4347 }
0x1de2   :  { %v3403_v27 = vsub.f32 %v3363_v31, %v3395_v57  ;;  %v3361_v55 = vmul.f32 0.6931472, %v4348_v36  ;;  %v3459_v42 = vpop.xlane.xlu0 %3458 }
0x1de3   :  { %vm3460_vm12 = vcmp.eq.f32.partialorder %v5138_v3, %v3459_v42  ;;  %v3465_v57 = vcvt.f32.s32 %v3459_v42 }
0x1de4   :  { %v3407_v53 = vmul.f32 %v3519_v38, %v3403_v27  ;;  %v3365_v44 = vadd.f32 %v3361_v55, %v5102_v30  ;;  %v3456_v30 = vcvt.s32.f32 %v3454_v51 }
0x1de5   :  { %v3466_v10 = vshll.u32 %v3465_v57, 16 }
0x1de6   :  { %v3412_v34 = vsel %vm3410_vm11, %v3407_v53, 0.0  ;;  %v3405_v49 = vsub.f32 %v3365_v44, %v3401_v41  ;;  %v3489_v56 = vpop.xlane.xlu0 %3488  ;;  %v3461_v13 = vsel %vm3460_vm12, %v3456_v30, inf }
0x1de7   :  { %v3413_v47 = vadd.f32 %v3412_v34, %v3411_v46  ;;  %vm3490_vm13 = vcmp.eq.f32.partialorder %v5142_v5, %v3489_v56  ;;  %v3495_v58 = vcvt.f32.s32 %v3489_v56 }
0x1de8   :  { %v3409_v60 = vmul.f32 %v3520_v45, %v3405_v49  ;;  %v3491_v35 = vsel %vm3490_vm13, %v3486_v1, inf }
0x1de9   :  { %v3415_v50 = vadd.f32 %v3414_v48, %v3413_v47  ;;  %v3496_v18 = vshll.u32 %v3495_v58, 16 }
0x1dea   :  { %v3416_v39 = vsel %vm3410_vm11, %v3409_v60, 0.0 }
0x1deb   :  { %v3417_v52 = vadd.f32 %v3416_v39, %v3415_v50 }
0x1ded   :  { %3418 = vadd.xlane.f32.xlu1 %v3417_v52 }
0x1df1   :  { %3462 = vmin.xlane.f32.xlu1 %v3461_v13 }
0x1df5   :  { %3492 = vmin.xlane.f32.xlu1 %v3491_v35 }
0x1e5d   :  { %v3448_v62 = vpop.xlane.xlu0 %3447 }
0x1e5e   :  { %v3449_v2 = vcvt.f32.s32 %v3448_v62 }
0x1e60   :  { %v3452_v63 = vadd.s32 %v3451_v16, %v3449_v2 }
0x1e61   :  { %v3478_v3 = vpop.xlane.xlu0 %3477 }
0x1e62   :  { %3498 = vst [vmem:[%s5211_s22] sm:$0xff] %v3452_v63  ;;  %v3479_v0 = vcvt.f32.s32 %v3478_v3 }
0x1e64   :  { %v3482_v5 = vadd.s32 %v3481_v4, %v3479_v0 }
0x1e66   :  { %3500 = vst [vmem:[%s5211_s22 + $0x10] sm:$0xff] %v3482_v5 }
0x1e7a   :  { %v3419_v8 = vpop.xlane.xlu1 %3418 }
0x1e7b   :  { %v3420_v28 = vrot.slane %v3419_v8, 4 }
0x1e7d   :  { %v3421_v11 = vadd.f32 %v3420_v28, %v3419_v8 }
0x1e7e   :  { %v3463_v6 = vpop.xlane.xlu1 %3462 }
0x1e7f   :  { %v3422_v22 = vrot.slane %v3421_v11, 2  ;;  %v3464_v12 = vcvt.f32.s32 %v3463_v6 }
0x1e81   :  { %v3467_v33 = vadd.s32 %v3466_v10, %v3464_v12  ;;  %v3423_v14 = vadd.f32 %v3422_v22, %v3421_v11 }
0x1e82   :  { %v3493_v15 = vpop.xlane.xlu1 %3492 }
0x1e83   :  { %3499 = vst [vmem:[%s5211_s22 + $0x8] sm:$0xff] %v3467_v33  ;;  %v3494_v25 = vcvt.f32.s32 %v3493_v15  ;;  %v3424_v37 = vrot.slane %v3423_v14, 1 }
0x1e85   :  { %v3497_v17 = vadd.s32 %v3496_v18, %v3494_v25  ;;  %v3425_v9 = vadd.f32 %v3424_v37, %v3423_v14 }
0x1e87   :  { %3501 = vst [vmem:[%s5211_s22 + $0x18] sm:$0xff] %v3497_v17  ;;  %4096 = vpush %v3425_v9 }
0x1eb8   :  { %s4097_s2 = spop %4096 }
0x1eb9   :  { %s3427_s27 = smul.f32 0.033333335, %s4097_s2 }
0x1ebb   :  { %3429 = sst [smem:[#allocation2]] %s3427_s27 }
0x1ebc   :  { %4358 = shalt.err (!%p4355_p2)
}
0x1ebd   :  { %s4369_s10 = smov [#allocation2]  }
0x1ebe   :  { %3509 = dma.smem_to_hbm %s4369_s10, 16, %s5210_s21, [#allocation3]  }
0x1ebf   :  { %4359 = dma.done.wait [#allocation3], 16  }
0x1ec0   :  { %4360 = vsyncadd [#allocation3], 4294967280 }
0x1ec1   :  { %3517 = sfence }
0x1ec2   :  { %3518 = vsyncpa [#allocation3], 1 }

</bundles_post_ra>
